<compile_context>
chip_gen: v7x
topology: tpu7x:2x2x1
jax: 0.10.0
libtpu: 0.0.40
codegen_flags: <defaults>
</compile_context>

<pallas_src>
import jax
import jax.numpy as jnp
from jax.experimental import pallas as pl
from jax.experimental.pallas import tpu as pltpu

BLOCK_B_MAX = 64   # samples per grid step (multiple of 8), tunable per generation


# ---------------------------------------------------------------------------
# math helpers on plain jnp values (shared by the kernel and the reference)
# ---------------------------------------------------------------------------
def _layer(x, w, shift):
    """One Conv1d(k=3,pad=1) + BN(eval) + ELU + MaxPool1d(3,3) block.

    x     : (L, Bb, Cin)  time-major activations (any float dtype)
    w     : (3*Cin, Cout) bf16 conv weight with the BN scale folded in
    shift : (1, Cout)     f32 folded conv-bias + BN shift
    returns (L//3, Bb, Cout) f32
    """
    L, Bb, Cin = x.shape
    xb = x.astype(jnp.bfloat16)
    z = jnp.zeros((1, Bb, Cin), jnp.bfloat16)
    taps = jnp.concatenate(
        [jnp.concatenate([z, xb[:-1]], axis=0),     # x[t-1]  (zero pad at t=0)
         xb,                                        # x[t]
         jnp.concatenate([xb[1:], z], axis=0)],     # x[t+1]  (zero pad at t=L-1)
        axis=2)                                     # (L, Bb, 3*Cin)

    y = jnp.dot(taps.reshape(L * Bb, 3 * Cin), w,
                preferred_element_type=jnp.float32)            # (L*Bb, Cout)
    cout = y.shape[1]
    lp = L // 3
    # MaxPool1d(3,3): leading-axis regroup + 3-way elementwise max (drops remainder)
    y = y.reshape(L, Bb, cout)[:3 * lp].reshape(lp, 3, Bb, cout)
    y = jnp.maximum(jnp.maximum(y[:, 0], y[:, 1]), y[:, 2])    # (lp, Bb, Cout)
    # BN shift + ELU after the pool (both commute with max; 3x fewer exp's)
    y = y + shift
    return jnp.where(y > 0.0, y, jnp.exp(jnp.minimum(y, 0.0)) - 1.0)


def _head(act, dw1_stack, db1, dw2, db2):
    """PyTorch channel-major flatten + dense1/ReLU + dense2 (eval dropout = id).

    act       : (Lf, Bb, 200) f32
    dw1_stack : (Lf, 200, U) bf16  (dense1 weight re-sliced per time position)
    db1       : (1, U) f32, dw2 : (1, U) f32, db2 : (1, 1) f32
    returns (Bb, 1) f32
    """
    acc = jnp.dot(act[0].astype(jnp.bfloat16), dw1_stack[0],
                  preferred_element_type=jnp.float32)
    for t in range(1, act.shape[0]):
        acc = acc + jnp.dot(act[t].astype(jnp.bfloat16), dw1_stack[t],
                            preferred_element_type=jnp.float32)
    h = jnp.maximum(acc + db1, 0.0)                               # ReLU(dense1)
    # dense2 has a single output unit -> VPU multiply + lane reduce (no MXU pass)
    return jnp.sum(h * dw2, axis=1, keepdims=True) + db2          # (Bb, 1)


# ---------------------------------------------------------------------------
# Pallas kernel: one batch tile per grid step, whole forward pass fused
# ---------------------------------------------------------------------------
def eegnet_kernel(x_ref,
                  w1, t1, w2, t2, w3, t3, w4, t4,
                  dw1, db1, dw2, db2,
                  out_ref):
    xs = x_ref[...]                                   # (L, Bb, 4) bf16
    for w_ref, sh_ref in ((w1, t1), (w2, t2), (w3, t3), (w4, t4)):
        xs = _layer(xs, w_ref[...], sh_ref[...])
    out_ref[...] = _head(xs, dw1[...], db1[...], dw2[...], db2[...])


def eegnet_forward(x_ncw, params, *, block_b_max=BLOCK_B_MAX):
    """x_ncw: (B, 4, L) float32 (PyTorch NCW).  Returns (B, 1) float32."""
    B, cin, L = x_ncw.shape
    # block size: multiple of 8, capped, and aim for >= 2 grid steps (v7x: 2 TCs)
    half = -(-B // 2)
    block_b = max(8, min(block_b_max, ((half + 7) // 8) * 8))
    b_pad = (-B) % block_b
    grid_b = (B + b_pad) // block_b

    # time-major, bf16 input slab (layout plumbing only)
    x_t = jnp.transpose(x_ncw, (2, 0, 1)).astype(jnp.bfloat16)    # (L, B, 4)
    if b_pad:
        x_t = jnp.concatenate(
            [x_t, jnp.zeros((L, b_pad, cin), x_t.dtype)], axis=1)

    def const_spec(a):
        return pl.BlockSpec(a.shape, lambda g, _n=a.ndim: (0,) * _n)

    in_specs = [pl.BlockSpec((L, block_b, cin), lambda g: (0, g, 0))]
    in_specs += [const_spec(p) for p in params]
    out_spec = pl.BlockSpec((block_b, 1), lambda g: (g, 0))

    out = pl.pallas_call(
        eegnet_kernel,
        out_shape=jax.ShapeDtypeStruct((B + b_pad, 1), jnp.float32),
        grid=(grid_b,),
        in_specs=in_specs,
        out_specs=out_spec,
        compiler_params=pltpu.CompilerParams(
            dimension_semantics=("parallel",)),
    )(x_t, *params)
    return out[:B]


# ---------------------------------------------------------------------------
# parameter construction (PyTorch layouts) + folding into kernel-ready form
# ---------------------------------------------------------------------------
def init_raw_params(key, tensor_length, n_units):
    """Deterministic params in PyTorch layouts: Conv1d (Cout,Cin,3), Linear (out,in)."""
    lf = tensor_length
    for _ in range(4):
        lf //= 3
    dense_in = 200 * lf
    chans = [(4, 25), (25, 50), (50, 100), (100, 200)]
    keys = jax.random.split(key, 6 * 4 + 4)
    raw = {"convs": [], "bns": []}
    ki = 0
    for (ci, co) in chans:
        w = jax.random.normal(keys[ki], (co, ci, 3), jnp.float32) / jnp.sqrt(3.0 * ci); ki += 1
        b = 0.1 * jax.random.normal(keys[ki], (co,), jnp.float32); ki += 1
        gamma = 1.0 + 0.1 * jax.random.normal(keys[ki], (co,), jnp.float32); ki += 1
        beta = 0.1 * jax.random.normal(keys[ki], (co,), jnp.float32); ki += 1
        mean = 0.1 * jax.random.normal(keys[ki], (co,), jnp.float32); ki += 1
        var = 1.0 + jnp.abs(jax.random.normal(keys[ki], (co,), jnp.float32)); ki += 1
        raw["convs"].append((w, b))
        raw["bns"].append((gamma, beta, mean, var))
    raw["dense1"] = (jax.random.normal(keys[ki], (n_units, dense_in), jnp.float32)
                     / jnp.sqrt(float(dense_in)),
                     0.1 * jax.random.normal(keys[ki + 1], (n_units,), jnp.float32))
    raw["dense2"] = (jax.random.normal(keys[ki + 2], (1, n_units), jnp.float32)
                     / jnp.sqrt(float(n_units)),
                     0.1 * jax.random.normal(keys[ki + 3], (1,), jnp.float32))
    return raw


def prepare_params(raw, tensor_length, eps=1e-5):
    """Fold BN(eval)+bias into the conv weights/shift, re-slice dense1, cast MXU
    operands to bf16."""
    params = []
    for (w, b), (gamma, beta, mean, var) in zip(raw["convs"], raw["bns"]):
        co, ci, _ = w.shape
        scale = gamma / jnp.sqrt(var + eps)                       # (co,)
        shift = beta + (b - mean) * scale                         # (co,)
        # tap row index k*Cin + c matches the [x[t-1], x[t], x[t+1]] lane-concat order
        w_fused = jnp.transpose(w, (2, 1, 0)).reshape(3 * ci, co)
        params += [(w_fused * scale[None, :]).astype(jnp.bfloat16),
                   shift.reshape(1, co).astype(jnp.float32)]

    lf = tensor_length
    for _ in range(4):
        lf //= 3
    w1, b1 = raw["dense1"]                 # (U, 200*lf), (U,)
    w2, b2 = raw["dense2"]                 # (1, U), (1,)
    n_units = w1.shape[0]
    # PyTorch flatten index is c*lf + t; re-slice so the kernel can sum over t
    w1t = jnp.transpose(w1)                                        # (200*lf, U)
    dw1_stack = jnp.transpose(w1t.reshape(200, lf, n_units), (1, 0, 2))  # (lf, 200, U)
    params += [dw1_stack.astype(jnp.bfloat16),
               b1.reshape(1, n_units).astype(jnp.float32),
               w2.reshape(1, n_units).astype(jnp.float32),
               b2.reshape(1, 1).astype(jnp.float32)]
    return params


def reference_forward(x_ncw, params):
    """Pure-JAX (non-Pallas) reference mirroring the kernel math exactly."""
    (w1, t1, w2, t2, w3, t3, w4, t4, dw1, db1, dw2, db2) = params
    x = jnp.transpose(x_ncw, (2, 0, 1)).astype(jnp.bfloat16)       # (L, B, 4)
    for w, t in ((w1, t1), (w2, t2), (w3, t3), (w4, t4)):
        x = _layer(x, w, t)
    return _head(x, dw1, db1, dw2, db2)                            # (B, 1)


if __name__ == "__main__":
    tensor_length, n_units = 81, 32      # 81 -> 27 -> 9 -> 3 -> 1 after the 4 pools
    B, Cin = 20, 4                       # exercises batch padding AND a 2-step grid
    key = jax.random.PRNGKey(0)
    kx, kp = jax.random.split(key)
    x = jax.random.normal(kx, (B, Cin, tensor_length), jnp.float32)
    params = prepare_params(init_raw_params(kp, tensor_length, n_units), tensor_length)

    out = jax.block_until_ready(eegnet_forward(x, params))
    ref = reference_forward(x, params)

    assert out.shape == (B, 1), out.shape
    assert bool(jnp.all(jnp.isfinite(out)))
    assert jnp.allclose(out, ref, rtol=2e-3, atol=2e-3), (out, ref)
    print("KERNEL_OK")
</pallas_src>

<mosaic_0001>
module attributes {stable_mosaic.version = 11 : i64} {
  func.func @eegnet_kernel(%arg0: i32, %arg1: memref<81x16x4xbf16, #tpu.memory_space<vmem>>, %arg2: memref<12x25xbf16, #tpu.memory_space<vmem>>, %arg3: memref<1x25xf32, #tpu.memory_space<vmem>>, %arg4: memref<75x50xbf16, #tpu.memory_space<vmem>>, %arg5: memref<1x50xf32, #tpu.memory_space<vmem>>, %arg6: memref<150x100xbf16, #tpu.memory_space<vmem>>, %arg7: memref<1x100xf32, #tpu.memory_space<vmem>>, %arg8: memref<300x200xbf16, #tpu.memory_space<vmem>>, %arg9: memref<1x200xf32, #tpu.memory_space<vmem>>, %arg10: memref<1x200x32xbf16, #tpu.memory_space<vmem>>, %arg11: memref<1x32xf32, #tpu.memory_space<vmem>>, %arg12: memref<1x32xf32, #tpu.memory_space<vmem>>, %arg13: memref<1x1xf32, #tpu.memory_space<vmem>>, %arg14: memref<16x1xf32, #tpu.memory_space<vmem>>) attributes {dimension_semantics = [#tpu.dimension_semantics<parallel>], iteration_bounds = array<i64: 2>, scalar_prefetch = 0 : i64, scratch_operands = 0 : i64, tpu.core_type = #tpu.core_type<tc>, window_params = [{transform_indices = @transform_0, window_bounds = array<i64: 81, 16, 4>}, {pipeline_mode = #tpu.pipeline_mode<synchronous>, transform_indices = @transform_1, window_bounds = array<i64: 12, 25>}, {pipeline_mode = #tpu.pipeline_mode<synchronous>, transform_indices = @transform_2, window_bounds = array<i64: 1, 25>}, {pipeline_mode = #tpu.pipeline_mode<synchronous>, transform_indices = @transform_3, window_bounds = array<i64: 75, 50>}, {pipeline_mode = #tpu.pipeline_mode<synchronous>, transform_indices = @transform_4, window_bounds = array<i64: 1, 50>}, {pipeline_mode = #tpu.pipeline_mode<synchronous>, transform_indices = @transform_5, window_bounds = array<i64: 150, 100>}, {pipeline_mode = #tpu.pipeline_mode<synchronous>, transform_indices = @transform_6, window_bounds = array<i64: 1, 100>}, {pipeline_mode = #tpu.pipeline_mode<synchronous>, transform_indices = @transform_7, window_bounds = array<i64: 300, 200>}, {pipeline_mode = #tpu.pipeline_mode<synchronous>, transform_indices = @transform_8, window_bounds = array<i64: 1, 200>}, {pipeline_mode = #tpu.pipeline_mode<synchronous>, transform_indices = @transform_9, window_bounds = array<i64: 1, 200, 32>}, {pipeline_mode = #tpu.pipeline_mode<synchronous>, transform_indices = @transform_10, window_bounds = array<i64: 1, 32>}, {pipeline_mode = #tpu.pipeline_mode<synchronous>, transform_indices = @transform_11, window_bounds = array<i64: 1, 32>}, {pipeline_mode = #tpu.pipeline_mode<synchronous>, transform_indices = @transform_12, window_bounds = array<i64: 1, 1>}, {transform_indices = @transform_13, window_bounds = array<i64: 16, 1>}]} {
    %c0 = arith.constant 0 : index
    %c0_0 = arith.constant 0 : index
    %c0_1 = arith.constant 0 : index
    %0 = vector.load %arg1[%c0, %c0_0, %c0_1] : memref<81x16x4xbf16, #tpu.memory_space<vmem>>, vector<81x16x4xbf16>
    %c0_2 = arith.constant 0 : index
    %c0_3 = arith.constant 0 : index
    %1 = vector.load %arg2[%c0_2, %c0_3] : memref<12x25xbf16, #tpu.memory_space<vmem>>, vector<12x25xbf16>
    %c0_4 = arith.constant 0 : index
    %c0_5 = arith.constant 0 : index
    %2 = vector.load %arg3[%c0_4, %c0_5] : memref<1x25xf32, #tpu.memory_space<vmem>>, vector<1x25xf32>
    %cst = arith.constant 0.000000e+00 : bf16
    %3 = vector.broadcast %cst : bf16 to vector<1x16x4xbf16>
    %4 = vector.extract_strided_slice %0 {offsets = [0, 0, 0], sizes = [80, 16, 4], strides = [1, 1, 1]} : vector<81x16x4xbf16> to vector<80x16x4xbf16>
    %5 = tpu.concatenate %3, %4 in 0 : vector<1x16x4xbf16>, vector<80x16x4xbf16> -> vector<81x16x4xbf16>
    %6 = vector.extract_strided_slice %0 {offsets = [1, 0, 0], sizes = [80, 16, 4], strides = [1, 1, 1]} : vector<81x16x4xbf16> to vector<80x16x4xbf16>
    %7 = tpu.concatenate %6, %3 in 0 : vector<80x16x4xbf16>, vector<1x16x4xbf16> -> vector<81x16x4xbf16>
    %8 = tpu.concatenate %5, %0, %7 in 2 : vector<81x16x4xbf16>, vector<81x16x4xbf16>, vector<81x16x4xbf16> -> vector<81x16x12xbf16>
    %9 = vector.shape_cast %8 : vector<81x16x12xbf16> to vector<1296x12xbf16>
    %cst_6 = arith.constant dense<0.000000e+00> : vector<1296x25xf32>
    %10 = tpu.matmul %9, %1, %cst_6 {dimension_numbers = #tpu.dot_dimension_numbers<[1], [0], [0], [1], [0, 0, 1, 1], [], []>} : vector<1296x12xbf16>, vector<12x25xbf16>, vector<1296x25xf32> -> vector<1296x25xf32>
    %11 = vector.shape_cast %10 : vector<1296x25xf32> to vector<81x16x25xf32>
    %12 = vector.shape_cast %11 : vector<81x16x25xf32> to vector<27x3x16x25xf32>
    %13 = vector.extract_strided_slice %12 {offsets = [0, 0, 0, 0], sizes = [27, 1, 16, 25], strides = [1, 1, 1, 1]} : vector<27x3x16x25xf32> to vector<27x1x16x25xf32>
    %14 = vector.shape_cast %13 : vector<27x1x16x25xf32> to vector<27x16x25xf32>
    %15 = vector.extract_strided_slice %12 {offsets = [0, 1, 0, 0], sizes = [27, 1, 16, 25], strides = [1, 1, 1, 1]} : vector<27x3x16x25xf32> to vector<27x1x16x25xf32>
    %16 = vector.shape_cast %15 : vector<27x1x16x25xf32> to vector<27x16x25xf32>
    %17 = arith.maximumf %14, %16 : vector<27x16x25xf32>
    %18 = vector.extract_strided_slice %12 {offsets = [0, 2, 0, 0], sizes = [27, 1, 16, 25], strides = [1, 1, 1, 1]} : vector<27x3x16x25xf32> to vector<27x1x16x25xf32>
    %19 = vector.shape_cast %18 : vector<27x1x16x25xf32> to vector<27x16x25xf32>
    %20 = arith.maximumf %17, %19 : vector<27x16x25xf32>
    %21 = vector.shape_cast %2 : vector<1x25xf32> to vector<1x1x25xf32>
    %22 = vector.broadcast %21 : vector<1x1x25xf32> to vector<27x16x25xf32>
    %23 = arith.addf %20, %22 : vector<27x16x25xf32>
    %cst_7 = arith.constant 0.000000e+00 : f32
    %24 = vector.broadcast %cst_7 : f32 to vector<27x16x25xf32>
    %25 = arith.cmpf ogt, %23, %24 : vector<27x16x25xf32>
    %cst_8 = arith.constant 0.000000e+00 : f32
    %26 = vector.broadcast %cst_8 : f32 to vector<27x16x25xf32>
    %27 = arith.minimumf %23, %26 : vector<27x16x25xf32>
    %28 = math.exp %27 : vector<27x16x25xf32>
    %cst_9 = arith.constant 1.000000e+00 : f32
    %29 = vector.broadcast %cst_9 : f32 to vector<27x16x25xf32>
    %30 = arith.subf %28, %29 : vector<27x16x25xf32>
    %31 = arith.select %25, %23, %30 : vector<27x16x25xi1>, vector<27x16x25xf32>
    %c0_10 = arith.constant 0 : index
    %c0_11 = arith.constant 0 : index
    %32 = vector.load %arg4[%c0_10, %c0_11] : memref<75x50xbf16, #tpu.memory_space<vmem>>, vector<75x50xbf16>
    %c0_12 = arith.constant 0 : index
    %c0_13 = arith.constant 0 : index
    %33 = vector.load %arg5[%c0_12, %c0_13] : memref<1x50xf32, #tpu.memory_space<vmem>>, vector<1x50xf32>
    %34 = arith.truncf %31 : vector<27x16x25xf32> to vector<27x16x25xbf16>
    %cst_14 = arith.constant 0.000000e+00 : bf16
    %35 = vector.broadcast %cst_14 : bf16 to vector<1x16x25xbf16>
    %36 = vector.extract_strided_slice %34 {offsets = [0, 0, 0], sizes = [26, 16, 25], strides = [1, 1, 1]} : vector<27x16x25xbf16> to vector<26x16x25xbf16>
    %37 = tpu.concatenate %35, %36 in 0 : vector<1x16x25xbf16>, vector<26x16x25xbf16> -> vector<27x16x25xbf16>
    %38 = vector.extract_strided_slice %34 {offsets = [1, 0, 0], sizes = [26, 16, 25], strides = [1, 1, 1]} : vector<27x16x25xbf16> to vector<26x16x25xbf16>
    %39 = tpu.concatenate %38, %35 in 0 : vector<26x16x25xbf16>, vector<1x16x25xbf16> -> vector<27x16x25xbf16>
    %40 = tpu.concatenate %37, %34, %39 in 2 : vector<27x16x25xbf16>, vector<27x16x25xbf16>, vector<27x16x25xbf16> -> vector<27x16x75xbf16>
    %41 = vector.shape_cast %40 : vector<27x16x75xbf16> to vector<432x75xbf16>
    %cst_15 = arith.constant dense<0.000000e+00> : vector<432x50xf32>
    %42 = tpu.matmul %41, %32, %cst_15 {dimension_numbers = #tpu.dot_dimension_numbers<[1], [0], [0], [1], [0, 0, 1, 1], [], []>} : vector<432x75xbf16>, vector<75x50xbf16>, vector<432x50xf32> -> vector<432x50xf32>
    %43 = vector.shape_cast %42 : vector<432x50xf32> to vector<27x16x50xf32>
    %44 = vector.shape_cast %43 : vector<27x16x50xf32> to vector<9x3x16x50xf32>
    %45 = vector.extract_strided_slice %44 {offsets = [0, 0, 0, 0], sizes = [9, 1, 16, 50], strides = [1, 1, 1, 1]} : vector<9x3x16x50xf32> to vector<9x1x16x50xf32>
    %46 = vector.shape_cast %45 : vector<9x1x16x50xf32> to vector<9x16x50xf32>
    %47 = vector.extract_strided_slice %44 {offsets = [0, 1, 0, 0], sizes = [9, 1, 16, 50], strides = [1, 1, 1, 1]} : vector<9x3x16x50xf32> to vector<9x1x16x50xf32>
    %48 = vector.shape_cast %47 : vector<9x1x16x50xf32> to vector<9x16x50xf32>
    %49 = arith.maximumf %46, %48 : vector<9x16x50xf32>
    %50 = vector.extract_strided_slice %44 {offsets = [0, 2, 0, 0], sizes = [9, 1, 16, 50], strides = [1, 1, 1, 1]} : vector<9x3x16x50xf32> to vector<9x1x16x50xf32>
    %51 = vector.shape_cast %50 : vector<9x1x16x50xf32> to vector<9x16x50xf32>
    %52 = arith.maximumf %49, %51 : vector<9x16x50xf32>
    %53 = vector.shape_cast %33 : vector<1x50xf32> to vector<1x1x50xf32>
    %54 = vector.broadcast %53 : vector<1x1x50xf32> to vector<9x16x50xf32>
    %55 = arith.addf %52, %54 : vector<9x16x50xf32>
    %cst_16 = arith.constant 0.000000e+00 : f32
    %56 = vector.broadcast %cst_16 : f32 to vector<9x16x50xf32>
    %57 = arith.cmpf ogt, %55, %56 : vector<9x16x50xf32>
    %cst_17 = arith.constant 0.000000e+00 : f32
    %58 = vector.broadcast %cst_17 : f32 to vector<9x16x50xf32>
    %59 = arith.minimumf %55, %58 : vector<9x16x50xf32>
    %60 = math.exp %59 : vector<9x16x50xf32>
    %cst_18 = arith.constant 1.000000e+00 : f32
    %61 = vector.broadcast %cst_18 : f32 to vector<9x16x50xf32>
    %62 = arith.subf %60, %61 : vector<9x16x50xf32>
    %63 = arith.select %57, %55, %62 : vector<9x16x50xi1>, vector<9x16x50xf32>
    %c0_19 = arith.constant 0 : index
    %c0_20 = arith.constant 0 : index
    %64 = vector.load %arg6[%c0_19, %c0_20] : memref<150x100xbf16, #tpu.memory_space<vmem>>, vector<150x100xbf16>
    %c0_21 = arith.constant 0 : index
    %c0_22 = arith.constant 0 : index
    %65 = vector.load %arg7[%c0_21, %c0_22] : memref<1x100xf32, #tpu.memory_space<vmem>>, vector<1x100xf32>
    %66 = arith.truncf %63 : vector<9x16x50xf32> to vector<9x16x50xbf16>
    %cst_23 = arith.constant 0.000000e+00 : bf16
    %67 = vector.broadcast %cst_23 : bf16 to vector<1x16x50xbf16>
    %68 = vector.extract_strided_slice %66 {offsets = [0, 0, 0], sizes = [8, 16, 50], strides = [1, 1, 1]} : vector<9x16x50xbf16> to vector<8x16x50xbf16>
    %69 = tpu.concatenate %67, %68 in 0 : vector<1x16x50xbf16>, vector<8x16x50xbf16> -> vector<9x16x50xbf16>
    %70 = vector.extract_strided_slice %66 {offsets = [1, 0, 0], sizes = [8, 16, 50], strides = [1, 1, 1]} : vector<9x16x50xbf16> to vector<8x16x50xbf16>
    %71 = tpu.concatenate %70, %67 in 0 : vector<8x16x50xbf16>, vector<1x16x50xbf16> -> vector<9x16x50xbf16>
    %72 = tpu.concatenate %69, %66, %71 in 2 : vector<9x16x50xbf16>, vector<9x16x50xbf16>, vector<9x16x50xbf16> -> vector<9x16x150xbf16>
    %73 = vector.shape_cast %72 : vector<9x16x150xbf16> to vector<144x150xbf16>
    %cst_24 = arith.constant dense<0.000000e+00> : vector<144x100xf32>
    %74 = tpu.matmul %73, %64, %cst_24 {dimension_numbers = #tpu.dot_dimension_numbers<[1], [0], [0], [1], [0, 0, 1, 1], [], []>} : vector<144x150xbf16>, vector<150x100xbf16>, vector<144x100xf32> -> vector<144x100xf32>
    %75 = vector.shape_cast %74 : vector<144x100xf32> to vector<9x16x100xf32>
    %76 = vector.shape_cast %75 : vector<9x16x100xf32> to vector<3x3x16x100xf32>
    %77 = vector.extract_strided_slice %76 {offsets = [0, 0, 0, 0], sizes = [3, 1, 16, 100], strides = [1, 1, 1, 1]} : vector<3x3x16x100xf32> to vector<3x1x16x100xf32>
    %78 = vector.shape_cast %77 : vector<3x1x16x100xf32> to vector<3x16x100xf32>
    %79 = vector.extract_strided_slice %76 {offsets = [0, 1, 0, 0], sizes = [3, 1, 16, 100], strides = [1, 1, 1, 1]} : vector<3x3x16x100xf32> to vector<3x1x16x100xf32>
    %80 = vector.shape_cast %79 : vector<3x1x16x100xf32> to vector<3x16x100xf32>
    %81 = arith.maximumf %78, %80 : vector<3x16x100xf32>
    %82 = vector.extract_strided_slice %76 {offsets = [0, 2, 0, 0], sizes = [3, 1, 16, 100], strides = [1, 1, 1, 1]} : vector<3x3x16x100xf32> to vector<3x1x16x100xf32>
    %83 = vector.shape_cast %82 : vector<3x1x16x100xf32> to vector<3x16x100xf32>
    %84 = arith.maximumf %81, %83 : vector<3x16x100xf32>
    %85 = vector.shape_cast %65 : vector<1x100xf32> to vector<1x1x100xf32>
    %86 = vector.broadcast %85 : vector<1x1x100xf32> to vector<3x16x100xf32>
    %87 = arith.addf %84, %86 : vector<3x16x100xf32>
    %cst_25 = arith.constant 0.000000e+00 : f32
    %88 = vector.broadcast %cst_25 : f32 to vector<3x16x100xf32>
    %89 = arith.cmpf ogt, %87, %88 : vector<3x16x100xf32>
    %cst_26 = arith.constant 0.000000e+00 : f32
    %90 = vector.broadcast %cst_26 : f32 to vector<3x16x100xf32>
    %91 = arith.minimumf %87, %90 : vector<3x16x100xf32>
    %92 = math.exp %91 : vector<3x16x100xf32>
    %cst_27 = arith.constant 1.000000e+00 : f32
    %93 = vector.broadcast %cst_27 : f32 to vector<3x16x100xf32>
    %94 = arith.subf %92, %93 : vector<3x16x100xf32>
    %95 = arith.select %89, %87, %94 : vector<3x16x100xi1>, vector<3x16x100xf32>
    %c0_28 = arith.constant 0 : index
    %c0_29 = arith.constant 0 : index
    %96 = vector.load %arg8[%c0_28, %c0_29] : memref<300x200xbf16, #tpu.memory_space<vmem>>, vector<300x200xbf16>
    %c0_30 = arith.constant 0 : index
    %c0_31 = arith.constant 0 : index
    %97 = vector.load %arg9[%c0_30, %c0_31] : memref<1x200xf32, #tpu.memory_space<vmem>>, vector<1x200xf32>
    %98 = arith.truncf %95 : vector<3x16x100xf32> to vector<3x16x100xbf16>
    %cst_32 = arith.constant 0.000000e+00 : bf16
    %99 = vector.broadcast %cst_32 : bf16 to vector<1x16x100xbf16>
    %100 = vector.extract_strided_slice %98 {offsets = [0, 0, 0], sizes = [2, 16, 100], strides = [1, 1, 1]} : vector<3x16x100xbf16> to vector<2x16x100xbf16>
    %101 = tpu.concatenate %99, %100 in 0 : vector<1x16x100xbf16>, vector<2x16x100xbf16> -> vector<3x16x100xbf16>
    %102 = vector.extract_strided_slice %98 {offsets = [1, 0, 0], sizes = [2, 16, 100], strides = [1, 1, 1]} : vector<3x16x100xbf16> to vector<2x16x100xbf16>
    %103 = tpu.concatenate %102, %99 in 0 : vector<2x16x100xbf16>, vector<1x16x100xbf16> -> vector<3x16x100xbf16>
    %104 = tpu.concatenate %101, %98, %103 in 2 : vector<3x16x100xbf16>, vector<3x16x100xbf16>, vector<3x16x100xbf16> -> vector<3x16x300xbf16>
    %105 = vector.shape_cast %104 : vector<3x16x300xbf16> to vector<48x300xbf16>
    %cst_33 = arith.constant dense<0.000000e+00> : vector<48x200xf32>
    %106 = tpu.matmul %105, %96, %cst_33 {dimension_numbers = #tpu.dot_dimension_numbers<[1], [0], [0], [1], [0, 0, 1, 1], [], []>} : vector<48x300xbf16>, vector<300x200xbf16>, vector<48x200xf32> -> vector<48x200xf32>
    %107 = vector.shape_cast %106 : vector<48x200xf32> to vector<3x16x200xf32>
    %108 = vector.shape_cast %107 : vector<3x16x200xf32> to vector<1x3x16x200xf32>
    %109 = vector.extract_strided_slice %108 {offsets = [0, 0, 0, 0], sizes = [1, 1, 16, 200], strides = [1, 1, 1, 1]} : vector<1x3x16x200xf32> to vector<1x1x16x200xf32>
    %110 = vector.shape_cast %109 : vector<1x1x16x200xf32> to vector<1x16x200xf32>
    %111 = vector.extract_strided_slice %108 {offsets = [0, 1, 0, 0], sizes = [1, 1, 16, 200], strides = [1, 1, 1, 1]} : vector<1x3x16x200xf32> to vector<1x1x16x200xf32>
    %112 = vector.shape_cast %111 : vector<1x1x16x200xf32> to vector<1x16x200xf32>
    %113 = arith.maximumf %110, %112 : vector<1x16x200xf32>
    %114 = vector.extract_strided_slice %108 {offsets = [0, 2, 0, 0], sizes = [1, 1, 16, 200], strides = [1, 1, 1, 1]} : vector<1x3x16x200xf32> to vector<1x1x16x200xf32>
    %115 = vector.shape_cast %114 : vector<1x1x16x200xf32> to vector<1x16x200xf32>
    %116 = arith.maximumf %113, %115 : vector<1x16x200xf32>
    %117 = vector.shape_cast %97 : vector<1x200xf32> to vector<1x1x200xf32>
    %118 = vector.broadcast %117 : vector<1x1x200xf32> to vector<1x16x200xf32>
    %119 = arith.addf %116, %118 : vector<1x16x200xf32>
    %cst_34 = arith.constant 0.000000e+00 : f32
    %120 = vector.broadcast %cst_34 : f32 to vector<1x16x200xf32>
    %121 = arith.cmpf ogt, %119, %120 : vector<1x16x200xf32>
    %cst_35 = arith.constant 0.000000e+00 : f32
    %122 = vector.broadcast %cst_35 : f32 to vector<1x16x200xf32>
    %123 = arith.minimumf %119, %122 : vector<1x16x200xf32>
    %124 = math.exp %123 : vector<1x16x200xf32>
    %cst_36 = arith.constant 1.000000e+00 : f32
    %125 = vector.broadcast %cst_36 : f32 to vector<1x16x200xf32>
    %126 = arith.subf %124, %125 : vector<1x16x200xf32>
    %127 = arith.select %121, %119, %126 : vector<1x16x200xi1>, vector<1x16x200xf32>
    %c0_37 = arith.constant 0 : index
    %c0_38 = arith.constant 0 : index
    %c0_39 = arith.constant 0 : index
    %128 = vector.load %arg10[%c0_37, %c0_38, %c0_39] : memref<1x200x32xbf16, #tpu.memory_space<vmem>>, vector<1x200x32xbf16>
    %c0_40 = arith.constant 0 : index
    %c0_41 = arith.constant 0 : index
    %129 = vector.load %arg11[%c0_40, %c0_41] : memref<1x32xf32, #tpu.memory_space<vmem>>, vector<1x32xf32>
    %c0_42 = arith.constant 0 : index
    %c0_43 = arith.constant 0 : index
    %130 = vector.load %arg12[%c0_42, %c0_43] : memref<1x32xf32, #tpu.memory_space<vmem>>, vector<1x32xf32>
    %c0_44 = arith.constant 0 : index
    %c0_45 = arith.constant 0 : index
    %131 = vector.load %arg13[%c0_44, %c0_45] : memref<1x1xf32, #tpu.memory_space<vmem>>, vector<1x1xf32>
    %132 = vector.shape_cast %127 : vector<1x16x200xf32> to vector<16x200xf32>
    %133 = arith.truncf %132 : vector<16x200xf32> to vector<16x200xbf16>
    %134 = vector.shape_cast %128 : vector<1x200x32xbf16> to vector<200x32xbf16>
    %cst_46 = arith.constant dense<0.000000e+00> : vector<16x32xf32>
    %135 = tpu.matmul %133, %134, %cst_46 {dimension_numbers = #tpu.dot_dimension_numbers<[1], [0], [0], [1], [0, 0, 1, 1], [], []>} : vector<16x200xbf16>, vector<200x32xbf16>, vector<16x32xf32> -> vector<16x32xf32>
    %136 = vector.broadcast %129 : vector<1x32xf32> to vector<16x32xf32>
    %137 = arith.addf %135, %136 : vector<16x32xf32>
    %cst_47 = arith.constant 0.000000e+00 : f32
    %138 = vector.broadcast %cst_47 : f32 to vector<16x32xf32>
    %139 = arith.maximumf %137, %138 : vector<16x32xf32>
    %140 = vector.broadcast %130 : vector<1x32xf32> to vector<16x32xf32>
    %141 = arith.mulf %139, %140 : vector<16x32xf32>
    %cst_48 = arith.constant dense<0.000000e+00> : vector<16xf32>
    %142 = vector.multi_reduction <add>, %141, %cst_48 [1] : vector<16x32xf32> to vector<16xf32>
    %143 = vector.shape_cast %142 : vector<16xf32> to vector<16x1xf32>
    %144 = vector.broadcast %131 : vector<1x1xf32> to vector<16x1xf32>
    %145 = arith.addf %143, %144 : vector<16x1xf32>
    %c0_49 = arith.constant 0 : index
    %c0_50 = arith.constant 0 : index
    %146 = vector.load %arg14[%c0_49, %c0_50] : memref<16x1xf32, #tpu.memory_space<vmem>>, vector<16x1xf32>
    tpu.vector_store %arg14[%c0_49, %c0_50], %145 {strides = array<i32>} : memref<16x1xf32, #tpu.memory_space<vmem>>, vector<16x1xf32>,
    return
  }
  func.func @transform_0(%arg0: i32) -> (i32, i32, i32) {
    %c0_i32 = arith.constant 0 : i32
    %c0_i32_0 = arith.constant 0 : i32
    %c0_i32_1 = arith.constant 0 : i32
    return %c0_i32, %arg0, %c0_i32_0 : i32, i32, i32
  }
  func.func @transform_1(%arg0: i32) -> (i32, i32) {
    %c0_i32 = arith.constant 0 : i32
    %c0_i32_0 = arith.constant 0 : i32
    %c0_i32_1 = arith.constant 0 : i32
    return %c0_i32, %c0_i32_0 : i32, i32
  }
  func.func @transform_2(%arg0: i32) -> (i32, i32) {
    %c0_i32 = arith.constant 0 : i32
    %c0_i32_0 = arith.constant 0 : i32
    %c0_i32_1 = arith.constant 0 : i32
    return %c0_i32, %c0_i32_0 : i32, i32
  }
  func.func @transform_3(%arg0: i32) -> (i32, i32) {
    %c0_i32 = arith.constant 0 : i32
    %c0_i32_0 = arith.constant 0 : i32
    %c0_i32_1 = arith.constant 0 : i32
    return %c0_i32, %c0_i32_0 : i32, i32
  }
  func.func @transform_4(%arg0: i32) -> (i32, i32) {
    %c0_i32 = arith.constant 0 : i32
    %c0_i32_0 = arith.constant 0 : i32
    %c0_i32_1 = arith.constant 0 : i32
    return %c0_i32, %c0_i32_0 : i32, i32
  }
  func.func @transform_5(%arg0: i32) -> (i32, i32) {
    %c0_i32 = arith.constant 0 : i32
    %c0_i32_0 = arith.constant 0 : i32
    %c0_i32_1 = arith.constant 0 : i32
    return %c0_i32, %c0_i32_0 : i32, i32
  }
  func.func @transform_6(%arg0: i32) -> (i32, i32) {
    %c0_i32 = arith.constant 0 : i32
    %c0_i32_0 = arith.constant 0 : i32
    %c0_i32_1 = arith.constant 0 : i32
    return %c0_i32, %c0_i32_0 : i32, i32
  }
  func.func @transform_7(%arg0: i32) -> (i32, i32) {
    %c0_i32 = arith.constant 0 : i32
    %c0_i32_0 = arith.constant 0 : i32
    %c0_i32_1 = arith.constant 0 : i32
    return %c0_i32, %c0_i32_0 : i32, i32
  }
  func.func @transform_8(%arg0: i32) -> (i32, i32) {
    %c0_i32 = arith.constant 0 : i32
    %c0_i32_0 = arith.constant 0 : i32
    %c0_i32_1 = arith.constant 0 : i32
    return %c0_i32, %c0_i32_0 : i32, i32
  }
  func.func @transform_9(%arg0: i32) -> (i32, i32, i32) {
    %c0_i32 = arith.constant 0 : i32
    %c0_i32_0 = arith.constant 0 : i32
    %c0_i32_1 = arith.constant 0 : i32
    %c0_i32_2 = arith.constant 0 : i32
    return %c0_i32, %c0_i32_0, %c0_i32_1 : i32, i32, i32
  }
  func.func @transform_10(%arg0: i32) -> (i32, i32) {
    %c0_i32 = arith.constant 0 : i32
    %c0_i32_0 = arith.constant 0 : i32
    %c0_i32_1 = arith.constant 0 : i32
    return %c0_i32, %c0_i32_0 : i32, i32
  }
  func.func @transform_11(%arg0: i32) -> (i32, i32) {
    %c0_i32 = arith.constant 0 : i32
    %c0_i32_0 = arith.constant 0 : i32
    %c0_i32_1 = arith.constant 0 : i32
    return %c0_i32, %c0_i32_0 : i32, i32
  }
  func.func @transform_12(%arg0: i32) -> (i32, i32) {
    %c0_i32 = arith.constant 0 : i32
    %c0_i32_0 = arith.constant 0 : i32
    %c0_i32_1 = arith.constant 0 : i32
    return %c0_i32, %c0_i32_0 : i32, i32
  }
  func.func @transform_13(%arg0: i32) -> (i32, i32) {
    %c0_i32 = arith.constant 0 : i32
    %c0_i32_0 = arith.constant 0 : i32
    return %arg0, %c0_i32 : i32, i32
  }
}

</mosaic_0001>

<bundles_post_ra>
// kernel: tpu_custom_call.1
= control target key start
LH: loop header
LB: loop body
LE: loop exit
PB: predicated region body
PF: predicated region fallthrough
CT: control target
= control target key end

     0   :  { %s9521_s0 = inlined_call_operand.vmem [shape: bf16[81,32,4], index: 0, kind: input, shape index: {}]   ;;  %s9522_s1 = inlined_call_operand.vmem [shape: bf16[12,25], index: 1, kind: input, shape index: {}]   ;;  %s9523_s2 = inlined_call_operand.vmem [shape: f32[1,25], index: 2, kind: input, shape index: {}]   ;;  %s9524_s3 = inlined_call_operand.vmem [shape: bf16[75,50], index: 3, kind: input, shape index: {}]   ;;  %s9525_s4 = inlined_call_operand.vmem [shape: f32[1,50], index: 4, kind: input, shape index: {}]   ;;  %s9526_s5 = inlined_call_operand.vmem [shape: bf16[150,100], index: 5, kind: input, shape index: {}]   ;;  %s9527_s6 = inlined_call_operand.vmem [shape: f32[1,100], index: 6, kind: input, shape index: {}]   ;;  %s9528_s7 = inlined_call_operand.vmem [shape: bf16[300,200], index: 7, kind: input, shape index: {}]   ;;  %s9529_s8 = inlined_call_operand.vmem [shape: f32[1,200], index: 8, kind: input, shape index: {}]   ;;  %s9530_s9 = inlined_call_operand.vmem [shape: bf16[1,200,32], index: 9, kind: input, shape index: {}]   ;;  %s9531_s10 = inlined_call_operand.vmem [shape: f32[1,32], index: 10, kind: input, shape index: {}]   ;;  %s9532_s11 = inlined_call_operand.vmem [shape: f32[1,32], index: 11, kind: input, shape index: {}]   ;;  %s9533_s12 = inlined_call_operand.<no memory space> [shape: f32[1,1], index: 12, kind: input, shape index: {}]   ;;  %s9534_s13 = inlined_call_operand.vmem [shape: f32[32,1], index: 13, kind: output, shape index: {}]  }
   0x1   :  { %v18_v0 = vstv %s9533_s12 }
   0x2   :  { %19 = vst [vmem:[#allocation2] sm:$0x1] %v18_v0 }
   0x3   :  { %s7121_s27 = smov 0   ;;  %s7123_s28 = smov 0  }
   0x4   :  { %s7125_s29 = smov 0  }
   0x5 LB: > { %s5671_s12 = sadd.s32 4294967295, %s7036_s29   ;;  %s7138_s30 = sadd.s32 1, %s7036_s29   ;;  %s7036_s29 = sphi %s7125_s29, %s9598_s29   ;;  %s7032_s28 = sphi %s7123_s28, %s9597_s28   ;;  %s7028_s27 = sphi %s7121_s27, %s9596_s27  }
   0x6   : > { %s29_s14 = ssub.s32 %s7036_s29, %s7138_s30  ;;  %s32_s15 = sadd.s32 1, %s7032_s28 }
   0x7   : > { %p30_p0 = scmp.eq.s32.totalorder %s29_s14, 0  ;;  %p39_p1 = scmp.ne.s32.totalorder %s7032_s28, %s7028_s27 }
   0x8   : > { %p40_p2 = scmp.eq.s32.totalorder %s7036_s29, 0  ;;  %p5674_p4 = scmp.ge.s32.totalorder %s7036_s29, 2 }
   0x9   : > { %s7147_s16 = scalar_select %p30_p0, %s7032_s28, %s32_s15  }
   0xa   : > { %p41_p3 = por %p40_p2, %p39_p1  ;;  %379 = sbr.rel (%p5674_p4) target bundleno = 62 (0x3e), region = 64 }
  0x11   : > { %382 = sbr.rel (!%p41_p3) target bundleno = 62 (0x3e), region = 68  ;;  %s384_s17 = sand.u32 (%p41_p3), 1, %s7032_s28  }
  0x12   : > { %s6043_s18 = sshll.u32 (%p41_p3), %s7036_s29, 3  ;;  %s6616_s19 = smul.u32 (%p41_p3), 648, %s384_s17 }
  0x13   : > { %s7155_s22 = scalar_lea.vmem (%p41_p3), %s9521_s0, %s6043_s18 }
  0x14   : > { %v405_v1 = vld [vmem:[%s7155_s22] sm:$0xff] (%p41_p3)   ;;  %v409_v2 = vld [vmem:[%s7155_s22 + $0x10] sm:$0xff] (%p41_p3)   ;;  %s7163_s23 = scalar_lea.vmem (%p41_p3), [#allocation3], %s6616_s19 }
  0x15   : > { %v413_v3 = vld [vmem:[%s7155_s22 + $0x20] sm:$0xff] (%p41_p3)   ;;  %v417_v4 = vld [vmem:[%s7155_s22 + $0x30] sm:$0xff] (%p41_p3)   ;;  %406 = vst [vmem:[%s7163_s23] sm:$0xff] (%p41_p3), %v405_v1   ;;  %410 = vst [vmem:[%s7163_s23 + $0x8] sm:$0xff] (%p41_p3), %v409_v2  }
  0x16   : > { %v421_v5 = vld [vmem:[%s7155_s22 + $0x40] sm:$0xff] (%p41_p3)   ;;  %v425_v6 = vld [vmem:[%s7155_s22 + $0x50] sm:$0xff] (%p41_p3)   ;;  %414 = vst [vmem:[%s7163_s23 + $0x10] sm:$0xff] (%p41_p3), %v413_v3   ;;  %418 = vst [vmem:[%s7163_s23 + $0x18] sm:$0xff] (%p41_p3), %v417_v4  }
  0x17   : > { %422 = vst [vmem:[%s7163_s23 + $0x20] sm:$0xff] (%p41_p3), %v421_v5   ;;  %426 = vst [vmem:[%s7163_s23 + $0x28] sm:$0xff] (%p41_p3), %v425_v6   ;;  %v429_v7 = vld [vmem:[%s7155_s22 + $0x60] sm:$0xff] (%p41_p3)   ;;  %v433_v8 = vld [vmem:[%s7155_s22 + $0x70] sm:$0xff] (%p41_p3)  }
  0x18   : > { %v437_v9 = vld [vmem:[%s7155_s22 + $0x80] sm:$0xff]   ;;  %430 = vst [vmem:[%s7163_s23 + $0x30] sm:$0xff] %v429_v7   ;;  %434 = vst [vmem:[%s7163_s23 + $0x38] sm:$0xff] %v433_v8   ;;  %v441_v10 = vld [vmem:[%s7155_s22 + $0x90] sm:$0xff]  }
  0x19   : > { %438 = vst [vmem:[%s7163_s23 + $0x40] sm:$0xff] %v437_v9   ;;  %v445_v11 = vld [vmem:[%s7155_s22 + $0xa0] sm:$0xff]   ;;  %v449_v12 = vld [vmem:[%s7155_s22 + $0xb0] sm:$0xff]   ;;  %442 = vst [vmem:[%s7163_s23 + $0x48] sm:$0xff] %v441_v10  }
  0x1a   : > { %446 = vst [vmem:[%s7163_s23 + $0x50] sm:$0xff] %v445_v11   ;;  %450 = vst [vmem:[%s7163_s23 + $0x58] sm:$0xff] %v449_v12   ;;  %v453_v13 = vld [vmem:[%s7155_s22 + $0xc0] sm:$0xff]   ;;  %v457_v14 = vld [vmem:[%s7155_s22 + $0xd0] sm:$0xff]  }
  0x1b   : > { %v461_v15 = vld [vmem:[%s7155_s22 + $0xe0] sm:$0xff]   ;;  %454 = vst [vmem:[%s7163_s23 + $0x60] sm:$0xff] %v453_v13   ;;  %458 = vst [vmem:[%s7163_s23 + $0x68] sm:$0xff] %v457_v14   ;;  %v465_v16 = vld [vmem:[%s7155_s22 + $0xf0] sm:$0xff]  }
  0x1c   : > { %462 = vst [vmem:[%s7163_s23 + $0x70] sm:$0xff] %v461_v15   ;;  %v469_v17 = vld [vmem:[%s7155_s22 + $0x100] sm:$0xff]   ;;  %v473_v18 = vld [vmem:[%s7155_s22 + $0x110] sm:$0xff]   ;;  %466 = vst [vmem:[%s7163_s23 + $0x78] sm:$0xff] %v465_v16  }
  0x1d   : > { %470 = vst [vmem:[%s7163_s23 + $0x80] sm:$0xff] %v469_v17   ;;  %474 = vst [vmem:[%s7163_s23 + $0x88] sm:$0xff] %v473_v18   ;;  %v477_v19 = vld [vmem:[%s7155_s22 + $0x120] sm:$0xff]   ;;  %v481_v20 = vld [vmem:[%s7155_s22 + $0x130] sm:$0xff]  }
  0x1e   : > { %v485_v21 = vld [vmem:[%s7155_s22 + $0x140] sm:$0xff]   ;;  %478 = vst [vmem:[%s7163_s23 + $0x90] sm:$0xff] %v477_v19   ;;  %482 = vst [vmem:[%s7163_s23 + $0x98] sm:$0xff] %v481_v20   ;;  %v489_v22 = vld [vmem:[%s7155_s22 + $0x150] sm:$0xff]  }
  0x1f   : > { %486 = vst [vmem:[%s7163_s23 + $0xa0] sm:$0xff] %v485_v21   ;;  %v493_v23 = vld [vmem:[%s7155_s22 + $0x160] sm:$0xff]   ;;  %v497_v24 = vld [vmem:[%s7155_s22 + $0x170] sm:$0xff]   ;;  %490 = vst [vmem:[%s7163_s23 + $0xa8] sm:$0xff] %v489_v22  }
  0x20   : > { %494 = vst [vmem:[%s7163_s23 + $0xb0] sm:$0xff] %v493_v23   ;;  %498 = vst [vmem:[%s7163_s23 + $0xb8] sm:$0xff] %v497_v24   ;;  %v501_v25 = vld [vmem:[%s7155_s22 + $0x180] sm:$0xff]   ;;  %v505_v26 = vld [vmem:[%s7155_s22 + $0x190] sm:$0xff]  }
  0x21   : > { %v509_v27 = vld [vmem:[%s7155_s22 + $0x1a0] sm:$0xff]   ;;  %502 = vst [vmem:[%s7163_s23 + $0xc0] sm:$0xff] %v501_v25   ;;  %506 = vst [vmem:[%s7163_s23 + $0xc8] sm:$0xff] %v505_v26   ;;  %v513_v28 = vld [vmem:[%s7155_s22 + $0x1b0] sm:$0xff]  }
  0x22   : > { %510 = vst [vmem:[%s7163_s23 + $0xd0] sm:$0xff] %v509_v27   ;;  %v517_v29 = vld [vmem:[%s7155_s22 + $0x1c0] sm:$0xff]   ;;  %v521_v30 = vld [vmem:[%s7155_s22 + $0x1d0] sm:$0xff]   ;;  %514 = vst [vmem:[%s7163_s23 + $0xd8] sm:$0xff] %v513_v28  }
  0x23   : > { %518 = vst [vmem:[%s7163_s23 + $0xe0] sm:$0xff] %v517_v29   ;;  %522 = vst [vmem:[%s7163_s23 + $0xe8] sm:$0xff] %v521_v30   ;;  %v525_v31 = vld [vmem:[%s7155_s22 + $0x1e0] sm:$0xff]   ;;  %v529_v32 = vld [vmem:[%s7155_s22 + $0x1f0] sm:$0xff]  }
  0x24   : > { %v533_v33 = vld [vmem:[%s7155_s22 + $0x200] sm:$0xff]   ;;  %526 = vst [vmem:[%s7163_s23 + $0xf0] sm:$0xff] %v525_v31   ;;  %530 = vst [vmem:[%s7163_s23 + $0xf8] sm:$0xff] %v529_v32   ;;  %v537_v34 = vld [vmem:[%s7155_s22 + $0x210] sm:$0xff]  }
  0x25   : > { %534 = vst [vmem:[%s7163_s23 + $0x100] sm:$0xff] %v533_v33   ;;  %v541_v35 = vld [vmem:[%s7155_s22 + $0x220] sm:$0xff]   ;;  %v545_v36 = vld [vmem:[%s7155_s22 + $0x230] sm:$0xff]   ;;  %538 = vst [vmem:[%s7163_s23 + $0x108] sm:$0xff] %v537_v34  }
  0x26   : > { %542 = vst [vmem:[%s7163_s23 + $0x110] sm:$0xff] %v541_v35   ;;  %546 = vst [vmem:[%s7163_s23 + $0x118] sm:$0xff] %v545_v36   ;;  %v549_v37 = vld [vmem:[%s7155_s22 + $0x240] sm:$0xff]   ;;  %v553_v38 = vld [vmem:[%s7155_s22 + $0x250] sm:$0xff]  }
  0x27   : > { %v557_v39 = vld [vmem:[%s7155_s22 + $0x260] sm:$0xff]   ;;  %550 = vst [vmem:[%s7163_s23 + $0x120] sm:$0xff] %v549_v37   ;;  %554 = vst [vmem:[%s7163_s23 + $0x128] sm:$0xff] %v553_v38   ;;  %v561_v40 = vld [vmem:[%s7155_s22 + $0x270] sm:$0xff]  }
  0x28   : > { %558 = vst [vmem:[%s7163_s23 + $0x130] sm:$0xff] %v557_v39   ;;  %v565_v41 = vld [vmem:[%s7155_s22 + $0x280] sm:$0xff]   ;;  %v569_v42 = vld [vmem:[%s7155_s22 + $0x290] sm:$0xff]   ;;  %562 = vst [vmem:[%s7163_s23 + $0x138] sm:$0xff] %v561_v40  }
  0x29   : > { %566 = vst [vmem:[%s7163_s23 + $0x140] sm:$0xff] %v565_v41   ;;  %570 = vst [vmem:[%s7163_s23 + $0x148] sm:$0xff] %v569_v42   ;;  %v573_v43 = vld [vmem:[%s7155_s22 + $0x2a0] sm:$0xff]   ;;  %v577_v44 = vld [vmem:[%s7155_s22 + $0x2b0] sm:$0xff]  }
  0x2a   : > { %v581_v45 = vld [vmem:[%s7155_s22 + $0x2c0] sm:$0xff]   ;;  %574 = vst [vmem:[%s7163_s23 + $0x150] sm:$0xff] %v573_v43   ;;  %578 = vst [vmem:[%s7163_s23 + $0x158] sm:$0xff] %v577_v44   ;;  %v585_v46 = vld [vmem:[%s7155_s22 + $0x2d0] sm:$0xff]  }
  0x2b   : > { %582 = vst [vmem:[%s7163_s23 + $0x160] sm:$0xff] %v581_v45   ;;  %v589_v47 = vld [vmem:[%s7155_s22 + $0x2e0] sm:$0xff]   ;;  %v593_v48 = vld [vmem:[%s7155_s22 + $0x2f0] sm:$0xff]   ;;  %586 = vst [vmem:[%s7163_s23 + $0x168] sm:$0xff] %v585_v46  }
  0x2c   : > { %590 = vst [vmem:[%s7163_s23 + $0x170] sm:$0xff] %v589_v47   ;;  %594 = vst [vmem:[%s7163_s23 + $0x178] sm:$0xff] %v593_v48   ;;  %v597_v49 = vld [vmem:[%s7155_s22 + $0x300] sm:$0xff]   ;;  %v601_v50 = vld [vmem:[%s7155_s22 + $0x310] sm:$0xff]  }
  0x2d   : > { %v605_v51 = vld [vmem:[%s7155_s22 + $0x320] sm:$0xff]   ;;  %598 = vst [vmem:[%s7163_s23 + $0x180] sm:$0xff] %v597_v49   ;;  %602 = vst [vmem:[%s7163_s23 + $0x188] sm:$0xff] %v601_v50   ;;  %v609_v52 = vld [vmem:[%s7155_s22 + $0x330] sm:$0xff]  }
  0x2e   : > { %606 = vst [vmem:[%s7163_s23 + $0x190] sm:$0xff] %v605_v51   ;;  %v613_v53 = vld [vmem:[%s7155_s22 + $0x340] sm:$0xff]   ;;  %v617_v54 = vld [vmem:[%s7155_s22 + $0x350] sm:$0xff]   ;;  %610 = vst [vmem:[%s7163_s23 + $0x198] sm:$0xff] %v609_v52  }
  0x2f   : > { %614 = vst [vmem:[%s7163_s23 + $0x1a0] sm:$0xff] %v613_v53   ;;  %618 = vst [vmem:[%s7163_s23 + $0x1a8] sm:$0xff] %v617_v54   ;;  %v621_v55 = vld [vmem:[%s7155_s22 + $0x360] sm:$0xff]   ;;  %v625_v56 = vld [vmem:[%s7155_s22 + $0x370] sm:$0xff]  }
  0x30   : > { %v629_v57 = vld [vmem:[%s7155_s22 + $0x380] sm:$0xff]   ;;  %622 = vst [vmem:[%s7163_s23 + $0x1b0] sm:$0xff] %v621_v55   ;;  %626 = vst [vmem:[%s7163_s23 + $0x1b8] sm:$0xff] %v625_v56   ;;  %v633_v58 = vld [vmem:[%s7155_s22 + $0x390] sm:$0xff]  }
  0x31   : > { %630 = vst [vmem:[%s7163_s23 + $0x1c0] sm:$0xff] %v629_v57   ;;  %v637_v59 = vld [vmem:[%s7155_s22 + $0x3a0] sm:$0xff]   ;;  %v641_v60 = vld [vmem:[%s7155_s22 + $0x3b0] sm:$0xff]   ;;  %634 = vst [vmem:[%s7163_s23 + $0x1c8] sm:$0xff] %v633_v58  }
  0x32   : > { %638 = vst [vmem:[%s7163_s23 + $0x1d0] sm:$0xff] %v637_v59   ;;  %642 = vst [vmem:[%s7163_s23 + $0x1d8] sm:$0xff] %v641_v60   ;;  %v645_v61 = vld [vmem:[%s7155_s22 + $0x3c0] sm:$0xff]   ;;  %v649_v62 = vld [vmem:[%s7155_s22 + $0x3d0] sm:$0xff]  }
  0x33   : > { %v653_v63 = vld [vmem:[%s7155_s22 + $0x3e0] sm:$0xff]   ;;  %646 = vst [vmem:[%s7163_s23 + $0x1e0] sm:$0xff] %v645_v61   ;;  %650 = vst [vmem:[%s7163_s23 + $0x1e8] sm:$0xff] %v649_v62   ;;  %v657_v0 = vld [vmem:[%s7155_s22 + $0x3f0] sm:$0xff]  }
  0x34   : > { %654 = vst [vmem:[%s7163_s23 + $0x1f0] sm:$0xff] %v653_v63   ;;  %v661_v1 = vld [vmem:[%s7155_s22 + $0x400] sm:$0xff]   ;;  %v665_v2 = vld [vmem:[%s7155_s22 + $0x410] sm:$0xff]   ;;  %658 = vst [vmem:[%s7163_s23 + $0x1f8] sm:$0xff] %v657_v0  }
  0x35   : > { %662 = vst [vmem:[%s7163_s23 + $0x200] sm:$0xff] %v661_v1   ;;  %666 = vst [vmem:[%s7163_s23 + $0x208] sm:$0xff] %v665_v2   ;;  %v669_v3 = vld [vmem:[%s7155_s22 + $0x420] sm:$0xff]   ;;  %v673_v4 = vld [vmem:[%s7155_s22 + $0x430] sm:$0xff]  }
  0x36   : > { %v677_v5 = vld [vmem:[%s7155_s22 + $0x440] sm:$0xff]   ;;  %670 = vst [vmem:[%s7163_s23 + $0x210] sm:$0xff] %v669_v3   ;;  %674 = vst [vmem:[%s7163_s23 + $0x218] sm:$0xff] %v673_v4   ;;  %v681_v6 = vld [vmem:[%s7155_s22 + $0x450] sm:$0xff]  }
  0x37   : > { %678 = vst [vmem:[%s7163_s23 + $0x220] sm:$0xff] %v677_v5   ;;  %v685_v7 = vld [vmem:[%s7155_s22 + $0x460] sm:$0xff]   ;;  %v689_v8 = vld [vmem:[%s7155_s22 + $0x470] sm:$0xff]   ;;  %682 = vst [vmem:[%s7163_s23 + $0x228] sm:$0xff] %v681_v6  }
  0x38   : > { %686 = vst [vmem:[%s7163_s23 + $0x230] sm:$0xff] %v685_v7   ;;  %690 = vst [vmem:[%s7163_s23 + $0x238] sm:$0xff] %v689_v8   ;;  %v693_v9 = vld [vmem:[%s7155_s22 + $0x480] sm:$0xff]   ;;  %v697_v10 = vld [vmem:[%s7155_s22 + $0x490] sm:$0xff]  }
  0x39   : > { %v701_v11 = vld [vmem:[%s7155_s22 + $0x4a0] sm:$0xff]   ;;  %694 = vst [vmem:[%s7163_s23 + $0x240] sm:$0xff] %v693_v9   ;;  %698 = vst [vmem:[%s7163_s23 + $0x248] sm:$0xff] %v697_v10   ;;  %v705_v12 = vld [vmem:[%s7155_s22 + $0x4b0] sm:$0xff]  }
  0x3a   : > { %702 = vst [vmem:[%s7163_s23 + $0x250] sm:$0xff] %v701_v11   ;;  %v709_v13 = vld [vmem:[%s7155_s22 + $0x4c0] sm:$0xff]   ;;  %v713_v14 = vld [vmem:[%s7155_s22 + $0x4d0] sm:$0xff]   ;;  %706 = vst [vmem:[%s7163_s23 + $0x258] sm:$0xff] %v705_v12  }
  0x3b   : > { %710 = vst [vmem:[%s7163_s23 + $0x260] sm:$0xff] %v709_v13   ;;  %714 = vst [vmem:[%s7163_s23 + $0x268] sm:$0xff] %v713_v14   ;;  %v717_v15 = vld [vmem:[%s7155_s22 + $0x4e0] sm:$0xff]   ;;  %v721_v16 = vld [vmem:[%s7155_s22 + $0x4f0] sm:$0xff]  }
  0x3c   : > { %v725_v17 = vld [vmem:[%s7155_s22 + $0x500] sm:$0xff]   ;;  %718 = vst [vmem:[%s7163_s23 + $0x270] sm:$0xff] %v717_v15   ;;  %722 = vst [vmem:[%s7163_s23 + $0x278] sm:$0xff] %v721_v16  }
  0x3d   : > { %726 = vst [vmem:[%s7163_s23 + $0x280] sm:$0xff] %v725_v17  }
  0x3e PF: > { %p5677_p5 = scmp.ge.s32.totalorder %s7036_s29, 1  ;;  %p1074_p6 = scmp.lt.s32.totalorder %s7036_s29, 3 }
  0x40   : > { %p1075_p7 = pnand %p5677_p5, %p1074_p6 }
  0x42   : > { %1078 = sbr.rel (%p1075_p7) target bundleno = 2461 (0x99d), region = 109 }
  0x49   : > { %s1081_s24 = sand.u32 1, %s7028_s27   ;;  %v9535_v18 = vmov 0.0   ;;  %v6670_v19 = vld [vmem:[%s9522_s1] sm:$0x3f]   ;;  %vm2604_vm0 = vcmask 1045504   ;;  %vm7039_vm1 = vmmov 0  }
  0x4a   : > { %s6617_s25 = smul.u32 648, %s1081_s24  ;;  %6158 = vmatprep.subr.bf16.mxu0 %v9535_v18  ;;  %6602 = vmatprep.subr.bf16.mxu1 %v9535_v18  ;;  %v2606_v20 = vsel %vm2604_vm0, %v6670_v19, 0  ;;  %s7040_s15 = smov 4   ;;  %vm2029_vm2 = vcmask 31744   ;;  %vm2273_vm3 = vcmask 64512   ;;  %vm2441_vm4 = vcmask 97280  }
  0x4b   : > { %6160 = vmatprep.mubr.msk.bf16.mxu0 %vm7039_vm1, %v9535_v18  ;;  %6416 = vmatprep.mubr.msk.bf16.mxu1 %vm7039_vm1, %v9535_v18  ;;  %s7041_s17 = smov 8   ;;  %s7043_s26 = smov 25   ;;  %vm4174_vm7 = vcmask 1044480  }
  0x4c   : > { %s7334_s27 = scalar_lea.vmem [#allocation3], %s6617_s25  ;;  %6159 = vmatpush3.bf16.msra.mxu0 %v2606_v20  ;;  %6603 = vmatpush3.bf16.msra.mxu1 %v2606_v20  ;;  %s7045_s19 = smov 50  }
  0x4d   : > { %v7337_v21 = vld [vmem:[%s7334_s27] sm:$0xff]   ;;  %v7340_v22 = vld [vmem:[%s7334_s27 + $0x8] sm:$0xff]   ;;  %6484 = vmatprep.subr.bf16.mxu1 %v9535_v18  ;;  %v7348_v23 = vld [vmem:[%s7334_s27 + $0x10] sm:$0xff]  }
  0x4e   : > { %1702 = vrot.lane.b32.xlu0 %v7337_v21, %s7040_s15  ;;  %1704 = vrot.lane.b32.xlu1 %v7340_v22, %s7040_s15  ;;  %v7355_v24 = vld [vmem:[%s7334_s27 + $0x18] sm:$0xff]   ;;  %v7362_v25 = vld [vmem:[%s7334_s27 + $0x20] sm:$0xff]  }
  0x4f   : > { %v7369_v26 = vld [vmem:[%s7334_s27 + $0x28] sm:$0xff]   ;;  %v7376_v27 = vld [vmem:[%s7334_s27 + $0x30] sm:$0xff]   ;;  %v7383_v28 = vld [vmem:[%s7334_s27 + $0x38] sm:$0xff]  }
  0x50   : > { %v7390_v29 = vld [vmem:[%s7334_s27 + $0x40] sm:$0xff]   ;;  %v7393_v30 = vld [vmem:[%s7334_s27 + $0x48] sm:$0xff]   ;;  %v7402_v31 = vld [vmem:[%s7334_s27 + $0x50] sm:$0xff]  }
  0x51   : > { %v7407_v32 = vld [vmem:[%s7334_s27 + $0x58] sm:$0xff]   ;;  %v7416_v33 = vld [vmem:[%s7334_s27 + $0x60] sm:$0xff]   ;;  %v7421_v34 = vld [vmem:[%s7334_s27 + $0x68] sm:$0xff]  }
  0x52   : > { %1867 = vrot.lane.b32.xlu0 %v7340_v22, %s7041_s17  ;;  %1869 = vrot.lane.b32.xlu1 %v7348_v23, %s7041_s17  ;;  %v7430_v35 = vld [vmem:[%s7334_s27 + $0x70] sm:$0xff]   ;;  %v7435_v36 = vld [vmem:[%s7334_s27 + $0x78] sm:$0xff]  }
  0x53   : > { %v7444_v37 = vld [vmem:[%s7334_s27 + $0x80] sm:$0xff]   ;;  %v7449_v38 = vld [vmem:[%s7334_s27 + $0x88] sm:$0xff]   ;;  %v7458_v39 = vld [vmem:[%s7334_s27 + $0x90] sm:$0xff]  }
  0x54   : > { %v7463_v40 = vld [vmem:[%s7334_s27 + $0x98] sm:$0xff]   ;;  %v7472_v41 = vld [vmem:[%s7334_s27 + $0xa0] sm:$0xff]   ;;  %v7477_v42 = vld [vmem:[%s7334_s27 + $0xa8] sm:$0xff]  }
  0x55   : > { %v7486_v43 = vld [vmem:[%s7334_s27 + $0xb0] sm:$0xff]   ;;  %v7491_v44 = vld [vmem:[%s7334_s27 + $0xb8] sm:$0xff]   ;;  %v7500_v45 = vld [vmem:[%s7334_s27 + $0xc0] sm:$0xff]  }
  0x56   : > { %1706 = vrot.lane.b32.xlu0 %v7348_v23, %s7040_s15  ;;  %1871 = vrot.lane.b32.xlu1 %v7355_v24, %s7041_s17  ;;  %v7505_v46 = vld [vmem:[%s7334_s27 + $0xc8] sm:$0xff]   ;;  %v7516_v47 = vld [vmem:[%s7334_s27 + $0xd0] sm:$0xff]  }
  0x57   : > { %v7523_v48 = vld [vmem:[%s7334_s27 + $0xd8] sm:$0xff]   ;;  %v7530_v49 = vld [vmem:[%s7334_s27 + $0xe0] sm:$0xff]   ;;  %v7537_v50 = vld [vmem:[%s7334_s27 + $0xe8] sm:$0xff]  }
  0x58   : > { %v7544_v51 = vld [vmem:[%s7334_s27 + $0xf0] sm:$0xff]   ;;  %v7551_v54 = vld [vmem:[%s7334_s27 + $0xf8] sm:$0xff]   ;;  %v7563_v59 = vld [vmem:[%s7334_s27 + $0x100] sm:$0xff]  }
  0x59   : > { %9540 = vst [vmem:[#allocation4_spill] sm:$0xff] %v7563_v59  ;;  %v6686_v63 = vld [vmem:[%s7334_s27 + $0x108] sm:$0xff]   ;;  %v6687_v3 = vld [vmem:[%s7334_s27 + $0x110] sm:$0xff]   ;;  %v6688_v8 = vld [vmem:[%s7334_s27 + $0x118] sm:$0xff]  }
  0x5a   : > { %1708 = vrot.lane.b32.xlu0 %v7355_v24, %s7040_s15  ;;  %1873 = vrot.lane.b32.xlu1 %v7362_v25, %s7041_s17  ;;  %v6689_v11 = vld [vmem:[%s7334_s27 + $0x120] sm:$0xff]   ;;  %v6690_v16 = vld [vmem:[%s7334_s27 + $0x128] sm:$0xff]  }
  0x5b   : > { %v6691_v20 = vld [vmem:[%s7334_s27 + $0x130] sm:$0xff]  }
  0x5e   : > { %1710 = vrot.lane.b32.xlu0 %v7362_v25, %s7040_s15  ;;  %1875 = vrot.lane.b32.xlu1 %v7369_v26, %s7041_s17 }
  0x62   : > { %1712 = vrot.lane.b32.xlu0 %v7369_v26, %s7040_s15  ;;  %1877 = vrot.lane.b32.xlu1 %v7376_v27, %s7041_s17 }
  0x66   : > { %1714 = vrot.lane.b32.xlu0 %v7376_v27, %s7040_s15  ;;  %1879 = vrot.lane.b32.xlu1 %v7383_v28, %s7041_s17 }
  0x6a   : > { %1716 = vrot.lane.b32.xlu0 %v7383_v28, %s7040_s15  ;;  %1881 = vrot.lane.b32.xlu1 %v7390_v29, %s7041_s17 }
  0x6e   : > { %1718 = vrot.lane.b32.xlu0 %v7390_v29, %s7040_s15  ;;  %1883 = vrot.lane.b32.xlu1 %v7393_v30, %s7041_s17 }
  0x72   : > { %1720 = vrot.lane.b32.xlu0 %v7393_v30, %s7040_s15  ;;  %1885 = vrot.lane.b32.xlu1 %v7402_v31, %s7041_s17 }
  0x76   : > { %1722 = vrot.lane.b32.xlu0 %v7402_v31, %s7040_s15  ;;  %1887 = vrot.lane.b32.xlu1 %v7407_v32, %s7041_s17 }
  0x7a   : > { %1724 = vrot.lane.b32.xlu0 %v7407_v32, %s7040_s15  ;;  %1889 = vrot.lane.b32.xlu1 %v7416_v33, %s7041_s17 }
  0x7e   : > { %1726 = vrot.lane.b32.xlu0 %v7416_v33, %s7040_s15  ;;  %1891 = vrot.lane.b32.xlu1 %v7421_v34, %s7041_s17 }
  0x82   : > { %1728 = vrot.lane.b32.xlu0 %v7421_v34, %s7040_s15  ;;  %1893 = vrot.lane.b32.xlu1 %v7430_v35, %s7041_s17 }
  0x86   : > { %1730 = vrot.lane.b32.xlu0 %v7430_v35, %s7040_s15  ;;  %1895 = vrot.lane.b32.xlu1 %v7435_v36, %s7041_s17 }
  0x8a   : > { %1732 = vrot.lane.b32.xlu0 %v7435_v36, %s7040_s15  ;;  %1897 = vrot.lane.b32.xlu1 %v7444_v37, %s7041_s17 }
  0x8e   : > { %1734 = vrot.lane.b32.xlu0 %v7444_v37, %s7040_s15  ;;  %1899 = vrot.lane.b32.xlu1 %v7449_v38, %s7041_s17 }
  0x92   : > { %1736 = vrot.lane.b32.xlu0 %v7449_v38, %s7040_s15  ;;  %1901 = vrot.lane.b32.xlu1 %v7458_v39, %s7041_s17 }
  0x96   : > { %1738 = vrot.lane.b32.xlu0 %v7458_v39, %s7040_s15  ;;  %1903 = vrot.lane.b32.xlu1 %v7463_v40, %s7041_s17 }
  0x9a   : > { %1740 = vrot.lane.b32.xlu0 %v7463_v40, %s7040_s15  ;;  %1905 = vrot.lane.b32.xlu1 %v7472_v41, %s7041_s17 }
  0x9e   : > { %1742 = vrot.lane.b32.xlu0 %v7472_v41, %s7040_s15  ;;  %1907 = vrot.lane.b32.xlu1 %v7477_v42, %s7041_s17 }
  0xa2   : > { %1744 = vrot.lane.b32.xlu0 %v7477_v42, %s7040_s15  ;;  %1909 = vrot.lane.b32.xlu1 %v7486_v43, %s7041_s17 }
  0xa6   : > { %1746 = vrot.lane.b32.xlu0 %v7486_v43, %s7040_s15  ;;  %1911 = vrot.lane.b32.xlu1 %v7491_v44, %s7041_s17 }
  0xaa   : > { %1748 = vrot.lane.b32.xlu0 %v7491_v44, %s7040_s15  ;;  %1913 = vrot.lane.b32.xlu1 %v7500_v45, %s7041_s17 }
  0xae   : > { %1750 = vrot.lane.b32.xlu0 %v7500_v45, %s7040_s15  ;;  %1915 = vrot.lane.b32.xlu1 %v7505_v46, %s7041_s17 }
  0xb2   : > { %1752 = vrot.lane.b32.xlu0 %v7505_v46, %s7040_s15  ;;  %1917 = vrot.lane.b32.xlu1 %v7516_v47, %s7041_s17 }
  0xb6   : > { %1754 = vrot.lane.b32.xlu0 %v7516_v47, %s7040_s15  ;;  %1919 = vrot.lane.b32.xlu1 %v7523_v48, %s7041_s17 }
  0xba   : > { %1756 = vrot.lane.b32.xlu0 %v7523_v48, %s7040_s15  ;;  %1921 = vrot.lane.b32.xlu1 %v7530_v49, %s7041_s17 }
  0xbe   : > { %1758 = vrot.lane.b32.xlu0 %v7530_v49, %s7040_s15  ;;  %1923 = vrot.lane.b32.xlu1 %v7537_v50, %s7041_s17 }
  0xc0   : > { %v1703_v52 = vpop.permute.xlu0 %1702  ;;  %v1705_v53 = vpop.permute.xlu1 %1704 }
  0xc1   : > { %v2032_v55 = vsel %vm2029_vm2, 0, %v1703_v52  ;;  %v2035_v62 = vsel %vm2029_vm2, %v7337_v21, %v1705_v53  ;;  %v6692_v53 = vld [vmem:[%s7334_s27 + $0x138] sm:$0xff]  }
  0xc2   : > { %1760 = vrot.lane.b32.xlu0 %v7537_v50, %s7040_s15  ;;  %1925 = vrot.lane.b32.xlu1 %v7544_v51, %s7041_s17 }
  0xc4   : > { %v1868_v56 = vpop.permute.xlu0 %1867  ;;  %v1870_v58 = vpop.permute.xlu1 %1869 }
  0xc5   : > { %v2275_v57 = vsel %vm2273_vm3, %v2032_v55, %v1868_v56  ;;  %v2277_v1 = vsel %vm2273_vm3, %v2035_v62, %v1870_v58  ;;  %v6694_v62 = vld [vmem:[%s7334_s27 + $0x148] sm:$0xff]  }
  0xc6   : > { %6161 = vmatmul.mubr.msk.bf16.vlgmr.msra.gmra.mrb[0].mxu0 %vm2441_vm4, %v2275_v57  ;;  %1762 = vrot.lane.b32.xlu0 %v7544_v51, %s7040_s15 }
  0xc7   : > { %6164 = vmatprep.mubr.msk.bf16.mxu0 %vm7039_vm1, %v9535_v18  ;;  %1927 = vrot.lane.b32.xlu1 %v7551_v54, %s7041_s17 }
  0xc8   : > { %v1707_v60 = vpop.permute.xlu0 %1706  ;;  %v1872_v61 = vpop.permute.xlu1 %1871 }
  0xc9   : > { %v2038_v4 = vsel %vm2029_vm2, %v7340_v22, %v1707_v60 }
  0xca   : > { %1764 = vrot.lane.b32.xlu0 %v7551_v54, %s7040_s15  ;;  %v2279_v7 = vsel %vm2273_vm3, %v2038_v4, %v1872_v61 }
  0xcb   : > { %1929 = vrot.lane.b32.xlu1 %v7563_v59, %s7041_s17 }
  0xcc   : > { %v1709_v0 = vpop.permute.xlu0 %1708  ;;  %v1874_v2 = vpop.permute.xlu1 %1873 }
  0xcd   : > { %v2041_v12 = vsel %vm2029_vm2, %v7348_v23, %v1709_v0 }
  0xce   : > { %6165 = vmatmul.mubr.msk.bf16.gmra.mrb[4].mxu0 %vm2441_vm4, %v2277_v1  ;;  %1766 = vrot.lane.b32.xlu0 %v7563_v59, %s7040_s15  ;;  %v2281_v15 = vsel %vm2273_vm3, %v2041_v12, %v1874_v2  ;;  %v6698_v12 = vld [vmem:[%s7334_s27 + $0x168] sm:$0xff]  }
  0xcf   : > { %6168 = vmatprep.mubr.msk.bf16.mxu0 %vm7039_vm1, %v9535_v18  ;;  %1931 = vrot.lane.b32.xlu1 %v6686_v63, %s7041_s17 }
  0xd0   : > { %v1711_v5 = vpop.permute.xlu0 %1710  ;;  %v1876_v6 = vpop.permute.xlu1 %1875 }
  0xd1   : > { %v2044_v21 = vsel %vm2029_vm2, %v7355_v24, %v1711_v5  ;;  %v6693_v24 = vld [vmem:[%s7334_s27 + $0x140] sm:$0xff]   ;;  %v6696_v5 = vld [vmem:[%s7334_s27 + $0x158] sm:$0xff]  }
  0xd2   : > { %1768 = vrot.lane.b32.xlu0 %v6686_v63, %s7040_s15  ;;  %v2283_v52 = vsel %vm2273_vm3, %v2044_v21, %v1876_v6 }
  0xd3   : > { %1933 = vrot.lane.b32.xlu1 %v6687_v3, %s7041_s17 }
  0xd4   : > { %v1713_v9 = vpop.permute.xlu0 %1712  ;;  %v1878_v10 = vpop.permute.xlu1 %1877 }
  0xd5   : > { %v2047_v57 = vsel %vm2029_vm2, %v7362_v25, %v1713_v9  ;;  %v6695_v25 = vld [vmem:[%s7334_s27 + $0x150] sm:$0xff]  }
  0xd6   : > { %6169 = vmatmul.mubr.msk.bf16.gmra.mrb[8].mxu0 %vm2441_vm4, %v2279_v7  ;;  %1770 = vrot.lane.b32.xlu0 %v6687_v3, %s7040_s15  ;;  %v2285_v61 = vsel %vm2273_vm3, %v2047_v57, %v1878_v10  ;;  %v6702_v57 = vld [vmem:[%s7334_s27 + $0x188] sm:$0xff]  }
  0xd7   : > { %6172 = vmatprep.mubr.msk.bf16.mxu0 %vm7039_vm1, %v9535_v18  ;;  %1935 = vrot.lane.b32.xlu1 %v6688_v8, %s7041_s17 }
  0xd8   : > { %v1715_v13 = vpop.permute.xlu0 %1714  ;;  %v1880_v14 = vpop.permute.xlu1 %1879 }
  0xd9   : > { %v2050_v1 = vsel %vm2029_vm2, %v7369_v26, %v1715_v13  ;;  %v6697_v26 = vld [vmem:[%s7334_s27 + $0x160] sm:$0xff]  }
  0xda   : > { %1772 = vrot.lane.b32.xlu0 %v6688_v8, %s7040_s15  ;;  %v2287_v4 = vsel %vm2273_vm3, %v2050_v1, %v1880_v14 }
  0xdb   : > { %1937 = vrot.lane.b32.xlu1 %v6689_v11, %s7041_s17 }
  0xdc   : > { %v1717_v17 = vpop.permute.xlu0 %1716  ;;  %v1882_v19 = vpop.permute.xlu1 %1881 }
  0xdd   : > { %v2053_v8 = vsel %vm2029_vm2, %v7376_v27, %v1717_v17  ;;  %v6699_v27 = vld [vmem:[%s7334_s27 + $0x170] sm:$0xff]  }
  0xde   : > { %6173 = vmatmul.mubr.msk.bf16.gmra.mrb[12].mxu0 %vm2441_vm4, %v2281_v15  ;;  %1774 = vrot.lane.b32.xlu0 %v6689_v11, %s7040_s15  ;;  %v2289_v11 = vsel %vm2273_vm3, %v2053_v8, %v1882_v19 }
  0xdf   : > { %6176 = vmatprep.mubr.msk.bf16.mxu0 %vm7039_vm1, %v9535_v18  ;;  %1939 = vrot.lane.b32.xlu1 %v6690_v16, %s7041_s17 }
  0xe0   : > { %v1719_v22 = vpop.permute.xlu0 %1718  ;;  %v1884_v23 = vpop.permute.xlu1 %1883 }
  0xe1   : > { %v2056_v15 = vsel %vm2029_vm2, %v7383_v28, %v1719_v22  ;;  %v6701_v28 = vld [vmem:[%s7334_s27 + $0x180] sm:$0xff]  }
  0xe2   : > { %1776 = vrot.lane.b32.xlu0 %v6690_v16, %s7040_s15  ;;  %v2291_v19 = vsel %vm2273_vm3, %v2056_v15, %v1884_v23 }
  0xe3   : > { %1941 = vrot.lane.b32.xlu1 %v6691_v20, %s7041_s17 }
  0xe4   : > { %v7610_v55 = vpop.permute.xlu0 %1720  ;;  %v7612_v56 = vpop.permute.xlu1 %1885 }
  0xe5   : > { %v2059_v22 = vsel %vm2029_vm2, %v7390_v29, %v7610_v55  ;;  %v6703_v29 = vld [vmem:[%s7334_s27 + $0x190] sm:$0xff]  }
  0xe6   : > { %6177 = vmatmul.mubr.msk.bf16.gmra.mrb[16].mxu0 %vm2441_vm4, %v2283_v52  ;;  %1778 = vrot.lane.b32.xlu0 %v6691_v20, %s7040_s15  ;;  %v6700_v20 = vld [vmem:[%s7334_s27 + $0x178] sm:$0xff]  }
  0xe7   : > { %6180 = vmatprep.mubr.msk.bf16.mxu0 %vm7039_vm1, %v9535_v18  ;;  %1943 = vrot.lane.b32.xlu1 %v6692_v53, %s7041_s17 }
  0xe8   : > { %v7622_v58 = vpop.permute.xlu0 %1722  ;;  %v7624_v60 = vpop.permute.xlu1 %1887 }
  0xe9   : > { %v2062_v55 = vsel %vm2029_vm2, %v7393_v30, %v7622_v58  ;;  %v6705_v30 = vld [vmem:[%s7334_s27 + $0x1a0] sm:$0xff]  }
  0xea   : > { %1780 = vrot.lane.b32.xlu0 %v6692_v53, %s7040_s15  ;;  %v2295_v1 = vsel %vm2273_vm3, %v2062_v55, %v7624_v60 }
  0xeb   : > { %1945 = vrot.lane.b32.xlu1 %v6693_v24, %s7041_s17 }
  0xec   : > { %v7630_v63 = vpop.permute.xlu0 %1724  ;;  %v7632_v0 = vpop.permute.xlu1 %1889 }
  0xed   : > { %v2065_v58 = vsel %vm2029_vm2, %v7402_v31, %v7630_v63  ;;  %v7763_v31 = vld [vmem:[%s7334_s27 + $0x200] sm:$0xff]   ;;  %v7769_v63 = vld [vmem:[%s7334_s27 + $0x208] sm:$0xff]  }
  0xee   : > { %6181 = vmatmul.mubr.msk.bf16.gmra.mrb[20].mxu0 %vm2441_vm4, %v2285_v61  ;;  %1782 = vrot.lane.b32.xlu0 %v6693_v24, %s7040_s15  ;;  %v2293_v24 = vsel %vm2273_vm3, %v2059_v22, %v7612_v56  ;;  %v6709_v22 = vld [vmem:[%s7334_s27 + $0x1b0] sm:$0xff]  }
  0xef   : > { %6184 = vmatprep.mubr.msk.bf16.mxu0 %vm7039_vm1, %v9535_v18  ;;  %1947 = vrot.lane.b32.xlu1 %v6694_v62, %s7041_s17 }
  0xf0   : > { %v7642_v2 = vpop.permute.xlu0 %1726  ;;  %v7644_v3 = vpop.permute.xlu1 %1891 }
  0xf2   : > { %1784 = vrot.lane.b32.xlu0 %v6694_v62, %s7040_s15 }
  0xf3   : > { %1949 = vrot.lane.b32.xlu1 %v6695_v25, %s7041_s17 }
  0xf4   : > { %v7650_v6 = vpop.permute.xlu0 %1728  ;;  %v7652_v7 = vpop.permute.xlu1 %1893 }
  0xf6   : > { %6185 = vmatmul.mubr.msk.bf16.gmra.mrb[24].mxu0 %vm2441_vm4, %v2287_v4  ;;  %1786 = vrot.lane.b32.xlu0 %v6695_v25, %s7040_s15  ;;  %v6704_v4 = vld [vmem:[%s7334_s27 + $0x198] sm:$0xff]  }
  0xf7   : > { %6188 = vmatprep.mubr.msk.bf16.mxu0 %vm7039_vm1, %v9535_v18  ;;  %1951 = vrot.lane.b32.xlu1 %v6696_v5, %s7041_s17 }
  0xf8   : > { %v7662_v9 = vpop.permute.xlu0 %1730  ;;  %v7664_v10 = vpop.permute.xlu1 %1895 }
  0xfa   : > { %1788 = vrot.lane.b32.xlu0 %v6696_v5, %s7040_s15 }
  0xfb   : > { %1953 = vrot.lane.b32.xlu1 %v6697_v26, %s7041_s17 }
  0xfc   : > { %v7670_v13 = vpop.permute.xlu0 %1732  ;;  %v7672_v14 = vpop.permute.xlu1 %1897 }
  0xfe   : > { %6189 = vmatmul.mubr.msk.bf16.gmra.mrb[28].mxu0 %vm2441_vm4, %v2289_v11  ;;  %1790 = vrot.lane.b32.xlu0 %v6697_v26, %s7040_s15  ;;  %v2297_v11 = vsel %vm2273_vm3, %v2065_v58, %v7632_v0  ;;  %v2068_v0 = vsel %vm2029_vm2, %v7407_v32, %v7642_v2  ;;  %v7795_v32 = vld [vmem:[%s7334_s27 + $0x210] sm:$0xff]   ;;  %v2071_v2 = vsel %vm2029_vm2, %v7416_v33, %v7650_v6  ;;  %v7821_v33 = vld [vmem:[%s7334_s27 + $0x218] sm:$0xff]  }
  0xff   : > { %6192 = vmatprep.mubr.msk.bf16.mxu0 %vm7039_vm1, %v9535_v18  ;;  %1955 = vrot.lane.b32.xlu1 %v6698_v12, %s7041_s17  ;;  %v2301_v55 = vsel %vm2273_vm3, %v2071_v2, %v7652_v7  ;;  %v2074_v6 = vsel %vm2029_vm2, %v7421_v34, %v7662_v9  ;;  %v7847_v34 = vld [vmem:[%s7334_s27 + $0x220] sm:$0xff]   ;;  %v2077_v9 = vsel %vm2029_vm2, %v7430_v35, %v7670_v13  ;;  %v7873_v35 = vld [vmem:[%s7334_s27 + $0x228] sm:$0xff]  }
 0x100   : > { %v7682_v16 = vpop.permute.xlu0 %1734  ;;  %v7684_v17 = vpop.permute.xlu1 %1899  ;;  %v2305_v2 = vsel %vm2273_vm3, %v2077_v9, %v7672_v14  ;;  %v6717_v9 = vld [vmem:[%s7334_s27 + $0x1d0] sm:$0xff]  }
 0x101   : > { %v2080_v13 = vsel %vm2029_vm2, %v7435_v36, %v7682_v16  ;;  %v9543_v36 = vmov 0.0   ;;  %v7899_v16 = vld [vmem:[%s7334_s27 + $0x230] sm:$0xff]  }
 0x102   : > { %1792 = vrot.lane.b32.xlu0 %v6698_v12, %s7040_s15  ;;  %v6706_v12 = vld [vmem:[%s7334_s27 + $0x1a8] sm:$0xff]  }
 0x103   : > { %1957 = vrot.lane.b32.xlu1 %v6699_v27, %s7041_s17 }
 0x104   : > { %v7690_v21 = vpop.permute.xlu0 %1736  ;;  %v7692_v52 = vpop.permute.xlu1 %1901 }
 0x106   : > { %6193 = vmatmul.mubr.msk.bf16.gmra.mrb[32].mxu0 %vm2441_vm4, %v2291_v19  ;;  %1794 = vrot.lane.b32.xlu0 %v6699_v27, %s7040_s15 }
 0x107   : > { %6196 = vmatprep.mubr.msk.bf16.mxu0 %vm7039_vm1, %v9535_v18  ;;  %1959 = vrot.lane.b32.xlu1 %v6700_v20, %s7041_s17 }
 0x108   : > { %v7703_v23 = vpop.permute.xlu0 %1738  ;;  %v7705_v53 = vpop.permute.xlu1 %1903 }
 0x10a   : > { %1796 = vrot.lane.b32.xlu0 %v6700_v20, %s7040_s15 }
 0x10b   : > { %1961 = vrot.lane.b32.xlu1 %v6701_v28, %s7041_s17 }
 0x10c   : > { %v7712_v61 = vpop.permute.xlu0 %1740  ;;  %v7714_v62 = vpop.permute.xlu1 %1905 }
 0x10e   : > { %6197 = vmatmul.mubr.msk.bf16.gmra.mrb[36].mxu0 %vm2441_vm4, %v2293_v24  ;;  %1798 = vrot.lane.b32.xlu0 %v6701_v28, %s7040_s15  ;;  %v2299_v28 = vsel %vm2273_vm3, %v2068_v0, %v7644_v3 }
 0x10f   : > { %6200 = vmatprep.mubr.msk.bf16.mxu0 %vm7039_vm1, %v9535_v18  ;;  %1963 = vrot.lane.b32.xlu1 %v6702_v57, %s7041_s17 }
 0x110   : > { %v7725_v56 = vpop.permute.xlu0 %1742  ;;  %v7727_v25 = vpop.permute.xlu1 %1907 }
 0x112   : > { %1800 = vrot.lane.b32.xlu0 %v6702_v57, %s7040_s15 }
 0x113   : > { %1965 = vrot.lane.b32.xlu1 %v6703_v29, %s7041_s17 }
 0x114   : > { %v7734_v5 = vpop.permute.xlu0 %1744  ;;  %v7736_v26 = vpop.permute.xlu1 %1909 }
 0x116   : > { %6201 = vmatmul.mubr.msk.bf16.gmra.mrb[40].mxu0 %vm2441_vm4, %v2295_v1  ;;  %1802 = vrot.lane.b32.xlu0 %v6703_v29, %s7040_s15  ;;  %v6711_v1 = vld [vmem:[%s7334_s27 + $0x1b8] sm:$0xff]  }
 0x117   : > { %6204 = vmatprep.mubr.msk.bf16.mxu0 %vm7039_vm1, %v9535_v18  ;;  %1967 = vrot.lane.b32.xlu1 %v6704_v4, %s7041_s17 }
 0x118   : > { %v7747_v60 = vpop.permute.xlu0 %1746  ;;  %v7749_v8 = vpop.permute.xlu1 %1911 }
 0x11a   : > { %1804 = vrot.lane.b32.xlu0 %v6704_v4, %s7040_s15 }
 0x11b   : > { %1969 = vrot.lane.b32.xlu1 %v6705_v30, %s7041_s17 }
 0x11c   : > { %v7756_v27 = vpop.permute.xlu0 %1748  ;;  %v7758_v15 = vpop.permute.xlu1 %1913 }
 0x11e   : > { %6205 = vmatmul.mubr.msk.bf16.gmra.mrb[44].mxu0 %vm2441_vm4, %v2297_v11  ;;  %1806 = vrot.lane.b32.xlu0 %v6705_v30, %s7040_s15  ;;  %v2303_v11 = vsel %vm2273_vm3, %v2074_v6, %v7664_v10 }
 0x11f   : > { %6208 = vmatprep.mubr.msk.bf16.mxu0 %vm7039_vm1, %v9535_v18  ;;  %1971 = vrot.lane.b32.xlu1 %v6706_v12, %s7041_s17 }
 0x120   : > { %v7774_v19 = vpop.permute.xlu0 %1750  ;;  %v7776_v20 = vpop.permute.xlu1 %1915 }
 0x122   : > { %1830 = vrot.lane.b32.xlu0 %v7763_v31, %s7040_s15 }
 0x123   : > { %1995 = vrot.lane.b32.xlu1 %v7769_v63, %s7041_s17 }
 0x124   : > { %v7785_v24 = vpop.permute.xlu0 %1752  ;;  %v7787_v57 = vpop.permute.xlu1 %1917 }
 0x126   : > { %6209 = vmatmul.mubr.msk.bf16.gmra.mrb[48].mxu0 %vm2441_vm4, %v2299_v28  ;;  %1808 = vrot.lane.b32.xlu0 %v6706_v12, %s7040_s15  ;;  %v6713_v12 = vld [vmem:[%s7334_s27 + $0x1c0] sm:$0xff]  }
 0x127   : > { %6212 = vmatprep.mubr.msk.bf16.mxu0 %vm7039_vm1, %v9535_v18  ;;  %1973 = vrot.lane.b32.xlu1 %v6709_v22, %s7041_s17 }
 0x128   : > { %v7800_v3 = vpop.permute.xlu0 %1754  ;;  %v7802_v29 = vpop.permute.xlu1 %1919 }
 0x12a   : > { %1832 = vrot.lane.b32.xlu0 %v7769_v63, %s7040_s15 }
 0x12b   : > { %1997 = vrot.lane.b32.xlu1 %v7795_v32, %s7041_s17 }
 0x12c   : > { %v7811_v4 = vpop.permute.xlu0 %1756  ;;  %v7813_v30 = vpop.permute.xlu1 %1921 }
 0x12e   : > { %6213 = vmatmul.mubr.msk.bf16.gmra.mrb[52].mxu0 %vm2441_vm4, %v2301_v55  ;;  %1810 = vrot.lane.b32.xlu0 %v6709_v22, %s7040_s15  ;;  %v6715_v55 = vld [vmem:[%s7334_s27 + $0x1c8] sm:$0xff]  }
 0x12f   : > { %6216 = vmatprep.mubr.msk.bf16.mxu0 %vm7039_vm1, %v9535_v18  ;;  %1975 = vrot.lane.b32.xlu1 %v6711_v1, %s7041_s17 }
 0x130   : > { %v7826_v7 = vpop.permute.xlu0 %1758  ;;  %v7828_v58 = vpop.permute.xlu1 %1923 }
 0x132   : > { %1834 = vrot.lane.b32.xlu0 %v7795_v32, %s7040_s15 }
 0x133   : > { %1999 = vrot.lane.b32.xlu1 %v7821_v33, %s7041_s17 }
 0x134   : > { %v7837_v0 = vpop.permute.xlu0 %1760  ;;  %v7839_v28 = vpop.permute.xlu1 %1925 }
 0x136   : > { %6217 = vmatmul.mubr.msk.bf16.gmra.mrb[56].mxu0 %vm2441_vm4, %v2303_v11  ;;  %1812 = vrot.lane.b32.xlu0 %v6711_v1, %s7040_s15 }
 0x137   : > { %6220 = vmatprep.mubr.msk.bf16.mxu0 %vm7039_vm1, %v9535_v18  ;;  %1977 = vrot.lane.b32.xlu1 %v6713_v12, %s7041_s17 }
 0x138   : > { %v7852_v10 = vpop.permute.xlu0 %1762 }
 0x139   : > { %v7854_v22 = vpop.permute.xlu1 %1927 }
 0x13a   : > { %1836 = vrot.lane.b32.xlu0 %v7821_v33, %s7040_s15 }
 0x13b   : > { %2001 = vrot.lane.b32.xlu1 %v7847_v34, %s7041_s17 }
 0x13c   : > { %v7863_v1 = vpop.permute.xlu0 %1764 }
 0x13d   : > { %v7865_v6 = vpop.permute.xlu1 %1929 }
 0x13e   : > { %6221 = vmatmul.mubr.msk.bf16.gmra.mrb[60].mxu0 %vm2441_vm4, %v2305_v2  ;;  %1814 = vrot.lane.b32.xlu0 %v6713_v12, %s7040_s15  ;;  %v2307_v12 = vsel %vm2273_vm3, %v2080_v13, %v7684_v17  ;;  %v2083_v17 = vsel %vm2029_vm2, %v7444_v37, %v7690_v21  ;;  %v7925_v37 = vld [vmem:[%s7334_s27 + $0x238] sm:$0xff]   ;;  %v2086_v21 = vsel %vm2029_vm2, %v7449_v38, %v7703_v23  ;;  %v7951_v38 = vld [vmem:[%s7334_s27 + $0x240] sm:$0xff]  }
 0x13f   : > { %6224 = vmatprep.mubr.msk.bf16.mxu0 %vm7039_vm1, %v9535_v18  ;;  %1979 = vrot.lane.b32.xlu1 %v6715_v55, %s7041_s17  ;;  %v2089_v23 = vsel %vm2029_vm2, %v7458_v39, %v7712_v61  ;;  %v7980_v39 = vld [vmem:[%s7334_s27 + $0x248] sm:$0xff]   ;;  %v2092_v61 = vsel %vm2029_vm2, %v7463_v40, %v7725_v56  ;;  %v8010_v40 = vld [vmem:[%s7334_s27 + $0x250] sm:$0xff]   ;;  %v2095_v56 = vsel %vm2029_vm2, %v7472_v41, %v7734_v5  ;;  %v8040_v41 = vld [vmem:[%s7334_s27 + $0x258] sm:$0xff]  }
 0x140   : > { %v7878_v14 = vpop.permute.xlu0 %1766  ;;  %v2098_v5 = vsel %vm2029_vm2, %v7477_v42, %v7747_v60  ;;  %v8067_v42 = vld [vmem:[%s7334_s27 + $0x260] sm:$0xff]   ;;  %v2101_v60 = vsel %vm2029_vm2, %v7486_v43, %v7756_v27  ;;  %v2104_v27 = vsel %vm2029_vm2, %v7491_v44, %v7774_v19  ;;  %v8117_v44 = vld [vmem:[%s7334_s27 + $0x278] sm:$0xff]   ;;  %v2107_v19 = vsel %vm2029_vm2, %v7500_v45, %v7785_v24 }
 0x141   : > { %v7880_v11 = vpop.permute.xlu1 %1931  ;;  %v2110_v24 = vsel %vm2029_vm2, %v7505_v46, %v7800_v3  ;;  %v2113_v46 = vsel %vm2029_vm2, %v7516_v47, %v7811_v4  ;;  %v2116_v4 = vsel %vm2029_vm2, %v7523_v48, %v7826_v7 }
 0x142   : > { %1838 = vrot.lane.b32.xlu0 %v7847_v34, %s7040_s15 }
 0x143   : > { %2003 = vrot.lane.b32.xlu1 %v7873_v35, %s7041_s17 }
 0x144   : > { %v7889_v2 = vpop.permute.xlu0 %1768 }
 0x145   : > { %9541 = vst [vmem:[#allocation5_spill] sm:$0xff] %v7889_v2  ;;  %v7891_v18 = vpop.permute.xlu1 %1933 }
 0x146   : > { %9542 = vst [vmem:[#allocation6_spill] sm:$0xff] %v7891_v18  ;;  %6225 = vmatmul.mubr.msk.bf16.gmra.mrb[64].mxu0 %vm2441_vm4, %v2307_v12  ;;  %1816 = vrot.lane.b32.xlu0 %v6715_v55, %s7040_s15  ;;  %v2309_v55 = vsel %vm2273_vm3, %v2083_v17, %v7692_v52  ;;  %v6719_v12 = vld [vmem:[%s7334_s27 + $0x1d8] sm:$0xff]  }
 0x147   : > { %6228 = vmatprep.mubr.msk.bf16.mxu0 %vm7039_vm1, %v9543_v36  ;;  %1981 = vrot.lane.b32.xlu1 %v6717_v9, %s7041_s17 }
 0x148   : > { %v7904_v13 = vpop.permute.xlu0 %1770 }
 0x149   : > { %v7906_v59 = vpop.permute.xlu1 %1935 }
 0x14a   : > { %1840 = vrot.lane.b32.xlu0 %v7873_v35, %s7040_s15 }
 0x14b   : > { %2005 = vrot.lane.b32.xlu1 %v7899_v16, %s7041_s17 }
 0x14c   : > { %v7915_v18 = vpop.permute.xlu0 %1772 }
 0x14d   : > { %9544 = vst [vmem:[#allocation7_spill] sm:$0xff] %v7915_v18  ;;  %v7917_v2 = vpop.permute.xlu1 %1937 }
 0x14e   : > { %9545 = vst [vmem:[#allocation8_spill] sm:$0xff] %v7917_v2  ;;  %6229 = vmatmul.mubr.msk.bf16.gmra.mrb[68].mxu0 %vm2441_vm4, %v2309_v55  ;;  %1818 = vrot.lane.b32.xlu0 %v6717_v9, %s7040_s15  ;;  %v2311_v9 = vsel %vm2273_vm3, %v2086_v21, %v7705_v53  ;;  %v6721_v55 = vld [vmem:[%s7334_s27 + $0x1e0] sm:$0xff]  }
 0x14f   : > { %6232 = vmatprep.mubr.msk.bf16.mxu0 %vm7039_vm1, %v9543_v36  ;;  %1983 = vrot.lane.b32.xlu1 %v6719_v12, %s7041_s17 }
 0x150   : > { %v7930_v52 = vpop.permute.xlu0 %1774 }
 0x151   : > { %v7932_v17 = vpop.permute.xlu1 %1939 }
 0x152   : > { %1842 = vrot.lane.b32.xlu0 %v7899_v16, %s7040_s15 }
 0x153   : > { %2007 = vrot.lane.b32.xlu1 %v7925_v37, %s7041_s17 }
 0x154   : > { %v7941_v2 = vpop.permute.xlu0 %1776 }
 0x155   : > { %9546 = vst [vmem:[#allocation9_spill] sm:$0xff] %v7941_v2  ;;  %v7943_v18 = vpop.permute.xlu1 %1941 }
 0x156   : > { %9547 = vst [vmem:[#allocation10_spill] sm:$0xff] %v7943_v18  ;;  %6233 = vmatmul.mubr.msk.bf16.gmra.mrb[72].mxu0 %vm2441_vm4, %v2311_v9  ;;  %1820 = vrot.lane.b32.xlu0 %v6719_v12, %s7040_s15  ;;  %v2313_v12 = vsel %vm2273_vm3, %v2089_v23, %v7714_v62  ;;  %v7967_v9 = vld [vmem:[%s7334_s27 + $0x1e8] sm:$0xff]  }
 0x157   : > { %6236 = vmatprep.mubr.msk.bf16.mxu0 %vm7039_vm1, %v9543_v36  ;;  %1985 = vrot.lane.b32.xlu1 %v6721_v55, %s7041_s17 }
 0x158   : > { %v7956_v53 = vpop.permute.xlu0 %1778 }
 0x159   : > { %v7958_v21 = vpop.permute.xlu1 %1943 }
 0x15a   : > { %1844 = vrot.lane.b32.xlu0 %v7925_v37, %s7040_s15 }
 0x15b   : > { %2009 = vrot.lane.b32.xlu1 %v7951_v38, %s7041_s17 }
 0x15c   : > { %v7969_v18 = vpop.permute.xlu0 %1780 }
 0x15d   : > { %9548 = vst [vmem:[#allocation11_spill] sm:$0xff] %v7969_v18  ;;  %v7971_v2 = vpop.permute.xlu1 %1945 }
 0x15e   : > { %9549 = vst [vmem:[#allocation12_spill] sm:$0xff] %v7971_v2  ;;  %6237 = vmatmul.mubr.msk.bf16.gmra.mrb[76].mxu0 %vm2441_vm4, %v2313_v12  ;;  %1822 = vrot.lane.b32.xlu0 %v6721_v55, %s7040_s15  ;;  %v2315_v55 = vsel %vm2273_vm3, %v2092_v61, %v7727_v25  ;;  %v7996_v12 = vld [vmem:[%s7334_s27 + $0x1f0] sm:$0xff]  }
 0x15f   : > { %6240 = vmatprep.mubr.msk.bf16.mxu0 %vm7039_vm1, %v9543_v36  ;;  %1987 = vrot.lane.b32.xlu1 %v7967_v9, %s7041_s17 }
 0x160   : > { %v7985_v62 = vpop.permute.xlu0 %1782 }
 0x161   : > { %v7987_v23 = vpop.permute.xlu1 %1947 }
 0x162   : > { %9550 = vst [vmem:[#allocation13_spill] sm:$0xff] %v7987_v23  ;;  %1846 = vrot.lane.b32.xlu0 %v7951_v38, %s7040_s15 }
 0x163   : > { %2011 = vrot.lane.b32.xlu1 %v7980_v39, %s7041_s17 }
 0x164   : > { %v7998_v2 = vpop.permute.xlu0 %1784 }
 0x165   : > { %9551 = vst [vmem:[#allocation14_spill] sm:$0xff] %v7998_v2  ;;  %v8000_v18 = vpop.permute.xlu1 %1949 }
 0x166   : > { %9552 = vst [vmem:[#allocation15_spill] sm:$0xff] %v8000_v18  ;;  %6241 = vmatmul.mubr.msk.bf16.gmra.mrb[80].mxu0 %vm2441_vm4, %v2315_v55  ;;  %1824 = vrot.lane.b32.xlu0 %v7967_v9, %s7040_s15  ;;  %v2317_v55 = vsel %vm2273_vm3, %v2095_v56, %v7736_v26  ;;  %v8026_v18 = vld [vmem:[%s7334_s27 + $0x1f8] sm:$0xff]  }
 0x167   : > { %6244 = vmatprep.mubr.msk.bf16.mxu0 %vm7039_vm1, %v9543_v36  ;;  %1989 = vrot.lane.b32.xlu1 %v7996_v12, %s7041_s17 }
 0x168   : > { %v8015_v25 = vpop.permute.xlu0 %1786 }
 0x169   : > { %v8017_v61 = vpop.permute.xlu1 %1951 }
 0x16a   : > { %1848 = vrot.lane.b32.xlu0 %v7980_v39, %s7040_s15 }
 0x16b   : > { %2013 = vrot.lane.b32.xlu1 %v8010_v40, %s7041_s17 }
 0x16c   : > { %v8028_v2 = vpop.permute.xlu0 %1788 }
 0x16d   : > { %9553 = vst [vmem:[#allocation16_spill] sm:$0xff] %v8028_v2  ;;  %v8030_v23 = vpop.permute.xlu1 %1953 }
 0x16e   : > { %9554 = vst [vmem:[#allocation17_spill] sm:$0xff] %v8030_v23  ;;  %6245 = vmatmul.mubr.msk.bf16.gmra.mrb[84].mxu0 %vm2441_vm4, %v2317_v55  ;;  %1826 = vrot.lane.b32.xlu0 %v7996_v12, %s7040_s15  ;;  %v2319_v55 = vsel %vm2273_vm3, %v2098_v5, %v7749_v8 }
 0x16f   : > { %6248 = vmatprep.mubr.msk.bf16.mxu0 %vm7039_vm1, %v9543_v36  ;;  %1991 = vrot.lane.b32.xlu1 %v8026_v18, %s7041_s17 }
 0x170   : > { %v8045_v26 = vpop.permute.xlu0 %1790 }
 0x171   : > { %v8047_v56 = vpop.permute.xlu1 %1955 }
 0x172   : > { %1850 = vrot.lane.b32.xlu0 %v8010_v40, %s7040_s15 }
 0x173   : > { %2015 = vrot.lane.b32.xlu1 %v8040_v41, %s7041_s17 }
 0x174   : > { %v8055_v23 = vpop.permute.xlu0 %1792 }
 0x175   : > { %9555 = vst [vmem:[#allocation18_spill] sm:$0xff] %v8055_v23  ;;  %v8057_v2 = vpop.permute.xlu1 %1957 }
 0x176   : > { %9556 = vst [vmem:[#allocation19_spill] sm:$0xff] %v8057_v2  ;;  %6249 = vmatmul.mubr.msk.bf16.gmra.mrb[88].mxu0 %vm2441_vm4, %v2319_v55  ;;  %1828 = vrot.lane.b32.xlu0 %v8026_v18, %s7040_s15  ;;  %v2321_v55 = vsel %vm2273_vm3, %v2101_v60, %v7758_v15  ;;  %v8083_v2 = vld [vmem:[%s7334_s27 + $0x268] sm:$0xff]  }
 0x177   : > { %6252 = vmatprep.mubr.msk.bf16.mxu0 %vm7039_vm1, %v9543_v36  ;;  %1993 = vrot.lane.b32.xlu1 %v7763_v31, %s7041_s17 }
 0x178   : > { %v8072_v8 = vpop.permute.xlu0 %1794 }
 0x179   : > { %v8074_v5 = vpop.permute.xlu1 %1959 }
 0x17a   : > { %9557 = vst [vmem:[#allocation20_spill] sm:$0xff] %v8074_v5  ;;  %1852 = vrot.lane.b32.xlu0 %v8040_v41, %s7040_s15 }
 0x17b   : > { %2017 = vrot.lane.b32.xlu1 %v8067_v42, %s7041_s17 }
 0x17c   : > { %v8085_v23 = vpop.permute.xlu0 %1796 }
 0x17d   : > { %9558 = vst [vmem:[#allocation21_spill] sm:$0xff] %v8085_v23  ;;  %v8087_v43 = vpop.permute.xlu1 %1961 }
 0x17e   : > { %9559 = vst [vmem:[#allocation22_spill] sm:$0xff] %v8087_v43  ;;  %6253 = vmatmul.mubr.msk.bf16.gmra.mrb[92].mxu0 %vm2441_vm4, %v2321_v55  ;;  %1854 = vrot.lane.b32.xlu0 %v8067_v42, %s7040_s15  ;;  %v8104_v43 = vld [vmem:[%s7334_s27 + $0x270] sm:$0xff]   ;;  %v2323_v55 = vsel %vm2273_vm3, %v2104_v27, %v7776_v20 }
 0x17f   : > { %6256 = vmatprep.mubr.msk.bf16.mxu0 %vm7039_vm1, %v9543_v36  ;;  %2019 = vrot.lane.b32.xlu1 %v8083_v2, %s7041_s17 }
 0x180   : > { %v8099_v15 = vpop.permute.xlu0 %1798 }
 0x181   : > { %9560 = vst [vmem:[#allocation23_spill] sm:$0xff] %v8099_v15  ;;  %v8101_v60 = vpop.permute.xlu1 %1963 }
 0x182   : > { %9561 = vst [vmem:[#allocation24_spill] sm:$0xff] %v8101_v60  ;;  %1856 = vrot.lane.b32.xlu0 %v8083_v2, %s7040_s15 }
 0x183   : > { %2021 = vrot.lane.b32.xlu1 %v8104_v43, %s7041_s17 }
 0x184   : > { %v8112_v23 = vpop.permute.xlu0 %1800 }
 0x185   : > { %9562 = vst [vmem:[#allocation25_spill] sm:$0xff] %v8112_v23  ;;  %v8114_v5 = vpop.permute.xlu1 %1965  ;;  %v9538_v23 = vmov 0  }
 0x186   : > { %9563 = vst [vmem:[#allocation26_spill] sm:$0xff] %v8114_v5  ;;  %6257 = vmatmul.mubr.msk.bf16.gmra.mrb[96].mxu0 %vm2441_vm4, %v2323_v55  ;;  %1858 = vrot.lane.b32.xlu0 %v8104_v43, %s7040_s15  ;;  %v6733_v5 = vld [vmem:[%s7334_s27 + $0x280] sm:$0xff]   ;;  %v2325_v55 = vsel %vm2273_vm3, %v2107_v19, %v7787_v57  ;;  %v5761_v60 = vcombine.low %v9538_v23, %v9538_v23 }
 0x187   : > { %6260 = vmatprep.mubr.msk.bf16.mxu0 %vm7039_vm1, %v9543_v36  ;;  %2023 = vrot.lane.b32.xlu1 %v8117_v44, %s7041_s17  ;;  %v2327_v23 = vsel %vm2273_vm3, %v2110_v24, %v7802_v29 }
 0x188   : > { %v8129_v20 = vpop.permute.xlu0 %1802 }
 0x189   : > { %v8131_v27 = vpop.permute.xlu1 %1967 }
 0x18a   : > { %1860 = vrot.lane.b32.xlu0 %v8117_v44, %s7040_s15 }
 0x18b   : > { %2025 = vrot.lane.b32.xlu1 %v6733_v5, %s7041_s17 }
 0x18c   : > { %v8141_v15 = vpop.permute.xlu0 %1804 }
 0x18d   : > { %v8143_v45 = vpop.permute.xlu1 %1969 }
 0x18e   : > { %9564 = vst [vmem:[#allocation27_spill] sm:$0xff] %v8143_v45  ;;  %6261 = vmatmul.mubr.msk.bf16.gmra.mrb[100].mxu0 %vm2441_vm4, %v2325_v55  ;;  %1862 = vrot.lane.b32.xlu0 %v6733_v5, %s7040_s15 }
 0x18f   : > { %6264 = vmatprep.mubr.msk.bf16.mxu0 %vm7039_vm1, %v9543_v36  ;;  %2027 = vrot.lane.b32.xlu1 %v5761_v60, %s7041_s17 }
 0x190   : > { %v8153_v57 = vpop.permute.xlu0 %1806 }
 0x191   : > { %v8155_v19 = vpop.permute.xlu1 %1971 }
 0x192   : > { %9565 = vst [vmem:[#allocation28_spill] sm:$0xff] %v8155_v19 }
 0x194   : > { %v1831_v45 = vpop.permute.xlu0 %1830 }
 0x195   : > { %v2224_v5 = vsel %vm2029_vm2, %v8026_v18, %v1831_v45  ;;  %v1996_v55 = vpop.permute.xlu1 %1995  ;;  %v2329_v45 = vsel %vm2273_vm3, %v2113_v46, %v7813_v30 }
 0x196   : > { %6265 = vmatmul.mubr.msk.bf16.gmra.mrb[104].mxu0 %vm2441_vm4, %v2327_v23  ;;  %v2403_v60 = vsel %vm2273_vm3, %v2224_v5, %v1996_v55 }
 0x197   : > { %6268 = vmatprep.mubr.msk.bf16.mxu0 %vm7039_vm1, %v9543_v36  ;;  %6417 = vmatmul.mubr.msk.bf16.vlgmr.msra.gmra.mrb[0].mxu1 %vm2441_vm4, %v2403_v60 }
 0x198   : > { %v8169_v3 = vpop.permute.xlu0 %1808  ;;  %6420 = vmatprep.mubr.msk.bf16.mxu1 %vm7039_vm1, %v9543_v36 }
 0x199   : > { %v2642_v18 = vpop.f32.mrb[0].mxu0  ;;  %v8173_v29 = vpop.permute.xlu1 %1973 }
 0x19a   : > { %v6162_v23 = vpop.f32.mrb[1].mxu0 }
 0x19b   : > { %v2645_v24 = vpop.f32.mrb[2].mxu0 }
 0x19c   : > { %v6163_v5 = vpop.f32.mrb[3].mxu0  ;;  %v1833_v55 = vpop.permute.xlu0 %1832 }
 0x19d   : > { %v2227_v60 = vsel %vm2029_vm2, %v7763_v31, %v1833_v55  ;;  %v1998_v19 = vpop.permute.xlu1 %1997 }
 0x19e   : > { %6269 = vmatmul.mubr.msk.bf16.gmra.mrb[108].mxu0 %vm2441_vm4, %v2329_v45  ;;  %v2405_v47 = vsel %vm2273_vm3, %v2227_v60, %v1998_v19  ;;  %v2331_v19 = vsel %vm2273_vm3, %v2116_v4, %v7828_v58  ;;  %v2119_v58 = vsel %vm2029_vm2, %v7530_v49, %v7837_v0 }
 0x19f   : > { %6272 = vmatprep.mubr.msk.bf16.mxu0 %vm7039_vm1, %v9543_v36  ;;  %6421 = vmatmul.mubr.msk.bf16.gmra.mrb[4].mxu1 %vm2441_vm4, %v2405_v47 }
 0x1a0   : > { %v8187_v30 = vpop.permute.xlu0 %1810  ;;  %6424 = vmatprep.mubr.msk.bf16.mxu1 %vm7039_vm1, %v9543_v36 }
 0x1a1   : > { %9566 = vst [vmem:[#allocation29_spill] sm:$0xff] %v8187_v30  ;;  %v2650_v31 = vpop.f32.mrb[4].mxu0  ;;  %v8191_v46 = vpop.permute.xlu1 %1975 }
 0x1a2   : > { %v3289_v23 = vmax.f32 %v2642_v18, %v2650_v31  ;;  %v6166_v45 = vpop.f32.mrb[5].mxu0 }
 0x1a3   : > { %v2653_v5 = vpop.f32.mrb[6].mxu0 }
 0x1a4   : > { %v3290_v55 = vmax.f32 %v2645_v24, %v2653_v5  ;;  %v6167_v60 = vpop.f32.mrb[7].mxu0  ;;  %v1835_v47 = vpop.permute.xlu0 %1834 }
 0x1a5   : > { %v2230_v48 = vsel %vm2029_vm2, %v7769_v63, %v1835_v47  ;;  %v2000_v7 = vpop.permute.xlu1 %1999  ;;  %v8212_v63 = vld [vmem:[%s9523_s2] ss:$0 sm:$0xff] }
 0x1a6   : > { %6273 = vmatmul.mubr.msk.bf16.gmra.mrb[112].mxu0 %vm2441_vm4, %v2331_v19  ;;  %v2407_v30 = vsel %vm2273_vm3, %v2230_v48, %v2000_v7 }
 0x1a7   : > { %6276 = vmatprep.mubr.msk.bf16.mxu0 %vm7039_vm1, %v9543_v36  ;;  %6425 = vmatmul.mubr.msk.bf16.gmra.mrb[8].mxu1 %vm2441_vm4, %v2407_v30  ;;  %v2333_v30 = vsel %vm2273_vm3, %v2119_v58, %v7839_v28  ;;  %v2122_v28 = vsel %vm2029_vm2, %v7537_v50, %v7852_v10 }
 0x1a8   : > { %v8205_v18 = vpop.permute.xlu0 %1812  ;;  %6428 = vmatprep.mubr.msk.bf16.mxu1 %vm7039_vm1, %v9543_v36 }
 0x1a9   : > { %v2658_v24 = vpop.f32.mrb[8].mxu0  ;;  %v8214_v4 = vpop.permute.xlu1 %1977 }
 0x1aa   : > { %9567 = vst [vmem:[#allocation30_spill] sm:$0xff] %v8214_v4  ;;  %v3343_v31 = vmax.f32 %v3289_v23, %v2658_v24  ;;  %v6170_v45 = vpop.f32.mrb[9].mxu0 }
 0x1ab   : > { %v2661_v19 = vpop.f32.mrb[10].mxu0 }
 0x1ac   : > { %v8219_v49 = vadd.f32 %v8212_v63, %v3343_v31  ;;  %v3344_v0 = vmax.f32 %v3290_v55, %v2661_v19  ;;  %v6171_v5 = vpop.f32.mrb[11].mxu0  ;;  %v1837_v60 = vpop.permute.xlu0 %1836  ;;  %v2335_v19 = vsel %vm2273_vm3, %v2122_v28, %v7854_v22  ;;  %v2125_v22 = vsel %vm2029_vm2, %v7544_v51, %v7863_v1 }
 0x1ad   : > { %v2233_v47 = vsel %vm2029_vm2, %v7795_v32, %v1837_v60  ;;  %v2002_v48 = vpop.permute.xlu1 %2001 }
 0x1ae   : > { %v3511_v7 = vmin.f32 %v8219_v49, 0.0  ;;  %v3404_v4 = vadd.f32 %v8212_v63, %v3344_v0  ;;  %6277 = vmatmul.mubr.msk.bf16.gmra.mrb[116].mxu0 %vm2441_vm4, %v2333_v30  ;;  %v2409_v23 = vsel %vm2273_vm3, %v2233_v47, %v2002_v48  ;;  %vm3457_vm5 = vcmp.gt.f32.partialorder %v8219_v49, 0.0 }
 0x1af   : > { %6280 = vmatprep.mubr.msk.bf16.mxu0 %vm7039_vm1, %v9543_v36  ;;  %6429 = vmatmul.mubr.msk.bf16.gmra.mrb[12].mxu1 %vm2441_vm4, %v2409_v23 }
 0x1b0   : > { %v3565_v55 = vmul.f32 1.442695, %v3511_v7  ;;  %v3512_v32 = vmin.f32 %v3404_v4, 0.0  ;;  %v8233_v58 = vpop.permute.xlu0 %1814  ;;  %6432 = vmatprep.mubr.msk.bf16.mxu1 %vm7039_vm1, %v9543_v36  ;;  %vm3458_vm6 = vcmp.gt.f32.partialorder %v3404_v4, 0.0 }
 0x1b1   : > { %v2666_v24 = vpop.f32.mrb[12].mxu0  ;;  %v8237_v31 = vpop.permute.xlu1 %1979 }
 0x1b2   : > { %6819 = vpow2.f32 %v3565_v55  ;;  %v3567_v45 = vmul.f32 1.442695, %v3512_v32  ;;  %v6174_v30 = vpop.f32.mrb[13].mxu0  ;;  %v2337_v55 = vsel %vm2273_vm3, %v2125_v22, %v7865_v6 }
 0x1b3   : > { %v2669_v0 = vpop.f32.mrb[14].mxu0 }
 0x1b4   : > { %6821 = vpow2.f32 %v3567_v45  ;;  %v6175_v5 = vpop.f32.mrb[15].mxu0  ;;  %v1839_v50 = vpop.permute.xlu0 %1838  ;;  %v6734_v45 = vld [vmem:[%s9524_s3] sm:$0xff]  }
 0x1b5   : > { %v2236_v10 = vsel %vm2029_vm2, %v7821_v33, %v1839_v50  ;;  %v2004_v60 = vpop.permute.xlu1 %2003  ;;  %6485 = vmatpush3.bf16.msra.mxu1 %v6734_v45 }
 0x1b6   : > { %6281 = vmatmul.mubr.msk.bf16.gmra.mrb[120].mxu0 %vm2441_vm4, %v2335_v19  ;;  %v2411_v47 = vsel %vm2273_vm3, %v2236_v10, %v2004_v60  ;;  %6486 = vmatprep.subr.bf16.mxu1 %v9543_v36 }
 0x1b7   : > { %6284 = vmatprep.mubr.msk.bf16.mxu0 %vm7039_vm1, %v9543_v36  ;;  %6433 = vmatmul.mubr.msk.bf16.gmra.mrb[16].mxu1 %vm2441_vm4, %v2411_v47 }
 0x1b8   : > { %v8251_v48 = vpop.permute.xlu0 %1816  ;;  %6436 = vmatprep.mubr.msk.bf16.mxu1 %vm7039_vm1, %v9543_v36 }
 0x1b9   : > { %v2674_v33 = vpop.f32.mrb[16].mxu0  ;;  %v8255_v7 = vpop.permute.xlu1 %1981 }
 0x1ba   : > { %v3291_v23 = vmax.f32 %v2666_v24, %v2674_v33  ;;  %v6178_v28 = vpop.f32.mrb[17].mxu0 }
 0x1bb   : > { %v2677_v32 = vpop.f32.mrb[18].mxu0 }
 0x1bc   : > { %v6820_v30 = vpop.eup %6819  ;;  %v3292_v51 = vmax.f32 %v2669_v0, %v2677_v32  ;;  %v6179_v1 = vpop.f32.mrb[19].mxu0  ;;  %v6735_v0 = vld [vmem:[%s9524_s3 + $0x8] sm:$0xff]  }
 0x1bd   : > { %v1841_v19 = vpop.permute.xlu0 %1840  ;;  %v5845_v5 = vadd.f32 -1.0, %v6820_v30  ;;  %v2006_v10 = vpop.permute.xlu1 %2005  ;;  %6487 = vmatpush3.bf16.msra.mxu1 %v6735_v0  ;;  %v6736_v1 = vld [vmem:[%s9524_s3 + $0x10] sm:$0xff]  }
 0x1be   : > { %v2239_v50 = vsel %vm2029_vm2, %v7847_v34, %v1841_v19  ;;  %v6822_v24 = vpop.eup %6821  ;;  %6285 = vmatmul.mubr.msk.bf16.gmra.mrb[124].mxu0 %vm2441_vm4, %v2337_v55  ;;  %v2128_v34 = vsel %vm2029_vm2, %v7551_v54, %v7878_v14  ;;  %6488 = vmatprep.subr.bf16.mxu1 %v9543_v36 }
 0x1bf   : > { %v2413_v6 = vsel %vm2273_vm3, %v2239_v50, %v2006_v10  ;;  %v5846_v60 = vadd.f32 -1.0, %v6822_v24  ;;  %6288 = vmatprep.mubr.msk.bf16.mxu0 %vm7039_vm1, %v9543_v36  ;;  %v3727_v22 = vsel %vm3457_vm5, %v8219_v49, %v5845_v5  ;;  %v2339_v54 = vsel %vm2273_vm3, %v2128_v34, %v7880_v11  ;;  %v9568_v24 = vld [vmem:[#allocation5_spill] sm:$0xff] }
 0x1c0   : > { %6437 = vmatmul.mubr.msk.bf16.gmra.mrb[20].mxu1 %vm2441_vm4, %v2413_v6  ;;  %v9569_v6 = vld [vmem:[#allocation4_spill] sm:$0xff] }
 0x1c1   : > { %v8277_v47 = vpop.permute.xlu0 %1818  ;;  %6440 = vmatprep.mubr.msk.bf16.mxu1 %vm7039_vm1, %v9543_v36  ;;  %v3728_v33 = vsel %vm3458_vm6, %v3404_v4, %v5846_v60  ;;  %v2682_v28 = vpop.f32.mrb[20].mxu0  ;;  %6489 = vmatpush3.bf16.msra.mxu1 %v6736_v1  ;;  %v2131_v60 = vsel %vm2029_vm2, %v9569_v6, %v9568_v24 }
 0x1c2   : > { %v8282_v55 = vpop.permute.xlu1 %1983  ;;  %v3345_v32 = vmax.f32 %v3291_v23, %v2682_v28  ;;  %v6182_v45 = vpop.f32.mrb[21].mxu0  ;;  %v8284_v30 = vpack.c.bf16 %v3728_v33, %v3727_v22  ;;  %6490 = vmatprep.subr.bf16.mxu1 %v9543_v36 }
 0x1c3   : > { %v2685_v14 = vpop.f32.mrb[22].mxu0 }
 0x1c4   : > { %v8293_v4 = vadd.f32 %v8212_v63, %v3345_v32  ;;  %v3346_v49 = vmax.f32 %v3292_v51, %v2685_v14  ;;  %3846 = vrot.lane.b32.xlu0 %v8284_v30, %s7043_s26  ;;  %v6183_v23 = vpop.f32.mrb[23].mxu0  ;;  %v6738_v32 = vld [vmem:[%s9524_s3 + $0x20] sm:$0x3f]   ;;  %v7044_v14 = vmov 65535  }
 0x1c5   : > { %v1843_v19 = vpop.permute.xlu0 %1842  ;;  %v4175_v1 = vsel %vm4174_vm7, 4294967295, %v7044_v14  ;;  %vm3954_vm7 = vcmask 203776  }
 0x1c6   : > { %v2242_v5 = vsel %vm2029_vm2, %v7873_v35, %v1843_v19  ;;  %v2008_v50 = vpop.permute.xlu1 %2007  ;;  %v3513_v11 = vmin.f32 %v8293_v4, 0.0  ;;  %v8301_v10 = vadd.f32 %v8212_v63, %v3346_v49  ;;  %6289 = vmatmul.mubr.msk.bf16.gmra.mrb[128].mxu0 %vm2441_vm4, %v2339_v54  ;;  %v6737_v35 = vld [vmem:[%s9524_s3 + $0x18] sm:$0xff]   ;;  %v9570_v49 = vld [vmem:[#allocation6_spill] sm:$0xff]  ;;  %vm3459_vm8 = vcmp.gt.f32.partialorder %v8293_v4, 0.0 }
 0x1c7   : > { %v2415_v51 = vsel %vm2273_vm3, %v2242_v5, %v2008_v50  ;;  %6292 = vmatprep.mubr.msk.bf16.mxu0 %vm7039_vm1, %v9543_v36  ;;  %6491 = vmatpush3.bf16.msra.mxu1 %v6737_v35  ;;  %v2341_v23 = vsel %vm2273_vm3, %v2131_v60, %v9570_v49  ;;  %v4176_v5 = vsel %vm2604_vm0, %v4175_v1, 0  ;;  %v6983_v60 = vld [vmem:[%s7334_s27 + $0x108] sm:$0xff]  }
 0x1c8   : > { %6441 = vmatmul.mubr.msk.bf16.gmra.mrb[24].mxu1 %vm2441_vm4, %v2415_v51  ;;  %v3569_v0 = vmul.f32 1.442695, %v3513_v11  ;;  %v3514_v34 = vmin.f32 %v8301_v10, 0.0  ;;  %6492 = vmatprep.subr.bf16.mxu1 %v9543_v36  ;;  %v4178_v51 = vand.u32 %v6738_v32, %v4176_v5  ;;  %vm3460_vm9 = vcmp.gt.f32.partialorder %v8301_v10, 0.0 }
 0x1c9   : > { %v8316_v22 = vpop.permute.xlu0 %1820  ;;  %6444 = vmatprep.mubr.msk.bf16.mxu1 %vm7039_vm1, %v9543_v36  ;;  %v2690_v33 = vpop.f32.mrb[24].mxu0 }
 0x1ca   : > { %v8320_v28 = vpop.permute.xlu1 %1985  ;;  %6823 = vpow2.f32 %v3569_v0  ;;  %v3571_v45 = vmul.f32 1.442695, %v3514_v34  ;;  %v6186_v54 = vpop.f32.mrb[25].mxu0  ;;  %v2134_v0 = vsel %vm2029_vm2, %v6983_v60, %v7904_v13 }
 0x1cb   : > { %v2693_v19 = vpop.f32.mrb[26].mxu0  ;;  %6493 = vmatpush3.bf16.msra.mxu1 %v4178_v51  ;;  %v2343_v1 = vsel %vm2273_vm3, %v2134_v0, %v7906_v59  ;;  %v6984_v59 = vld [vmem:[%s7334_s27 + $0x110] sm:$0xff]  }
 0x1cc   : > { %6825 = vpow2.f32 %v3571_v45  ;;  %v6187_v50 = vpop.f32.mrb[27].mxu0 }
 0x1cd   : > { %v1845_v11 = vpop.permute.xlu0 %1844 }
 0x1ce   : > { %v2245_v35 = vsel %vm2029_vm2, %v7899_v16, %v1845_v11  ;;  %v2010_v24 = vpop.permute.xlu1 %2009  ;;  %6293 = vmatmul.mubr.msk.bf16.gmra.mrb[132].mxu0 %vm2441_vm4, %v2341_v23  ;;  %v9571_v16 = vmov 0  }
 0x1cf   : > { %v2417_v6 = vsel %vm2273_vm3, %v2245_v35, %v2010_v24  ;;  %6296 = vmatprep.mubr.msk.bf16.mxu0 %vm7039_vm1, %v9543_v36  ;;  %4805 = vmatprep.subr.bf16.mxu1 %v9571_v16 }
 0x1d0   : > { %6445 = vmatmul.mubr.msk.bf16.gmra.mrb[28].mxu1 %vm2441_vm4, %v2417_v6 }
 0x1d1   : > { %v8339_v34 = vpop.permute.xlu0 %1822  ;;  %6448 = vmatprep.mubr.msk.bf16.mxu1 %vm7039_vm1, %v9543_v36  ;;  %v2698_v32 = vpop.f32.mrb[28].mxu0 }
 0x1d2   : > { %v8344_v45 = vpop.permute.xlu1 %1987  ;;  %v3293_v54 = vmax.f32 %v2690_v33, %v2698_v32  ;;  %v6190_v14 = vpop.f32.mrb[29].mxu0 }
 0x1d3   : > { %v2701_v49 = vpop.f32.mrb[30].mxu0 }
 0x1d4   : > { %v6824_v23 = vpop.eup %6823  ;;  %v3294_v5 = vmax.f32 %v2693_v19, %v2701_v49  ;;  %v6191_v13 = vpop.f32.mrb[31].mxu0  ;;  %v9572_v19 = vld [vmem:[#allocation7_spill] sm:$0xff] }
 0x1d5   : > { %v1847_v50 = vpop.permute.xlu0 %1846  ;;  %v5847_v11 = vadd.f32 -1.0, %v6824_v23  ;;  %v2137_v60 = vsel %vm2029_vm2, %v6984_v59, %v9572_v19  ;;  %v6985_v19 = vld [vmem:[%s7334_s27 + $0x118] sm:$0xff]  }
 0x1d6   : > { %v2248_v51 = vsel %vm2029_vm2, %v7925_v37, %v1847_v50  ;;  %v2012_v35 = vpop.permute.xlu1 %2011  ;;  %v6826_v24 = vpop.eup %6825  ;;  %6297 = vmatmul.mubr.msk.bf16.gmra.mrb[136].mxu0 %vm2441_vm4, %v2343_v1  ;;  %v9573_v50 = vld [vmem:[#allocation8_spill] sm:$0xff] }
 0x1d7   : > { %v2419_v33 = vsel %vm2273_vm3, %v2248_v51, %v2012_v35  ;;  %v5848_v6 = vadd.f32 -1.0, %v6826_v24  ;;  %6300 = vmatprep.mubr.msk.bf16.mxu0 %vm7039_vm1, %v9543_v36  ;;  %v3729_v0 = vsel %vm3459_vm8, %v8293_v4, %v5847_v11  ;;  %v2345_v51 = vsel %vm2273_vm3, %v2137_v60, %v9573_v50 }
 0x1d8   : > { %6449 = vmatmul.mubr.msk.bf16.gmra.mrb[32].mxu1 %vm2441_vm4, %v2419_v33  ;;  %v2140_v60 = vsel %vm2029_vm2, %v6985_v19, %v7930_v52  ;;  %vm4035_vm8 = vcmask 408576  }
 0x1d9   : > { %v8360_v37 = vpop.permute.xlu0 %1824  ;;  %6452 = vmatprep.mubr.msk.bf16.mxu1 %vm7039_vm1, %v9543_v36  ;;  %v3730_v32 = vsel %vm3460_vm9, %v8301_v10, %v5848_v6  ;;  %v2706_v14 = vpop.f32.mrb[32].mxu0  ;;  %v2347_v52 = vsel %vm2273_vm3, %v2140_v60, %v7932_v17  ;;  %vm4119_vm9 = vcmask 613376  }
 0x1da   : > { %v8366_v1 = vpop.permute.xlu1 %1989  ;;  %v3347_v49 = vmax.f32 %v3293_v54, %v2706_v14  ;;  %v6194_v23 = vpop.f32.mrb[33].mxu0  ;;  %v8368_v13 = vpack.c.bf16 %v3730_v32, %v3729_v0 }
 0x1db   : > { %v2709_v35 = vpop.f32.mrb[34].mxu0 }
 0x1dc   : > { %v8373_v24 = vadd.f32 %v8212_v63, %v3347_v49  ;;  %v3348_v33 = vmax.f32 %v3294_v5, %v2709_v35  ;;  %3848 = vrot.lane.b32.xlu0 %v8368_v13, %s7043_s26  ;;  %3900 = vrot.lane.b32.xlu1 %v8368_v13, %s7045_s19  ;;  %v6195_v4 = vpop.f32.mrb[35].mxu0 }
 0x1dd   : > { %v1849_v10 = vpop.permute.xlu0 %1848 }
 0x1de   : > { %v2251_v54 = vsel %vm2029_vm2, %v7951_v38, %v1849_v10  ;;  %v2014_v11 = vpop.permute.xlu1 %2013  ;;  %v3515_v6 = vmin.f32 %v8373_v24, 0.0  ;;  %v3408_v59 = vadd.f32 %v8212_v63, %v3348_v33  ;;  %6301 = vmatmul.mubr.msk.bf16.gmra.mrb[140].mxu0 %vm2441_vm4, %v2345_v51  ;;  %vm3461_vm10 = vcmp.gt.f32.partialorder %v8373_v24, 0.0 }
 0x1df   : > { %v2421_v5 = vsel %vm2273_vm3, %v2251_v54, %v2014_v11  ;;  %6304 = vmatprep.mubr.msk.bf16.mxu0 %vm7039_vm1, %v9543_v36 }
 0x1e0   : > { %6453 = vmatmul.mubr.msk.bf16.gmra.mrb[36].mxu1 %vm2441_vm4, %v2421_v5  ;;  %v3573_v0 = vmul.f32 1.442695, %v3515_v6  ;;  %v3516_v38 = vmin.f32 %v3408_v59, 0.0  ;;  %v6986_v6 = vld [vmem:[%s7334_s27 + $0x120] sm:$0xff]   ;;  %v9574_v5 = vld [vmem:[#allocation9_spill] sm:$0xff]  ;;  %vm3462_vm11 = vcmp.gt.f32.partialorder %v3408_v59, 0.0 }
 0x1e1   : > { %v1827_v32 = vpop.permute.xlu0 %1826  ;;  %6456 = vmatprep.mubr.msk.bf16.mxu1 %vm7039_vm1, %v9543_v36  ;;  %v2714_v14 = vpop.f32.mrb[36].mxu0  ;;  %v2143_v17 = vsel %vm2029_vm2, %v6986_v6, %v9574_v5 }
 0x1e2   : > { %v2218_v49 = vsel %vm2029_vm2, %v7967_v9, %v1827_v32  ;;  %v1992_v23 = vpop.permute.xlu1 %1991  ;;  %6827 = vpow2.f32 %v3573_v0  ;;  %v3575_v50 = vmul.f32 1.442695, %v3516_v38  ;;  %v6198_v51 = vpop.f32.mrb[37].mxu0 }
 0x1e3   : > { %v8396_v35 = vsel %vm2273_vm3, %v2218_v49, %v1992_v23  ;;  %v2717_v33 = vpop.f32.mrb[38].mxu0  ;;  %v9575_v23 = vld [vmem:[#allocation10_spill] sm:$0xff] }
 0x1e4   : > { %6829 = vpow2.f32 %v3575_v50  ;;  %v6199_v4 = vpop.f32.mrb[39].mxu0  ;;  %v2349_v50 = vsel %vm2273_vm3, %v2143_v17, %v9575_v23  ;;  %v6987_v17 = vld [vmem:[%s7334_s27 + $0x128] sm:$0xff]  }
 0x1e5   : > { %v1851_v10 = vpop.permute.xlu0 %1850 }
 0x1e6   : > { %v2254_v54 = vsel %vm2029_vm2, %v7980_v39, %v1851_v10  ;;  %v2016_v11 = vpop.permute.xlu1 %2015  ;;  %6305 = vmatmul.mubr.msk.bf16.gmra.mrb[144].mxu0 %vm2441_vm4, %v2347_v52 }
 0x1e7   : > { %v2423_v9 = vsel %vm2273_vm3, %v2254_v54, %v2016_v11  ;;  %6308 = vmatprep.mubr.msk.bf16.mxu0 %vm7039_vm1, %v9543_v36 }
 0x1e8   : > { %6457 = vmatmul.mubr.msk.bf16.gmra.mrb[40].mxu1 %vm2441_vm4, %v2423_v9 }
 0x1e9   : > { %v1829_v19 = vpop.permute.xlu0 %1828  ;;  %6460 = vmatprep.mubr.msk.bf16.mxu1 %vm7039_vm1, %v9543_v36  ;;  %v2722_v60 = vpop.f32.mrb[40].mxu0 }
 0x1ea   : > { %v2221_v39 = vsel %vm2029_vm2, %v7996_v12, %v1829_v19  ;;  %v1994_v0 = vpop.permute.xlu1 %1993  ;;  %v3295_v38 = vmax.f32 %v2714_v14, %v2722_v60  ;;  %v6202_v32 = vpop.f32.mrb[41].mxu0 }
 0x1eb   : > { %v8415_v49 = vsel %vm2273_vm3, %v2221_v39, %v1994_v0  ;;  %v2725_v51 = vpop.f32.mrb[42].mxu0 }
 0x1ec   : > { %v6828_v52 = vpop.eup %6827  ;;  %v3296_v4 = vmax.f32 %v2717_v33, %v2725_v51  ;;  %v6203_v10 = vpop.f32.mrb[43].mxu0  ;;  %v2146_v33 = vsel %vm2029_vm2, %v6987_v17, %v7956_v53 }
 0x1ed   : > { %v1853_v54 = vpop.permute.xlu0 %1852  ;;  %v5849_v11 = vadd.f32 -1.0, %v6828_v52  ;;  %v2351_v53 = vsel %vm2273_vm3, %v2146_v33, %v7958_v21  ;;  %v6988_v21 = vld [vmem:[%s7334_s27 + $0x130] sm:$0xff]  }
 0x1ee   : > { %v2257_v9 = vsel %vm2029_vm2, %v8010_v40, %v1853_v54  ;;  %v2018_v12 = vpop.permute.xlu1 %2017  ;;  %v6830_v6 = vpop.eup %6829  ;;  %6309 = vmatmul.mubr.msk.bf16.gmra.mrb[148].mxu0 %vm2441_vm4, %v2349_v50 }
 0x1ef   : > { %v2425_v14 = vsel %vm2273_vm3, %v2257_v9, %v2018_v12  ;;  %v5850_v5 = vadd.f32 -1.0, %v6830_v6  ;;  %6312 = vmatprep.mubr.msk.bf16.mxu0 %vm7039_vm1, %v9543_v36  ;;  %v3731_v19 = vsel %vm3461_vm10, %v8373_v24, %v5849_v11 }
 0x1f0   : > { %6461 = vmatmul.mubr.msk.bf16.gmra.mrb[44].mxu1 %vm2441_vm4, %v2425_v14 }
 0x1f1   : > { %v1855_v40 = vpop.permute.xlu0 %1854  ;;  %6464 = vmatprep.mubr.msk.bf16.mxu1 %vm7039_vm1, %v9543_v36  ;;  %v3732_v60 = vsel %vm3462_vm11, %v3408_v59, %v5850_v5  ;;  %v2730_v39 = vpop.f32.mrb[44].mxu0 }
 0x1f2   : > { %v2260_v0 = vsel %vm2029_vm2, %v8040_v41, %v1855_v40  ;;  %v2020_v32 = vpop.permute.xlu1 %2019  ;;  %v3349_v23 = vmax.f32 %v3295_v38, %v2730_v39  ;;  %v6206_v50 = vpop.f32.mrb[45].mxu0  ;;  %v8435_v51 = vpack.c.bf16 %v3732_v60, %v3731_v19  ;;  %v9577_v19 = vld [vmem:[#allocation12_spill] sm:$0xff] }
 0x1f3   : > { %v2733_v52 = vpop.f32.mrb[46].mxu0  ;;  %v2427_v24 = vsel %vm2273_vm3, %v2260_v0, %v2020_v32 }
 0x1f4   : > { %v3409_v10 = vadd.f32 %v8212_v63, %v3349_v23  ;;  %v3350_v54 = vmax.f32 %v3296_v4, %v2733_v52  ;;  %3850 = vrot.lane.b32.xlu0 %v8435_v51, %s7043_s26  ;;  %3902 = vrot.lane.b32.xlu1 %v8435_v51, %s7045_s19  ;;  %v6207_v41 = vpop.f32.mrb[47].mxu0  ;;  %v9576_v4 = vld [vmem:[#allocation11_spill] sm:$0xff] }
 0x1f5   : > { %v2149_v11 = vsel %vm2029_vm2, %v6988_v21, %v9576_v4  ;;  %v1857_v6 = vpop.permute.xlu0 %1856 }
 0x1f6   : > { %v3517_v59 = vmin.f32 %v3409_v10, 0.0  ;;  %v3410_v38 = vadd.f32 %v8212_v63, %v3350_v54  ;;  %6313 = vmatmul.mubr.msk.bf16.gmra.mrb[152].mxu0 %vm2441_vm4, %v2351_v53  ;;  %v2263_v5 = vsel %vm2029_vm2, %v8067_v42, %v1857_v6  ;;  %v2022_v17 = vpop.permute.xlu1 %2021  ;;  %v2353_v60 = vsel %vm2273_vm3, %v2149_v11, %v9577_v19  ;;  %v6989_v42 = vld [vmem:[%s7334_s27 + $0x138] sm:$0xff]  }
 0x1f7   : > { %6316 = vmatprep.mubr.msk.bf16.mxu0 %vm7039_vm1, %v9543_v36  ;;  %v2429_v32 = vsel %vm2273_vm3, %v2263_v5, %v2022_v17  ;;  %v2152_v23 = vsel %vm2029_vm2, %v6989_v42, %v7985_v62  ;;  %vm3463_vm12 = vcmp.gt.f32.partialorder %v3409_v10, 0.0 }
 0x1f8   : > { %6465 = vmatmul.mubr.msk.bf16.gmra.mrb[48].mxu1 %vm2441_vm4, %v2427_v24  ;;  %v3577_v9 = vmul.f32 1.442695, %v3517_v59  ;;  %v3518_v12 = vmin.f32 %v3410_v38, 0.0  ;;  %v9578_v59 = vld [vmem:[#allocation13_spill] sm:$0xff]  ;;  %vm3464_vm13 = vcmp.gt.f32.partialorder %v3410_v38, 0.0 }
 0x1f9   : > { %6468 = vmatprep.mubr.msk.bf16.mxu1 %vm7039_vm1, %v9543_v36  ;;  %v2738_v14 = vpop.f32.mrb[48].mxu0  ;;  %v1859_v50 = vpop.permute.xlu0 %1858  ;;  %v2355_v21 = vsel %vm2273_vm3, %v2152_v23, %v9578_v59 }
 0x1fa   : > { %6831 = vpow2.f32 %v3577_v9  ;;  %v3579_v33 = vmul.f32 1.442695, %v3518_v12  ;;  %v6210_v40 = vpop.f32.mrb[49].mxu0  ;;  %v2266_v52 = vsel %vm2029_vm2, %v8083_v2, %v1859_v50  ;;  %v2024_v54 = vpop.permute.xlu1 %2023  ;;  %v6990_v2 = vld [vmem:[%s7334_s27 + $0x140] sm:$0xff]  }
 0x1fb   : > { %v2741_v39 = vpop.f32.mrb[50].mxu0  ;;  %v2431_v62 = vsel %vm2273_vm3, %v2266_v52, %v2024_v54 }
 0x1fc   : > { %6833 = vpow2.f32 %v3579_v33  ;;  %v6211_v0 = vpop.f32.mrb[51].mxu0 }
 0x1fd   : > { %v1861_v40 = vpop.permute.xlu0 %1860 }
 0x1fe   : > { %6317 = vmatmul.mubr.msk.bf16.gmra.mrb[156].mxu0 %vm2441_vm4, %v2353_v60  ;;  %v2269_v0 = vsel %vm2029_vm2, %v8104_v43, %v1861_v40 }
 0x1ff   : > { %6320 = vmatprep.mubr.msk.bf16.mxu0 %vm7039_vm1, %v9543_v36 }
 0x200   : > { %6469 = vmatmul.mubr.msk.bf16.gmra.mrb[52].mxu1 %vm2441_vm4, %v2429_v32  ;;  %v2026_v32 = vpop.permute.xlu1 %2025 }
 0x201   : > { %6472 = vmatprep.mubr.msk.bf16.mxu1 %vm7039_vm1, %v9543_v36  ;;  %v2746_v53 = vpop.f32.mrb[52].mxu0 }
 0x202   : > { %v3297_v41 = vmax.f32 %v2738_v14, %v2746_v53  ;;  %v6214_v24 = vpop.f32.mrb[53].mxu0  ;;  %v9579_v14 = vld [vmem:[#allocation14_spill] sm:$0xff]  ;;  %v9580_v53 = vld [vmem:[#allocation15_spill] sm:$0xff] }
 0x203   : > { %v2749_v4 = vpop.f32.mrb[54].mxu0  ;;  %v2155_v33 = vsel %vm2029_vm2, %v6990_v2, %v9579_v14 }
 0x204   : > { %v6832_v11 = vpop.eup %6831  ;;  %v3298_v9 = vmax.f32 %v2741_v39, %v2749_v4  ;;  %v6215_v12 = vpop.f32.mrb[55].mxu0  ;;  %v2357_v52 = vsel %vm2273_vm3, %v2155_v33, %v9580_v53 }
 0x205   : > { %v5851_v6 = vadd.f32 -1.0, %v6832_v11  ;;  %v1863_v12 = vpop.permute.xlu0 %1862 }
 0x206   : > { %v6834_v5 = vpop.eup %6833  ;;  %6321 = vmatmul.mubr.msk.bf16.gmra.mrb[160].mxu0 %vm2441_vm4, %v2355_v21  ;;  %v6991_v21 = vld [vmem:[%s7334_s27 + $0x148] sm:$0xff]  }
 0x207   : > { %v5852_v17 = vadd.f32 -1.0, %v6834_v5  ;;  %6324 = vmatprep.mubr.msk.bf16.mxu0 %vm7039_vm1, %v9543_v36  ;;  %v3733_v19 = vsel %vm3463_vm12, %v3409_v10, %v5851_v6  ;;  %v2433_v10 = vsel %vm2273_vm3, %v2269_v0, %v2026_v32  ;;  %v2158_v4 = vsel %vm2029_vm2, %v6991_v21, %v8015_v25  ;;  %v2028_v5 = vpop.permute.xlu1 %2027  ;;  %v9582_v32 = vld [vmem:[#allocation17_spill] sm:$0xff] }
 0x208   : > { %6473 = vmatmul.mubr.msk.bf16.gmra.mrb[56].mxu1 %vm2441_vm4, %v2431_v62  ;;  %v2272_v6 = vsel %vm2029_vm2, %v8117_v44, %v1863_v12  ;;  %v2359_v14 = vsel %vm2273_vm3, %v2158_v4, %v8017_v61  ;;  %v6992_v44 = vld [vmem:[%s7334_s27 + $0x150] sm:$0xff]  }
 0x209   : > { %6476 = vmatprep.mubr.msk.bf16.mxu1 %vm7039_vm1, %v9543_v36  ;;  %v3734_v60 = vsel %vm3464_vm13, %v3410_v38, %v5852_v17  ;;  %v2754_v39 = vpop.f32.mrb[56].mxu0  ;;  %v2435_v40 = vsel %vm2273_vm3, %v2272_v6, %v2028_v5 }
 0x20a   : > { %v3351_v42 = vmax.f32 %v3297_v41, %v2754_v39  ;;  %v6218_v23 = vpop.f32.mrb[57].mxu0  ;;  %v8485_v50 = vpack.c.bf16 %v3734_v60, %v3733_v19  ;;  %v9581_v19 = vld [vmem:[#allocation16_spill] sm:$0xff] }
 0x20b   : > { %v2757_v54 = vpop.f32.mrb[58].mxu0  ;;  %v2161_v60 = vsel %vm2029_vm2, %v6992_v44, %v9581_v19 }
 0x20c   : > { %v3411_v24 = vadd.f32 %v8212_v63, %v3351_v42  ;;  %v3352_v59 = vmax.f32 %v3298_v9, %v2757_v54  ;;  %3852 = vrot.lane.b32.xlu0 %v8485_v50, %s7043_s26  ;;  %3904 = vrot.lane.b32.xlu1 %v8485_v50, %s7045_s19  ;;  %v6219_v43 = vpop.f32.mrb[59].mxu0  ;;  %v2361_v42 = vsel %vm2273_vm3, %v2161_v60, %v9582_v32 }
 0x20e   : > { %v3519_v38 = vmin.f32 %v3411_v24, 0.0  ;;  %v3412_v41 = vadd.f32 %v8212_v63, %v3352_v59  ;;  %6325 = vmatmul.mubr.msk.bf16.gmra.mrb[164].mxu0 %vm2441_vm4, %v2357_v52  ;;  %vm3465_vm14 = vcmp.gt.f32.partialorder %v3411_v24, 0.0 }
 0x20f   : > { %6328 = vmatprep.mubr.msk.bf16.mxu0 %vm7039_vm1, %v9543_v36 }
 0x210   : > { %6477 = vmatmul.mubr.msk.bf16.gmra.mrb[60].mxu1 %vm2441_vm4, %v2433_v10  ;;  %v3581_v11 = vmul.f32 1.442695, %v3519_v38  ;;  %v3520_v9 = vmin.f32 %v3412_v41, 0.0  ;;  %v6993_v38 = vld [vmem:[%s7334_s27 + $0x158] sm:$0xff]   ;;  %vm3466_vm15 = vcmp.gt.f32.partialorder %v3412_v41, 0.0 }
 0x211   : > { %6480 = vmatprep.mubr.msk.bf16.mxu1 %vm7039_vm1, %v9543_v36  ;;  %v2762_v62 = vpop.f32.mrb[60].mxu0  ;;  %v2164_v21 = vsel %vm2029_vm2, %v6993_v38, %v8045_v26 }
 0x212   : > { %6835 = vpow2.f32 %v3581_v11  ;;  %v3583_v17 = vmul.f32 1.442695, %v3520_v9  ;;  %v6222_v2 = vpop.f32.mrb[61].mxu0  ;;  %v2363_v5 = vsel %vm2273_vm3, %v2164_v21, %v8047_v56  ;;  %v6994_v56 = vld [vmem:[%s7334_s27 + $0x160] sm:$0xff]  }
 0x213   : > { %v2765_v33 = vpop.f32.mrb[62].mxu0 }
 0x214   : > { %6837 = vpow2.f32 %v3583_v17  ;;  %v6223_v25 = vpop.f32.mrb[63].mxu0 }
 0x216   : > { %6329 = vmatmul.mubr.msk.bf16.gmra.mrb[168].mxu0 %vm2441_vm4, %v2359_v14 }
 0x217   : > { %6332 = vmatprep.mubr.msk.bf16.mxu0 %vm7039_vm1, %v9543_v36 }
 0x218   : > { %6481 = vmatmul.mubr.msk.bf16.gmra.mrb[64].mxu1 %vm2441_vm4, %v2435_v40 }
 0x219   : > { %6494 = vmatprep.mubr.msk.bf16.mxu1 %vm7039_vm1, %v9543_v36  ;;  %v2770_v61 = vpop.f32.mrb[64].mxu0 }
 0x21a   : > { %v3299_v39 = vmax.f32 %v2762_v62, %v2770_v61  ;;  %v6226_v0 = vpop.f32.mrb[65].mxu0 }
 0x21b   : > { %v2773_v23 = vpop.f32.mrb[66].mxu0 }
 0x21c   : > { %v6836_v53 = vpop.eup %6835  ;;  %v3300_v52 = vmax.f32 %v2765_v33, %v2773_v23  ;;  %v6227_v54 = vpop.f32.mrb[67].mxu0  ;;  %v9583_v33 = vld [vmem:[#allocation18_spill] sm:$0xff]  ;;  %v6995_v23 = vld [vmem:[%s7334_s27 + $0x168] sm:$0xff]  }
 0x21d   : > { %v5853_v59 = vadd.f32 -1.0, %v6836_v53  ;;  %v2167_v25 = vsel %vm2029_vm2, %v6994_v56, %v9583_v33  ;;  %v2170_v53 = vsel %vm2029_vm2, %v6995_v23, %v8072_v8  ;;  %v9586_v8 = vld [vmem:[#allocation21_spill] sm:$0xff] }
 0x21e   : > { %v6838_v43 = vpop.eup %6837  ;;  %6333 = vmatmul.mubr.msk.bf16.gmra.mrb[172].mxu0 %vm2441_vm4, %v2361_v42 }
 0x21f   : > { %v5854_v10 = vadd.f32 -1.0, %v6838_v43  ;;  %6336 = vmatprep.mubr.msk.bf16.mxu0 %vm7039_vm1, %v9543_v36  ;;  %v3735_v4 = vsel %vm3465_vm14, %v3411_v24, %v5853_v59  ;;  %v9585_v43 = vld [vmem:[#allocation20_spill] sm:$0xff] }
 0x221   : > { %v3736_v11 = vsel %vm3466_vm15, %v3412_v41, %v5854_v10  ;;  %v2778_v9 = vpop.f32.mrb[68].mxu0  ;;  %v2367_v10 = vsel %vm2273_vm3, %v2170_v53, %v9585_v43  ;;  %v9589_v43 = vld [vmem:[#allocation24_spill] sm:$0xff] }
 0x222   : > { %v3353_v12 = vmax.f32 %v3299_v39, %v2778_v9  ;;  %v6230_v62 = vpop.f32.mrb[69].mxu0  ;;  %v8527_v6 = vpack.c.bf16 %v3736_v11, %v3735_v4  ;;  %v9584_v39 = vld [vmem:[#allocation19_spill] sm:$0xff] }
 0x223   : > { %v2781_v17 = vpop.f32.mrb[70].mxu0  ;;  %v2365_v0 = vsel %vm2273_vm3, %v2167_v25, %v9584_v39 }
 0x224   : > { %v3413_v2 = vadd.f32 %v8212_v63, %v3353_v12  ;;  %v3354_v14 = vmax.f32 %v3300_v52, %v2781_v17  ;;  %3854 = vrot.lane.b32.xlu0 %v8527_v6, %s7043_s26  ;;  %3906 = vrot.lane.b32.xlu1 %v8527_v6, %s7045_s19  ;;  %v6231_v26 = vpop.f32.mrb[71].mxu0 }
 0x226   : > { %v3521_v24 = vmin.f32 %v3413_v2, 0.0  ;;  %v3414_v41 = vadd.f32 %v8212_v63, %v3354_v14  ;;  %6337 = vmatmul.mubr.msk.bf16.gmra.mrb[176].mxu0 %vm2441_vm4, %v2363_v5  ;;  %v6996_v5 = vld [vmem:[%s7334_s27 + $0x170] sm:$0xff]   ;;  %vm3467_vm5 = vcmp.gt.f32.partialorder %v3413_v2, 0.0 }
 0x227   : > { %6340 = vmatprep.mubr.msk.bf16.mxu0 %vm7039_vm1, %v9543_v36  ;;  %v2173_v17 = vsel %vm2029_vm2, %v6996_v5, %v9586_v8  ;;  %v9591_v8 = vld [vmem:[#allocation26_spill] sm:$0xff] }
 0x228   : > { %v3585_v40 = vmul.f32 1.442695, %v3521_v24  ;;  %v3522_v44 = vmin.f32 %v3414_v41, 0.0  ;;  %vm3468_vm6 = vcmp.gt.f32.partialorder %v3414_v41, 0.0 }
 0x229   : > { %v2786_v19 = vpop.f32.mrb[72].mxu0 }
 0x22a   : > { %6839 = vpow2.f32 %v3585_v40  ;;  %v3587_v60 = vmul.f32 1.442695, %v3522_v44  ;;  %v6234_v61 = vpop.f32.mrb[73].mxu0  ;;  %v9587_v40 = vld [vmem:[#allocation22_spill] sm:$0xff] }
 0x22b   : > { %v2789_v32 = vpop.f32.mrb[74].mxu0  ;;  %v2369_v44 = vsel %vm2273_vm3, %v2173_v17, %v9587_v40 }
 0x22c   : > { %6841 = vpow2.f32 %v3587_v60  ;;  %v6235_v42 = vpop.f32.mrb[75].mxu0 }
 0x22e   : > { %6341 = vmatmul.mubr.msk.bf16.gmra.mrb[180].mxu0 %vm2441_vm4, %v2365_v0  ;;  %v6997_v0 = vld [vmem:[%s7334_s27 + $0x178] sm:$0xff]  }
 0x22f   : > { %6344 = vmatprep.mubr.msk.bf16.mxu0 %vm7039_vm1, %v9543_v36 }
 0x231   : > { %v2794_v52 = vpop.f32.mrb[76].mxu0 }
 0x232   : > { %v3301_v54 = vmax.f32 %v2786_v19, %v2794_v52  ;;  %v6238_v59 = vpop.f32.mrb[77].mxu0 }
 0x233   : > { %v2797_v38 = vpop.f32.mrb[78].mxu0 }
 0x234   : > { %v6840_v21 = vpop.eup %6839  ;;  %v3302_v4 = vmax.f32 %v2789_v32, %v2797_v38  ;;  %v6239_v11 = vpop.f32.mrb[79].mxu0  ;;  %v9588_v32 = vld [vmem:[#allocation23_spill] sm:$0xff] }
 0x235   : > { %v5855_v9 = vadd.f32 -1.0, %v6840_v21  ;;  %v2176_v42 = vsel %vm2029_vm2, %v6997_v0, %v9588_v32  ;;  %v9590_v11 = vld [vmem:[#allocation25_spill] sm:$0xff]  ;;  %v6999_v0 = vld [vmem:[%s7334_s27 + $0x188] sm:$0xff]  }
 0x236   : > { %v6842_v12 = vpop.eup %6841  ;;  %6345 = vmatmul.mubr.msk.bf16.gmra.mrb[184].mxu0 %vm2441_vm4, %v2367_v10  ;;  %v2371_v10 = vsel %vm2273_vm3, %v2176_v42, %v9589_v43  ;;  %v2182_v32 = vsel %vm2029_vm2, %v6999_v0, %v8129_v20 }
 0x237   : > { %v5856_v62 = vadd.f32 -1.0, %v6842_v12  ;;  %6348 = vmatprep.mubr.msk.bf16.mxu0 %vm7039_vm1, %v9543_v36  ;;  %v3737_v14 = vsel %vm3467_vm5, %v3413_v2, %v5855_v9  ;;  %v2375_v43 = vsel %vm2273_vm3, %v2182_v32, %v8131_v27  ;;  %v7000_v27 = vld [vmem:[%s7334_s27 + $0x190] sm:$0xff]  }
 0x239   : > { %v3738_v26 = vsel %vm3468_vm6, %v3414_v41, %v5856_v62  ;;  %v2802_v24 = vpop.f32.mrb[80].mxu0 }
 0x23a   : > { %v3355_v56 = vmax.f32 %v3301_v54, %v2802_v24  ;;  %v6242_v33 = vpop.f32.mrb[81].mxu0  ;;  %v8559_v25 = vpack.c.bf16 %v3738_v26, %v3737_v14  ;;  %v3847_v14 = vpop.permute.xlu0 %3846 }
 0x23b   : > { %v2805_v19 = vpop.f32.mrb[82].mxu0 }
 0x23c   : > { %v3415_v60 = vadd.f32 %v8212_v63, %v3355_v56  ;;  %v3356_v61 = vmax.f32 %v3302_v4, %v2805_v19  ;;  %3856 = vrot.lane.b32.xlu0 %v8559_v25, %s7043_s26  ;;  %3908 = vrot.lane.b32.xlu1 %v8559_v25, %s7045_s19  ;;  %v6243_v2 = vpop.f32.mrb[83].mxu0  ;;  %v6998_v4 = vld [vmem:[%s7334_s27 + $0x180] sm:$0xff]   ;;  %v3956_v19 = vsel %vm3954_vm7, 0, %v3847_v14 }
 0x23d   : > { %v2179_v9 = vsel %vm2029_vm2, %v6998_v4, %v9590_v11  ;;  %v2185_v4 = vsel %vm2029_vm2, %v7000_v27, %v8141_v15 }
 0x23e   : > { %v3523_v41 = vmin.f32 %v3415_v60, 0.0  ;;  %v3416_v39 = vadd.f32 %v8212_v63, %v3356_v61  ;;  %6349 = vmatmul.mubr.msk.bf16.gmra.mrb[188].mxu0 %vm2441_vm4, %v2369_v44  ;;  %v2373_v17 = vsel %vm2273_vm3, %v2179_v9, %v9591_v8  ;;  %vm3469_vm10 = vcmp.gt.f32.partialorder %v3415_v60, 0.0  ;;  %v9592_v8 = vld [vmem:[#allocation27_spill] sm:$0xff] }
 0x23f   : > { %6352 = vmatprep.mubr.msk.bf16.mxu0 %vm7039_vm1, %v9543_v36 }
 0x240   : > { %v3589_v23 = vmul.f32 1.442695, %v3523_v41  ;;  %v3524_v53 = vmin.f32 %v3416_v39, 0.0  ;;  %vm3470_vm11 = vcmp.gt.f32.partialorder %v3416_v39, 0.0 }
 0x241   : > { %v2810_v52 = vpop.f32.mrb[84].mxu0 }
 0x242   : > { %6843 = vpow2.f32 %v3589_v23  ;;  %v3591_v54 = vmul.f32 1.442695, %v3524_v53  ;;  %v6246_v59 = vpop.f32.mrb[85].mxu0 }
 0x243   : > { %v2813_v38 = vpop.f32.mrb[86].mxu0 }
 0x244   : > { %6845 = vpow2.f32 %v3591_v54  ;;  %v6247_v21 = vpop.f32.mrb[87].mxu0 }
 0x246   : > { %6353 = vmatmul.mubr.msk.bf16.gmra.mrb[192].mxu0 %vm2441_vm4, %v2371_v10 }
 0x247   : > { %6356 = vmatprep.mubr.msk.bf16.mxu0 %vm7039_vm1, %v9543_v36 }
 0x249   : > { %v2818_v12 = vpop.f32.mrb[88].mxu0 }
 0x24a   : > { %v3303_v62 = vmax.f32 %v2810_v52, %v2818_v12  ;;  %v6250_v5 = vpop.f32.mrb[89].mxu0 }
 0x24b   : > { %v2821_v26 = vpop.f32.mrb[90].mxu0 }
 0x24c   : > { %v6844_v24 = vpop.eup %6843  ;;  %v3304_v56 = vmax.f32 %v2813_v38, %v2821_v26  ;;  %v6251_v33 = vpop.f32.mrb[91].mxu0 }
 0x24d   : > { %v5857_v40 = vadd.f32 -1.0, %v6844_v24  ;;  %v7001_v24 = vld [vmem:[%s7334_s27 + $0x198] sm:$0xff]  }
 0x24e   : > { %v6846_v44 = vpop.eup %6845  ;;  %6357 = vmatmul.mubr.msk.bf16.gmra.mrb[196].mxu0 %vm2441_vm4, %v2373_v17  ;;  %v3901_v61 = vpop.permute.xlu1 %3900  ;;  %v2377_v17 = vsel %vm2273_vm3, %v2185_v4, %v9592_v8  ;;  %v2188_v15 = vsel %vm2029_vm2, %v7001_v24, %v8153_v57 }
 0x24f   : > { %v5858_v2 = vadd.f32 -1.0, %v6846_v44  ;;  %v4037_v41 = vsel %vm4035_vm8, %v3956_v19, %v3901_v61  ;;  %6360 = vmatprep.mubr.msk.bf16.mxu0 %vm7039_vm1, %v9543_v36  ;;  %v3739_v42 = vsel %vm3469_vm10, %v3415_v60, %v5857_v40  ;;  %v3849_v40 = vpop.permute.xlu0 %3848 }
 0x250   : > { %6495 = vmatmul.mubr.msk.bf16.vlgmr.msra.gmra.mrb[68].mxu1 %vm4119_vm9, %v4037_v41  ;;  %v9593_v41 = vld [vmem:[#allocation28_spill] sm:$0xff] }
 0x251   : > { %v3740_v23 = vsel %vm3470_vm11, %v3416_v39, %v5858_v2  ;;  %v2826_v53 = vpop.f32.mrb[92].mxu0  ;;  %6498 = vmatprep.mubr.msk.bf16.mxu1 %vm7039_vm1, %v9543_v36  ;;  %v2379_v0 = vsel %vm2273_vm3, %v2188_v15, %v9593_v41  ;;  %v7004_v15 = vld [vmem:[%s7334_s27 + $0x1a8] sm:$0xff]  }
 0x252   : > { %v3357_v52 = vmax.f32 %v3303_v62, %v2826_v53  ;;  %v6254_v54 = vpop.f32.mrb[93].mxu0  ;;  %v8596_v59 = vpack.c.bf16 %v3740_v23, %v3739_v42  ;;  %v3959_v23 = vsel %vm3954_vm7, %v8284_v30, %v3849_v40  ;;  %v7002_v30 = vld [vmem:[%s7334_s27 + $0x1a0] sm:$0xff]  }
 0x253   : > { %v2829_v10 = vpop.f32.mrb[94].mxu0 }
 0x254   : > { %v3417_v20 = vadd.f32 %v8212_v63, %v3357_v52  ;;  %v3358_v38 = vmax.f32 %v3304_v56, %v2829_v10  ;;  %3858 = vrot.lane.b32.xlu0 %v8596_v59, %s7043_s26  ;;  %3910 = vrot.lane.b32.xlu1 %v8596_v59, %s7045_s19  ;;  %v6255_v60 = vpop.f32.mrb[95].mxu0 }
 0x256   : > { %v3525_v39 = vmin.f32 %v3417_v20, 0.0  ;;  %v3418_v21 = vadd.f32 %v8212_v63, %v3358_v38  ;;  %6361 = vmatmul.mubr.msk.bf16.gmra.mrb[200].mxu0 %vm2441_vm4, %v2375_v43  ;;  %vm3471_vm12 = vcmp.gt.f32.partialorder %v3417_v20, 0.0  ;;  %v2191_v38 = vsel %vm2029_vm2, %v7002_v30, %v8169_v3 }
 0x257   : > { %6364 = vmatprep.mubr.msk.bf16.mxu0 %vm7039_vm1, %v9543_v36 }
 0x258   : > { %v3593_v11 = vmul.f32 1.442695, %v3525_v39  ;;  %v3526_v9 = vmin.f32 %v3418_v21, 0.0  ;;  %vm3472_vm13 = vcmp.gt.f32.partialorder %v3418_v21, 0.0 }
 0x259   : > { %v2834_v12 = vpop.f32.mrb[96].mxu0 }
 0x25a   : > { %6847 = vpow2.f32 %v3593_v11  ;;  %v3595_v62 = vmul.f32 1.442695, %v3526_v9  ;;  %v6258_v5 = vpop.f32.mrb[97].mxu0 }
 0x25b   : > { %v2837_v63 = vpop.f32.mrb[98].mxu0  ;;  %v2381_v5 = vsel %vm2273_vm3, %v2191_v38, %v8173_v29 }
 0x25c   : > { %6849 = vpow2.f32 %v3595_v62  ;;  %v6259_v14 = vpop.f32.mrb[99].mxu0 }
 0x25e   : > { %6365 = vmatmul.mubr.msk.bf16.gmra.mrb[204].mxu0 %vm2441_vm4, %v2377_v17 }
 0x25f   : > { %6368 = vmatprep.mubr.msk.bf16.mxu0 %vm7039_vm1, %v9543_v36 }
 0x261   : > { %v2842_v26 = vpop.f32.mrb[100].mxu0 }
 0x262   : > { %v3305_v56 = vmax.f32 %v2834_v12, %v2842_v26  ;;  %v6262_v33 = vpop.f32.mrb[101].mxu0 }
 0x263   : > { %v2845_v44 = vpop.f32.mrb[102].mxu0 }
 0x264   : > { %v6848_v19 = vpop.eup %6847  ;;  %v3306_v61 = vmax.f32 %v2837_v63, %v2845_v44  ;;  %v6263_v2 = vpop.f32.mrb[103].mxu0 }
 0x265   : > { %v5859_v32 = vadd.f32 -1.0, %v6848_v19 }
 0x266   : > { %v6850_v42 = vpop.eup %6849  ;;  %6369 = vmatmul.mubr.msk.bf16.gmra.mrb[208].mxu0 %vm2441_vm4, %v2379_v0  ;;  %v3903_v53 = vpop.permute.xlu1 %3902 }
 0x267   : > { %v5860_v57 = vadd.f32 -1.0, %v6850_v42  ;;  %v4039_v52 = vsel %vm4035_vm8, %v3959_v23, %v3903_v53  ;;  %6372 = vmatprep.mubr.msk.bf16.mxu0 %vm7039_vm1, %v9543_v36  ;;  %v3741_v54 = vsel %vm3471_vm12, %v3417_v20, %v5859_v32  ;;  %v8641_v20 = vld [vmem:[%s9523_s2] ss:$0 sm:$0xff]  ;;  %v3851_v42 = vpop.permute.xlu0 %3850 }
 0x268   : > { %6499 = vmatmul.mubr.msk.bf16.gmra.mrb[72].mxu1 %vm4119_vm9, %v4039_v52  ;;  %v7005_v53 = vld [vmem:[%s7334_s27 + $0x1b0] sm:$0xff]  }
 0x269   : > { %v3742_v43 = vsel %vm3472_vm13, %v3418_v21, %v5860_v57  ;;  %v2850_v10 = vpop.f32.mrb[104].mxu0  ;;  %6502 = vmatprep.mubr.msk.bf16.mxu1 %vm7039_vm1, %v9543_v36  ;;  %v2197_v57 = vsel %vm2029_vm2, %v7005_v53, %v8205_v18 }
 0x26a   : > { %v3359_v60 = vmax.f32 %v3305_v56, %v2850_v10  ;;  %v6266_v39 = vpop.f32.mrb[105].mxu0  ;;  %v8634_v27 = vpack.c.bf16 %v3742_v43, %v3741_v54  ;;  %v8636_v4 = vpop.f32.mrb[0].mxu1  ;;  %v9594_v56 = vld [vmem:[#allocation29_spill] sm:$0xff] }
 0x26b   : > { %v2853_v11 = vpop.f32.mrb[106].mxu0  ;;  %v6418_v9 = vpop.f32.mrb[1].mxu1  ;;  %v2194_v33 = vsel %vm2029_vm2, %v7004_v15, %v9594_v56 }
 0x26c   : > { %v3419_v21 = vadd.f32 %v8641_v20, %v3359_v60  ;;  %v3360_v12 = vmax.f32 %v3306_v61, %v2853_v11  ;;  %3860 = vrot.lane.b32.xlu0 %v8634_v27, %s7043_s26  ;;  %3912 = vrot.lane.b32.xlu1 %v8634_v27, %s7045_s19  ;;  %v6267_v3 = vpop.f32.mrb[107].mxu0  ;;  %v8648_v62 = vpop.f32.mrb[2].mxu1  ;;  %v2383_v0 = vsel %vm2273_vm3, %v2194_v33, %v8191_v46  ;;  %v9595_v11 = vld [vmem:[#allocation30_spill] sm:$0xff] }
 0x26d   : > { %v6419_v8 = vpop.f32.mrb[3].mxu1  ;;  %v2385_v9 = vsel %vm2273_vm3, %v2197_v57, %v9595_v11 }
 0x26e   : > { %v3527_v17 = vmin.f32 %v3419_v21, 0.0  ;;  %v3420_v63 = vadd.f32 %v8641_v20, %v3360_v12  ;;  %6373 = vmatmul.mubr.msk.bf16.gmra.mrb[212].mxu0 %vm2441_vm4, %v2381_v5  ;;  %v3962_v8 = vsel %vm3954_vm7, %v8368_v13, %v3851_v42  ;;  %vm3473_vm14 = vcmp.gt.f32.partialorder %v3419_v21, 0.0  ;;  %v7006_v13 = vld [vmem:[%s7334_s27 + $0x1b8] sm:$0xff]  }
 0x26f   : > { %6376 = vmatprep.mubr.msk.bf16.mxu0 %vm7039_vm1, %v9543_v36  ;;  %v2200_v56 = vsel %vm2029_vm2, %v7006_v13, %v8233_v58 }
 0x270   : > { %v3597_v14 = vmul.f32 1.442695, %v3527_v17  ;;  %v3528_v26 = vmin.f32 %v3420_v63, 0.0  ;;  %vm3474_vm15 = vcmp.gt.f32.partialorder %v3420_v63, 0.0  ;;  %v2387_v42 = vsel %vm2273_vm3, %v2200_v56, %v8237_v31 }
 0x271   : > { %v2858_v24 = vpop.f32.mrb[108].mxu0 }
 0x272   : > { %6851 = vpow2.f32 %v3597_v14  ;;  %v3599_v40 = vmul.f32 1.442695, %v3528_v26  ;;  %v6270_v29 = vpop.f32.mrb[109].mxu0  ;;  %v8659_v44 = vpop.f32.mrb[4].mxu1 }
 0x273   : > { %v2861_v19 = vpop.f32.mrb[110].mxu0  ;;  %v6422_v61 = vpop.f32.mrb[5].mxu1 }
 0x274   : > { %6853 = vpow2.f32 %v3599_v40  ;;  %v6271_v2 = vpop.f32.mrb[111].mxu0  ;;  %v8661_v41 = vpop.f32.mrb[6].mxu1 }
 0x275   : > { %v6423_v32 = vpop.f32.mrb[7].mxu1 }
 0x276   : > { %6377 = vmatmul.mubr.msk.bf16.gmra.mrb[216].mxu0 %vm2441_vm4, %v2383_v0 }
 0x277   : > { %6380 = vmatprep.mubr.msk.bf16.mxu0 %vm7039_vm1, %v9543_v36 }
 0x279   : > { %v2866_v23 = vpop.f32.mrb[112].mxu0 }
 0x27a   : > { %v3307_v52 = vmax.f32 %v2858_v24, %v2866_v23  ;;  %v6274_v54 = vpop.f32.mrb[113].mxu0  ;;  %v3170_v43 = vpop.f32.mrb[8].mxu1 }
 0x27b   : > { %v2869_v10 = vpop.f32.mrb[114].mxu0  ;;  %v6426_v30 = vpop.f32.mrb[9].mxu1 }
 0x27c   : > { %v6852_v38 = vpop.eup %6851  ;;  %v3308_v60 = vmax.f32 %v2861_v19, %v2869_v10  ;;  %v6275_v46 = vpop.f32.mrb[115].mxu0  ;;  %v7007_v30 = vld [vmem:[%s7334_s27 + $0x1c0] sm:$0xff]  }
 0x27d   : > { %v3173_v39 = vpop.f32.mrb[10].mxu1  ;;  %v5861_v12 = vadd.f32 -1.0, %v6852_v38  ;;  %v2203_v38 = vsel %vm2029_vm2, %v7007_v30, %v8251_v48 }
 0x27e   : > { %v6427_v3 = vpop.f32.mrb[11].mxu1  ;;  %v6854_v5 = vpop.eup %6853  ;;  %6381 = vmatmul.mubr.msk.bf16.gmra.mrb[220].mxu0 %vm2441_vm4, %v2385_v9 }
 0x27f   : > { %v3905_v18 = vpop.permute.xlu1 %3904  ;;  %v5862_v17 = vadd.f32 -1.0, %v6854_v5  ;;  %6384 = vmatprep.mubr.msk.bf16.mxu0 %vm7039_vm1, %v9543_v36  ;;  %v3743_v26 = vsel %vm3473_vm14, %v3419_v21, %v5861_v12  ;;  %v2389_v5 = vsel %vm2273_vm3, %v2203_v38, %v8255_v7  ;;  %v3853_v48 = vpop.permute.xlu0 %3852 }
 0x280   : > { %v4041_v14 = vsel %vm4035_vm8, %v3962_v8, %v3905_v18 }
 0x281   : > { %6503 = vmatmul.mubr.msk.bf16.gmra.mrb[76].mxu1 %vm4119_vm9, %v4041_v14  ;;  %v3744_v24 = vsel %vm3474_vm15, %v3420_v63, %v5862_v17  ;;  %v2874_v15 = vpop.f32.mrb[116].mxu0  ;;  %v7008_v14 = vld [vmem:[%s7334_s27 + $0x1c8] sm:$0xff]  }
 0x282   : > { %6506 = vmatprep.mubr.msk.bf16.mxu1 %vm7039_vm1, %v9543_v36  ;;  %v3361_v33 = vmax.f32 %v3307_v52, %v2874_v15  ;;  %v6278_v40 = vpop.f32.mrb[117].mxu0  ;;  %v8685_v29 = vpack.c.bf16 %v3744_v24, %v3743_v26  ;;  %v3178_v19 = vpop.f32.mrb[12].mxu1  ;;  %v2206_v26 = vsel %vm2029_vm2, %v7008_v14, %v8277_v47 }
 0x283   : > { %v2877_v61 = vpop.f32.mrb[118].mxu0  ;;  %v3333_v2 = vmax.f32 %v3170_v43, %v3178_v19  ;;  %v6430_v0 = vpop.f32.mrb[13].mxu1 }
 0x284   : > { %v3421_v32 = vadd.f32 %v8641_v20, %v3361_v33  ;;  %v3362_v21 = vmax.f32 %v3308_v60, %v2877_v61  ;;  %3862 = vrot.lane.b32.xlu0 %v8685_v29, %s7043_s26  ;;  %3914 = vrot.lane.b32.xlu1 %v8685_v29, %s7045_s19  ;;  %v6279_v63 = vpop.f32.mrb[119].mxu0  ;;  %v3181_v58 = vpop.f32.mrb[14].mxu1 }
 0x285   : > { %v3334_v23 = vmax.f32 %v3173_v39, %v3181_v58  ;;  %v6431_v53 = vpop.f32.mrb[15].mxu1  ;;  %v3965_v58 = vsel %vm3954_vm7, %v8435_v51, %v3853_v48  ;;  %v7009_v51 = vld [vmem:[%s7334_s27 + $0x1d0] sm:$0xff]  }
 0x286   : > { %v3529_v57 = vmin.f32 %v3421_v32, 0.0  ;;  %v3422_v52 = vadd.f32 %v8641_v20, %v3362_v21  ;;  %6385 = vmatmul.mubr.msk.bf16.gmra.mrb[224].mxu0 %vm2441_vm4, %v2387_v42  ;;  %vm3475_vm5 = vcmp.gt.f32.partialorder %v3421_v32, 0.0 }
 0x287   : > { %6388 = vmatprep.mubr.msk.bf16.mxu0 %vm7039_vm1, %v9543_v36 }
 0x288   : > { %v3601_v54 = vmul.f32 1.442695, %v3529_v57  ;;  %v3530_v43 = vmin.f32 %v3422_v52, 0.0  ;;  %vm3476_vm6 = vcmp.gt.f32.partialorder %v3422_v52, 0.0 }
 0x289   : > { %v2882_v10 = vpop.f32.mrb[120].mxu0 }
 0x28a   : > { %6855 = vpow2.f32 %v3601_v54  ;;  %v3603_v60 = vmul.f32 1.442695, %v3530_v43  ;;  %v6282_v31 = vpop.f32.mrb[121].mxu0  ;;  %v3186_v46 = vpop.f32.mrb[16].mxu1  ;;  %v2209_v54 = vsel %vm2029_vm2, %v7009_v51, %v8316_v22 }
 0x28b   : > { %v2885_v39 = vpop.f32.mrb[122].mxu0  ;;  %v8701_v11 = vmax.f32 %v3333_v2, %v3186_v46  ;;  %v6434_v9 = vpop.f32.mrb[17].mxu1  ;;  %v2391_v2 = vsel %vm2273_vm3, %v2206_v26, %v8282_v55  ;;  %v7010_v26 = vld [vmem:[%s7334_s27 + $0x1d8] sm:$0xff]  }
 0x28c   : > { %6857 = vpow2.f32 %v3603_v60  ;;  %v6283_v12 = vpop.f32.mrb[123].mxu0  ;;  %v3189_v3 = vpop.f32.mrb[18].mxu1  ;;  %v2393_v9 = vsel %vm2273_vm3, %v2209_v54, %v8320_v28 }
 0x28d   : > { %v8705_v8 = vmax.f32 %v3334_v23, %v3189_v3  ;;  %v6435_v18 = vpop.f32.mrb[19].mxu1 }
 0x28e   : > { %6389 = vmatmul.mubr.msk.bf16.gmra.mrb[228].mxu0 %vm2441_vm4, %v2389_v5 }
 0x28f   : > { %6392 = vmatprep.mubr.msk.bf16.mxu0 %vm7039_vm1, %v9543_v36 }
 0x291   : > { %v2890_v17 = vpop.f32.mrb[124].mxu0 }
 0x292   : > { %v3309_v24 = vmax.f32 %v2882_v10, %v2890_v17  ;;  %v6286_v15 = vpop.f32.mrb[125].mxu0 }
 0x293   : > { %v3194_v13 = vpop.f32.mrb[20].mxu1  ;;  %v2893_v56 = vpop.f32.mrb[126].mxu0 }
 0x294   : > { %v6438_v33 = vpop.f32.mrb[21].mxu1  ;;  %v6856_v7 = vpop.eup %6855  ;;  %v3310_v40 = vmax.f32 %v2885_v39, %v2893_v56 }
 0x295   : > { %v6287_v19 = vpop.f32.mrb[127].mxu0  ;;  %v3197_v61 = vpop.f32.mrb[22].mxu1  ;;  %v5863_v0 = vadd.f32 -1.0, %v6856_v7 }
 0x296   : > { %v6439_v21 = vpop.f32.mrb[23].mxu1  ;;  %v6858_v63 = vpop.eup %6857  ;;  %6393 = vmatmul.mubr.msk.bf16.gmra.mrb[232].mxu0 %vm2441_vm4, %v2391_v2 }
 0x297   : > { %v3907_v47 = vpop.permute.xlu1 %3906  ;;  %v5864_v42 = vadd.f32 -1.0, %v6858_v63  ;;  %6396 = vmatprep.mubr.msk.bf16.mxu0 %vm7039_vm1, %v9543_v36  ;;  %v3745_v55 = vsel %vm3475_vm5, %v3421_v32, %v5863_v0  ;;  %v7011_v63 = vld [vmem:[%s7334_s27 + $0x1e0] sm:$0xff]   ;;  %s7047_s27 = smov 72  }
 0x298   : > { %v4043_v23 = vsel %vm4035_vm8, %v3965_v58, %v3907_v47  ;;  %v2215_v58 = vsel %vm2029_vm2, %v7011_v63, %v8360_v37 }
 0x299   : > { %6507 = vmatmul.mubr.msk.bf16.gmra.mrb[80].mxu1 %vm4119_vm9, %v4043_v23  ;;  %v3746_v53 = vsel %vm3476_vm6, %v3422_v52, %v5864_v42  ;;  %v2898_v57 = vpop.f32.mrb[128].mxu0 }
 0x29a   : > { %6510 = vmatprep.mubr.msk.bf16.mxu1 %vm7039_vm1, %v9543_v36  ;;  %v3363_v43 = vmax.f32 %v3309_v24, %v2898_v57  ;;  %v6290_v10 = vpop.f32.mrb[129].mxu0  ;;  %v8727_v30 = vpack.c.bf16 %v3746_v53, %v3745_v55  ;;  %v2212_v24 = vsel %vm2029_vm2, %v7010_v26, %v8339_v34  ;;  %v3855_v34 = vpop.permute.xlu0 %3854 }
 0x29b   : > { %v3202_v38 = vpop.f32.mrb[24].mxu1  ;;  %v2901_v60 = vpop.f32.mrb[130].mxu0 }
 0x29c   : > { %v3335_v31 = vmax.f32 %v3194_v13, %v3202_v38  ;;  %v6442_v46 = vpop.f32.mrb[25].mxu1  ;;  %v3423_v39 = vadd.f32 %v8641_v20, %v3363_v43  ;;  %v3364_v32 = vmax.f32 %v3310_v40, %v2901_v60  ;;  %3864 = vrot.lane.b32.xlu0 %v8727_v30, %s7043_s26  ;;  %3916 = vrot.lane.b32.xlu1 %v8727_v30, %s7045_s19  ;;  %v6291_v52 = vpop.f32.mrb[131].mxu0 }
 0x29d   : > { %v3205_v22 = vpop.f32.mrb[26].mxu1  ;;  %v2397_v43 = vsel %vm2273_vm3, %v2215_v58, %v8366_v1 }
 0x29e   : > { %v3336_v12 = vmax.f32 %v3197_v61, %v3205_v22  ;;  %v6443_v3 = vpop.f32.mrb[27].mxu1  ;;  %v3531_v5 = vmin.f32 %v3423_v39, 0.0  ;;  %v3424_v18 = vadd.f32 %v8641_v20, %v3364_v32  ;;  %6397 = vmatmul.mubr.msk.bf16.gmra.mrb[236].mxu0 %vm2441_vm4, %v2393_v9  ;;  %v2395_v61 = vsel %vm2273_vm3, %v2212_v24, %v8344_v45 }
 0x29f   : > { %6400 = vmatprep.mubr.msk.bf16.mxu0 %vm7039_vm1, %v9543_v36  ;;  %vm3477_vm2 = vcmp.gt.f32.partialorder %v3423_v39, 0.0  ;;  %v8779_v24 = vadd.f32 %v8641_v20, %v8705_v8 }
 0x2a0   : > { %v3605_v48 = vmul.f32 1.442695, %v3531_v5  ;;  %v3532_v17 = vmin.f32 %v3424_v18, 0.0  ;;  %vm3478_vm10 = vcmp.gt.f32.partialorder %v3424_v18, 0.0 }
 0x2a1   : > { %v2906_v14 = vpop.f32.mrb[132].mxu0  ;;  %vm3502_vm12 = vcmp.gt.f32.partialorder %v8779_v24, 0.0 }
 0x2a2   : > { %6859 = vpow2.f32 %v3605_v48  ;;  %v3607_v15 = vmul.f32 1.442695, %v3532_v17  ;;  %v6294_v28 = vpop.f32.mrb[133].mxu0  ;;  %v8770_v48 = vadd.f32 %v8641_v20, %v8701_v11 }
 0x2a3   : > { %v3210_v13 = vpop.f32.mrb[28].mxu1  ;;  %v2909_v56 = vpop.f32.mrb[134].mxu0 }
 0x2a4   : > { %v8743_v33 = vmax.f32 %v3335_v31, %v3210_v13  ;;  %v6446_v7 = vpop.f32.mrb[29].mxu1  ;;  %6861 = vpow2.f32 %v3607_v15  ;;  %v6295_v40 = vpop.f32.mrb[135].mxu0  ;;  %v3968_v31 = vsel %vm3954_vm7, %v8485_v50, %v3855_v34  ;;  %vm3501_vm11 = vcmp.gt.f32.partialorder %v8770_v48, 0.0 }
 0x2a5   : > { %v3213_v19 = vpop.f32.mrb[30].mxu1  ;;  %v3555_v7 = vmin.f32 %v8770_v48, 0.0 }
 0x2a6   : > { %v8747_v2 = vmax.f32 %v3336_v12, %v3213_v19  ;;  %v6447_v0 = vpop.f32.mrb[31].mxu1  ;;  %6401 = vmatmul.mubr.msk.bf16.gmra.mrb[240].mxu0 %vm2441_vm4, %v2395_v61  ;;  %v3556_v61 = vmin.f32 %v8779_v24, 0.0 }
 0x2a7   : > { %6404 = vmatprep.mubr.msk.bf16.mxu0 %vm7039_vm1, %v9543_v36  ;;  %v3653_v58 = vmul.f32 1.442695, %v3555_v7  ;;  %v8804_v7 = vadd.f32 %v8641_v20, %v8743_v33 }
 0x2a9   : > { %v2914_v21 = vpop.f32.mrb[136].mxu0  ;;  %vm3503_vm15 = vcmp.gt.f32.partialorder %v8804_v7, 0.0 }
 0x2aa   : > { %v3311_v47 = vmax.f32 %v2906_v14, %v2914_v21  ;;  %v6298_v42 = vpop.f32.mrb[137].mxu0 }
 0x2ab   : > { %v3218_v23 = vpop.f32.mrb[32].mxu1  ;;  %v2917_v55 = vpop.f32.mrb[138].mxu0 }
 0x2ac   : > { %v6450_v53 = vpop.f32.mrb[33].mxu1  ;;  %v6860_v45 = vpop.eup %6859  ;;  %v3312_v57 = vmax.f32 %v2909_v56, %v2917_v55 }
 0x2ad   : > { %v6299_v51 = vpop.f32.mrb[139].mxu0  ;;  %v3221_v54 = vpop.f32.mrb[34].mxu1  ;;  %v5865_v10 = vadd.f32 -1.0, %v6860_v45 }
 0x2ae   : > { %v6451_v38 = vpop.f32.mrb[35].mxu1  ;;  %v6862_v60 = vpop.eup %6861  ;;  %6405 = vmatmul.mubr.msk.bf16.gmra.mrb[244].mxu0 %vm2441_vm4, %v2397_v43 }
 0x2af   : > { %v3909_v37 = vpop.permute.xlu1 %3908  ;;  %v5866_v46 = vadd.f32 -1.0, %v6862_v60  ;;  %6408 = vmatprep.mubr.msk.bf16.mxu0 %vm7039_vm1, %v9543_v36  ;;  %v3747_v1 = vsel %vm3477_vm2, %v3423_v39, %v5865_v10 }
 0x2b0   : > { %v4045_v32 = vsel %vm4035_vm8, %v3968_v31, %v3909_v37 }
 0x2b1   : > { %6511 = vmatmul.mubr.msk.bf16.gmra.mrb[84].mxu1 %vm4119_vm9, %v4045_v32  ;;  %v3748_v52 = vsel %vm3478_vm10, %v3424_v18, %v5866_v46  ;;  %v2922_v22 = vpop.f32.mrb[140].mxu0 }
 0x2b2   : > { %6514 = vmatprep.mubr.msk.bf16.mxu1 %vm7039_vm1, %v9543_v36  ;;  %v3365_v50 = vmax.f32 %v3311_v47, %v2922_v22  ;;  %v6302_v9 = vpop.f32.mrb[141].mxu0  ;;  %v8766_v12 = vpack.c.bf16 %v3748_v52, %v3747_v1 }
 0x2b3   : > { %v3226_v3 = vpop.f32.mrb[36].mxu1  ;;  %v2925_v5 = vpop.f32.mrb[142].mxu0 }
 0x2b4   : > { %v3337_v17 = vmax.f32 %v3218_v23, %v3226_v3  ;;  %v6454_v14 = vpop.f32.mrb[37].mxu1  ;;  %v3425_v26 = vadd.f32 %v8641_v20, %v3365_v50  ;;  %v3366_v39 = vmax.f32 %v3312_v57, %v2925_v5  ;;  %3866 = vrot.lane.b32.xlu0 %v8766_v12, %s7043_s26  ;;  %3918 = vrot.lane.b32.xlu1 %v8766_v12, %s7045_s19  ;;  %v6303_v18 = vpop.f32.mrb[143].mxu0  ;;  %v3655_v23 = vmul.f32 1.442695, %v3556_v61 }
 0x2b5   : > { %v3229_v15 = vpop.f32.mrb[38].mxu1  ;;  %v3857_v57 = vpop.permute.xlu0 %3856 }
 0x2b6   : > { %v3338_v28 = vmax.f32 %v3221_v54, %v3229_v15  ;;  %v6455_v11 = vpop.f32.mrb[39].mxu1  ;;  %v3533_v13 = vmin.f32 %v3425_v26, 0.0  ;;  %v3426_v56 = vadd.f32 %v8641_v20, %v3366_v39  ;;  %6409 = vmatmul.mubr.msk.bf16.gmra.mrb[248].mxu0 %vm2441_vm4, %v8396_v35  ;;  %v3971_v50 = vsel %vm3954_vm7, %v8527_v6, %v3857_v57 }
 0x2b7   : > { %6412 = vmatprep.mubr.msk.bf16.mxu0 %vm7039_vm1, %v9543_v36  ;;  %vm3479_vm3 = vcmp.gt.f32.partialorder %v3425_v26, 0.0 }
 0x2b8   : > { %v3609_v40 = vmul.f32 1.442695, %v3533_v13  ;;  %v3534_v19 = vmin.f32 %v3426_v56, 0.0 }
 0x2b9   : > { %v2930_v8 = vpop.f32.mrb[144].mxu0 }
 0x2ba   : > { %6863 = vpow2.f32 %v3609_v40  ;;  %v3611_v0 = vmul.f32 1.442695, %v3534_v19  ;;  %v6306_v34 = vpop.f32.mrb[145].mxu0 }
 0x2bb   : > { %v3234_v21 = vpop.f32.mrb[40].mxu1  ;;  %v2933_v63 = vpop.f32.mrb[146].mxu0 }
 0x2bc   : > { %v8788_v47 = vmax.f32 %v3337_v17, %v3234_v21  ;;  %v6458_v42 = vpop.f32.mrb[41].mxu1  ;;  %6865 = vpow2.f32 %v3611_v0  ;;  %v6307_v35 = vpop.f32.mrb[147].mxu0 }
 0x2bd   : > { %v3237_v55 = vpop.f32.mrb[42].mxu1  ;;  %6867 = vpow2.f32 %v3653_v58  ;;  %v3557_v35 = vmin.f32 %v8804_v7, 0.0 }
 0x2be   : > { %v8790_v53 = vmax.f32 %v3338_v28, %v3237_v55  ;;  %v6459_v45 = vpop.f32.mrb[43].mxu1  ;;  %6413 = vmatmul.mubr.msk.bf16.gmra.mrb[252].mxu0 %vm2441_vm4, %v8415_v49  ;;  %6869 = vpow2.f32 %v3655_v23  ;;  %vm3480_vm4 = vcmp.gt.f32.partialorder %v3426_v56, 0.0 }
 0x2c1   : > { %v2938_v51 = vpop.f32.mrb[148].mxu0 }
 0x2c2   : > { %v3313_v54 = vmax.f32 %v2930_v8, %v2938_v51  ;;  %v6310_v43 = vpop.f32.mrb[149].mxu0  ;;  %v8813_v8 = vadd.f32 %v8641_v20, %v8747_v2 }
 0x2c3   : > { %v3242_v10 = vpop.f32.mrb[44].mxu1  ;;  %v2941_v38 = vpop.f32.mrb[150].mxu0 }
 0x2c4   : > { %v6462_v60 = vpop.f32.mrb[45].mxu1  ;;  %v6864_v31 = vpop.eup %6863  ;;  %v3314_v37 = vmax.f32 %v2933_v63, %v2941_v38  ;;  %v3558_v45 = vmin.f32 %v8813_v8, 0.0  ;;  %vm3504_vm5 = vcmp.gt.f32.partialorder %v8813_v8, 0.0 }
 0x2c5   : > { %v6311_v46 = vpop.f32.mrb[151].mxu0  ;;  %v3245_v32 = vpop.f32.mrb[46].mxu1  ;;  %v5867_v1 = vadd.f32 -1.0, %v6864_v31  ;;  %v3657_v60 = vmul.f32 1.442695, %v3557_v35 }
 0x2c6   : > { %v6463_v52 = vpop.f32.mrb[47].mxu1  ;;  %v6866_v22 = vpop.eup %6865 }
 0x2c7   : > { %v3911_v49 = vpop.permute.xlu1 %3910  ;;  %v5868_v9 = vadd.f32 -1.0, %v6866_v22  ;;  %v6868_v5 = vpop.eup %6867  ;;  %v3749_v17 = vsel %vm3479_vm3, %v3425_v26, %v5867_v1 }
 0x2c8   : > { %v4047_v3 = vsel %vm4035_vm8, %v3971_v50, %v3911_v49  ;;  %v6870_v18 = vpop.eup %6869  ;;  %v5889_v34 = vadd.f32 -1.0, %v6868_v5 }
 0x2c9   : > { %6515 = vmatmul.mubr.msk.bf16.gmra.mrb[88].mxu1 %vm4119_vm9, %v4047_v3  ;;  %v3750_v14 = vsel %vm3480_vm4, %v3426_v56, %v5868_v9  ;;  %v2946_v39 = vpop.f32.mrb[152].mxu0  ;;  %v5890_v33 = vadd.f32 -1.0, %v6870_v18 }
 0x2ca   : > { %6518 = vmatprep.mubr.msk.bf16.mxu1 %vm7039_vm1, %v9543_v36  ;;  %v3367_v15 = vmax.f32 %v3313_v54, %v2946_v39  ;;  %v6314_v28 = vpop.f32.mrb[153].mxu0  ;;  %v8800_v11 = vpack.c.bf16 %v3750_v14, %v3749_v17  ;;  %v3771_v57 = vsel %vm3501_vm11, %v8770_v48, %v5889_v34 }
 0x2cb   : > { %v3250_v6 = vpop.f32.mrb[48].mxu1  ;;  %v2949_v13 = vpop.f32.mrb[154].mxu0  ;;  %v3772_v51 = vsel %vm3502_vm12, %v8779_v24, %v5890_v33 }
 0x2cc   : > { %v3339_v40 = vmax.f32 %v3242_v10, %v3250_v6  ;;  %v6466_v19 = vpop.f32.mrb[49].mxu1  ;;  %v3427_v26 = vadd.f32 %v8641_v20, %v3367_v15  ;;  %v3368_v56 = vmax.f32 %v3314_v37, %v2949_v13  ;;  %3868 = vrot.lane.b32.xlu0 %v8800_v11, %s7043_s26  ;;  %3920 = vrot.lane.b32.xlu1 %v8800_v11, %s7045_s19  ;;  %v6315_v61 = vpop.f32.mrb[155].mxu0 }
 0x2cd   : > { %v3253_v0 = vpop.f32.mrb[50].mxu1  ;;  %v8824_v52 = vpack.c.bf16 %v3772_v51, %v3771_v57  ;;  %v3859_v24 = vpop.permute.xlu0 %3858 }
 0x2ce   : > { %v3340_v21 = vmax.f32 %v3245_v32, %v3253_v0  ;;  %v6467_v63 = vpop.f32.mrb[51].mxu1  ;;  %v3535_v58 = vmin.f32 %v3427_v26, 0.0  ;;  %v3428_v42 = vadd.f32 %v8641_v20, %v3368_v56  ;;  %v3659_v32 = vmul.f32 1.442695, %v3558_v45 }
 0x2cf   : > { %vm3481_vm13 = vcmp.gt.f32.partialorder %v3427_v26, 0.0  ;;  %v8838_v45 = vadd.f32 %v8641_v20, %v8788_v47 }
 0x2d0   : > { %v3613_v23 = vmul.f32 1.442695, %v3535_v58  ;;  %v3536_v55 = vmin.f32 %v3428_v42, 0.0  ;;  %vm3482_vm14 = vcmp.gt.f32.partialorder %v3428_v42, 0.0 }
 0x2d1   : > { %v2954_v2 = vpop.f32.mrb[156].mxu0  ;;  %vm3505_vm10 = vcmp.gt.f32.partialorder %v8838_v45, 0.0 }
 0x2d2   : > { %6871 = vpow2.f32 %v3613_v23  ;;  %v3615_v54 = vmul.f32 1.442695, %v3536_v55  ;;  %v6318_v43 = vpop.f32.mrb[157].mxu0 }
 0x2d3   : > { %v3258_v10 = vpop.f32.mrb[52].mxu1  ;;  %v2957_v38 = vpop.f32.mrb[158].mxu0 }
 0x2d4   : > { %v8822_v31 = vmax.f32 %v3339_v40, %v3258_v10  ;;  %v6470_v37 = vpop.f32.mrb[53].mxu1  ;;  %6873 = vpow2.f32 %v3615_v54  ;;  %v6319_v46 = vpop.f32.mrb[159].mxu0  ;;  %v3974_v40 = vsel %vm3954_vm7, %v8559_v25, %v3859_v24  ;;  %v8847_v54 = vadd.f32 %v8641_v20, %v8790_v53 }
 0x2d5   : > { %v3261_v1 = vpop.f32.mrb[54].mxu1  ;;  %6875 = vpow2.f32 %v3657_v60 }
 0x2d6   : > { %v8826_v22 = vmax.f32 %v3340_v21, %v3261_v1  ;;  %v6471_v48 = vpop.f32.mrb[55].mxu1  ;;  %6877 = vpow2.f32 %v3659_v32  ;;  %v3559_v32 = vmin.f32 %v8838_v45, 0.0  ;;  %v3560_v24 = vmin.f32 %v8847_v54, 0.0 }
 0x2d7   : > { %vm3506_vm3 = vcmp.gt.f32.partialorder %v8847_v54, 0.0 }
 0x2d9   : > { %v2962_v50 = vpop.f32.mrb[160].mxu0 }
 0x2da   : > { %v3315_v49 = vmax.f32 %v2954_v2, %v2962_v50  ;;  %v6322_v9 = vpop.f32.mrb[161].mxu0 }
 0x2db   : > { %v3266_v3 = vpop.f32.mrb[56].mxu1  ;;  %v2965_v5 = vpop.f32.mrb[162].mxu0 }
 0x2dc   : > { %v6474_v17 = vpop.f32.mrb[57].mxu1  ;;  %v6872_v14 = vpop.eup %6871  ;;  %v3316_v39 = vmax.f32 %v2957_v38, %v2965_v5 }
 0x2dd   : > { %v6323_v18 = vpop.f32.mrb[163].mxu0  ;;  %v3269_v15 = vpop.f32.mrb[58].mxu1  ;;  %v5869_v28 = vadd.f32 -1.0, %v6872_v14  ;;  %v3661_v14 = vmul.f32 1.442695, %v3559_v32 }
 0x2de   : > { %v6475_v6 = vpop.f32.mrb[59].mxu1  ;;  %v6874_v13 = vpop.eup %6873 }
 0x2df   : > { %v3913_v19 = vpop.permute.xlu1 %3912  ;;  %v5870_v56 = vadd.f32 -1.0, %v6874_v13  ;;  %v6876_v0 = vpop.eup %6875  ;;  %v3751_v34 = vsel %vm3481_vm13, %v3427_v26, %v5869_v28  ;;  %v3663_v28 = vmul.f32 1.442695, %v3560_v24 }
 0x2e0   : > { %v4049_v61 = vsel %vm4035_vm8, %v3974_v40, %v3913_v19  ;;  %v6878_v63 = vpop.eup %6877  ;;  %v5891_v10 = vadd.f32 -1.0, %v6876_v0 }
 0x2e1   : > { %6519 = vmatmul.mubr.msk.bf16.gmra.mrb[92].mxu1 %vm4119_vm9, %v4049_v61  ;;  %v3752_v33 = vsel %vm3482_vm14, %v3428_v42, %v5870_v56  ;;  %v2970_v21 = vpop.f32.mrb[164].mxu0  ;;  %v5892_v47 = vadd.f32 -1.0, %v6878_v63  ;;  %v3861_v61 = vpop.permute.xlu0 %3860 }
 0x2e2   : > { %6522 = vmatprep.mubr.msk.bf16.mxu1 %vm7039_vm1, %v9543_v36  ;;  %v3369_v58 = vmax.f32 %v3315_v49, %v2970_v21  ;;  %v6326_v35 = vpop.f32.mrb[165].mxu0  ;;  %v8834_v23 = vpack.c.bf16 %v3752_v33, %v3751_v34  ;;  %v3773_v50 = vsel %vm3503_vm15, %v8804_v7, %v5891_v10 }
 0x2e3   : > { %v3274_v25 = vpop.f32.mrb[60].mxu1  ;;  %v2973_v55 = vpop.f32.mrb[166].mxu0  ;;  %v3774_v49 = vsel %vm3504_vm5, %v8813_v8, %v5892_v47  ;;  %v3977_v35 = vsel %vm3954_vm7, %v8596_v59, %v3861_v61 }
 0x2e4   : > { %v3341_v2 = vmax.f32 %v3266_v3, %v3274_v25  ;;  %v6478_v57 = vpop.f32.mrb[61].mxu1  ;;  %v3429_v26 = vadd.f32 %v8641_v20, %v3369_v58  ;;  %v3370_v42 = vmax.f32 %v3316_v39, %v2973_v55  ;;  %3870 = vrot.lane.b32.xlu0 %v8834_v23, %s7043_s26  ;;  %3922 = vrot.lane.b32.xlu1 %v8834_v23, %s7045_s19  ;;  %v6327_v51 = vpop.f32.mrb[167].mxu0 }
 0x2e5   : > { %v3277_v43 = vpop.f32.mrb[62].mxu1  ;;  %v8858_v13 = vpack.c.bf16 %v3774_v49, %v3773_v50 }
 0x2e6   : > { %v3342_v38 = vmax.f32 %v3269_v15, %v3277_v43  ;;  %v6479_v60 = vpop.f32.mrb[63].mxu1  ;;  %v3537_v37 = vmin.f32 %v3429_v26, 0.0  ;;  %v3430_v46 = vadd.f32 %v8641_v20, %v3370_v42  ;;  %vm3483_vm6 = vcmp.gt.f32.partialorder %v3429_v26, 0.0 }
 0x2e8   : > { %v3617_v1 = vmul.f32 1.442695, %v3537_v37  ;;  %v3538_v48 = vmin.f32 %v3430_v46, 0.0  ;;  %vm3484_vm2 = vcmp.gt.f32.partialorder %v3430_v46, 0.0  ;;  %v8872_v37 = vadd.f32 %v8641_v20, %v8822_v31 }
 0x2e9   : > { %v2978_v53 = vpop.f32.mrb[168].mxu0 }
 0x2ea   : > { %6879 = vpow2.f32 %v3617_v1  ;;  %v3619_v9 = vmul.f32 1.442695, %v3538_v48  ;;  %v6330_v3 = vpop.f32.mrb[169].mxu0  ;;  %v3561_v50 = vmin.f32 %v8872_v37, 0.0  ;;  %vm3507_vm12 = vcmp.gt.f32.partialorder %v8872_v37, 0.0 }
 0x2eb   : > { %v3282_v5 = vpop.f32.mrb[64].mxu1  ;;  %v2981_v17 = vpop.f32.mrb[170].mxu0 }
 0x2ec   : > { %v8856_v39 = vmax.f32 %v3341_v2, %v3282_v5  ;;  %v6482_v18 = vpop.f32.mrb[65].mxu1  ;;  %6881 = vpow2.f32 %v3619_v9  ;;  %v6331_v15 = vpop.f32.mrb[171].mxu0 }
 0x2ed   : > { %v3285_v6 = vpop.f32.mrb[66].mxu1  ;;  %6883 = vpow2.f32 %v3661_v14 }
 0x2ee   : > { %v8860_v40 = vmax.f32 %v3342_v38, %v3285_v6  ;;  %v6483_v7 = vpop.f32.mrb[67].mxu1  ;;  %6885 = vpow2.f32 %v3663_v28  ;;  %v3665_v28 = vmul.f32 1.442695, %v3561_v50 }
 0x2f1   : > { %v2986_v8 = vpop.f32.mrb[172].mxu0 }
 0x2f2   : > { %v3317_v19 = vmax.f32 %v2978_v53, %v2986_v8  ;;  %v6334_v56 = vpop.f32.mrb[173].mxu0 }
 0x2f3   : > { %v2989_v0 = vpop.f32.mrb[174].mxu0 }
 0x2f4   : > { %v6880_v34 = vpop.eup %6879  ;;  %v3318_v33 = vmax.f32 %v2981_v17, %v2989_v0  ;;  %v6335_v21 = vpop.f32.mrb[175].mxu0 }
 0x2f5   : > { %v5871_v63 = vadd.f32 -1.0, %v6880_v34 }
 0x2f6   : > { %v6882_v58 = vpop.eup %6881  ;;  %v3915_v25 = vpop.permute.xlu1 %3914 }
 0x2f7   : > { %v5872_v55 = vadd.f32 -1.0, %v6882_v58  ;;  %v4051_v2 = vsel %vm4035_vm8, %v3977_v35, %v3915_v25  ;;  %v6884_v57 = vpop.eup %6883  ;;  %v3753_v42 = vsel %vm3483_vm6, %v3429_v26, %v5871_v63  ;;  %v3863_v0 = vpop.permute.xlu0 %3862 }
 0x2f8   : > { %6523 = vmatmul.mubr.msk.bf16.gmra.mrb[96].mxu1 %vm4119_vm9, %v4051_v2  ;;  %v6886_v10 = vpop.eup %6885  ;;  %v5893_v48 = vadd.f32 -1.0, %v6884_v57  ;;  %v3980_v58 = vsel %vm3954_vm7, %v8634_v27, %v3863_v0 }
 0x2f9   : > { %v3754_v51 = vsel %vm3484_vm2, %v3430_v46, %v5872_v55  ;;  %v2994_v43 = vpop.f32.mrb[176].mxu0  ;;  %6526 = vmatprep.mubr.msk.bf16.mxu1 %vm7039_vm1, %v9543_v36  ;;  %v8881_v46 = vadd.f32 %v8641_v20, %v8826_v22  ;;  %v5894_v24 = vadd.f32 -1.0, %v6886_v10 }
 0x2fa   : > { %v3371_v47 = vmax.f32 %v3317_v19, %v2994_v43  ;;  %v6338_v38 = vpop.f32.mrb[177].mxu0  ;;  %v8868_v60 = vpack.c.bf16 %v3754_v51, %v3753_v42  ;;  %v3775_v17 = vsel %vm3505_vm10, %v8838_v45, %v5893_v48  ;;  %v8911_v48 = vadd.f32 %v8641_v20, %v8860_v40 }
 0x2fb   : > { %v2997_v59 = vpop.f32.mrb[178].mxu0  ;;  %v3562_v3 = vmin.f32 %v8881_v46, 0.0  ;;  %v3776_v22 = vsel %vm3506_vm3, %v8847_v54, %v5894_v24  ;;  %vm3508_vm13 = vcmp.gt.f32.partialorder %v8881_v46, 0.0 }
 0x2fc   : > { %v3431_v32 = vadd.f32 %v8641_v20, %v3371_v47  ;;  %v3372_v1 = vmax.f32 %v3318_v33, %v2997_v59  ;;  %3872 = vrot.lane.b32.xlu0 %v8868_v60, %s7043_s26  ;;  %3924 = vrot.lane.b32.xlu1 %v8868_v60, %s7045_s19  ;;  %v6339_v26 = vpop.f32.mrb[179].mxu0  ;;  %v8890_v8 = vpack.c.bf16 %v3776_v22, %v3775_v17  ;;  %vm3510_vm6 = vcmp.gt.f32.partialorder %v8911_v48, 0.0 }
 0x2fd   : > { %v3667_v7 = vmul.f32 1.442695, %v3562_v3  ;;  %v8902_v59 = vadd.f32 %v8641_v20, %v8856_v39  ;;  %v3564_v3 = vmin.f32 %v8911_v48, 0.0 }
 0x2fe   : > { %v3539_v53 = vmin.f32 %v3431_v32, 0.0  ;;  %v3432_v31 = vadd.f32 %v8641_v20, %v3372_v1  ;;  %vm3485_vm4 = vcmp.gt.f32.partialorder %v3431_v32, 0.0 }
 0x2ff   : > { %v3563_v50 = vmin.f32 %v8902_v59, 0.0  ;;  %vm3509_vm5 = vcmp.gt.f32.partialorder %v8902_v59, 0.0 }
 0x300   : > { %v3621_v49 = vmul.f32 1.442695, %v3539_v53  ;;  %v3540_v9 = vmin.f32 %v3432_v31, 0.0  ;;  %vm3486_vm11 = vcmp.gt.f32.partialorder %v3432_v31, 0.0 }
 0x301   : > { %v3002_v5 = vpop.f32.mrb[180].mxu0 }
 0x302   : > { %6887 = vpow2.f32 %v3621_v49  ;;  %v3623_v14 = vmul.f32 1.442695, %v3540_v9  ;;  %v6342_v18 = vpop.f32.mrb[181].mxu0 }
 0x303   : > { %v3005_v15 = vpop.f32.mrb[182].mxu0 }
 0x304   : > { %6889 = vpow2.f32 %v3623_v14  ;;  %v6343_v6 = vpop.f32.mrb[183].mxu0 }
 0x305   : > { %6891 = vpow2.f32 %v3665_v28  ;;  %v3671_v28 = vmul.f32 1.442695, %v3564_v3 }
 0x306   : > { %6893 = vpow2.f32 %v3667_v7 }
 0x309   : > { %v3010_v19 = vpop.f32.mrb[184].mxu0 }
 0x30a   : > { %v3319_v56 = vmax.f32 %v3002_v5, %v3010_v19  ;;  %v6346_v61 = vpop.f32.mrb[185].mxu0 }
 0x30b   : > { %v3013_v34 = vpop.f32.mrb[186].mxu0 }
 0x30c   : > { %v6888_v45 = vpop.eup %6887  ;;  %v3320_v33 = vmax.f32 %v3005_v15, %v3013_v34  ;;  %v6347_v54 = vpop.f32.mrb[187].mxu0 }
 0x30d   : > { %v5873_v21 = vadd.f32 -1.0, %v6888_v45 }
 0x30e   : > { %v6890_v63 = vpop.eup %6889  ;;  %v3917_v35 = vpop.permute.xlu1 %3916 }
 0x30f   : > { %v5874_v25 = vadd.f32 -1.0, %v6890_v63  ;;  %v4053_v55 = vsel %vm4035_vm8, %v3980_v58, %v3917_v35  ;;  %v6892_v2 = vpop.eup %6891  ;;  %v3755_v57 = vsel %vm3485_vm4, %v3431_v32, %v5873_v21  ;;  %v3865_v19 = vpop.permute.xlu0 %3864 }
 0x310   : > { %6527 = vmatmul.mubr.msk.bf16.gmra.mrb[100].mxu1 %vm4119_vm9, %v4053_v55  ;;  %v6894_v43 = vpop.eup %6893  ;;  %v5895_v24 = vadd.f32 -1.0, %v6892_v2  ;;  %v3983_v35 = vsel %vm3954_vm7, %v8685_v29, %v3865_v19 }
 0x311   : > { %v3756_v42 = vsel %vm3486_vm11, %v3432_v31, %v5874_v25  ;;  %v3018_v51 = vpop.f32.mrb[188].mxu0  ;;  %6530 = vmatprep.mubr.msk.bf16.mxu1 %vm7039_vm1, %v9543_v36  ;;  %v5896_v53 = vadd.f32 -1.0, %v6894_v43 }
 0x312   : > { %v3373_v10 = vmax.f32 %v3319_v56, %v3018_v51  ;;  %v6350_v47 = vpop.f32.mrb[189].mxu0  ;;  %v8898_v38 = vpack.c.bf16 %v3756_v42, %v3755_v57  ;;  %v3777_v5 = vsel %vm3507_vm12, %v8872_v37, %v5895_v24 }
 0x313   : > { %v3021_v27 = vpop.f32.mrb[190].mxu0  ;;  %v3778_v40 = vsel %vm3508_vm13, %v8881_v46, %v5896_v53 }
 0x314   : > { %v3433_v1 = vadd.f32 %v8641_v20, %v3373_v10  ;;  %v3374_v26 = vmax.f32 %v3320_v33, %v3021_v27  ;;  %3874 = vrot.lane.b32.xlu0 %v8898_v38, %s7043_s26  ;;  %3926 = vrot.lane.b32.xlu1 %v8898_v38, %s7045_s19  ;;  %v6351_v32 = vpop.f32.mrb[191].mxu0  ;;  %v8920_v6 = vpack.c.bf16 %v3778_v40, %v3777_v5 }
 0x315   : > { %v8937_v32 = vld [vmem:[%s9523_s2] ss:$0 sm:$0xff] }
 0x316   : > { %v3541_v31 = vmin.f32 %v3433_v1, 0.0  ;;  %v3434_v39 = vadd.f32 %v8641_v20, %v3374_v26  ;;  %v3669_v20 = vmul.f32 1.442695, %v3563_v50  ;;  %vm3487_vm14 = vcmp.gt.f32.partialorder %v3433_v1, 0.0 }
 0x318   : > { %v3625_v49 = vmul.f32 1.442695, %v3541_v31  ;;  %v3542_v9 = vmin.f32 %v3434_v39, 0.0  ;;  %vm3488_vm15 = vcmp.gt.f32.partialorder %v3434_v39, 0.0 }
 0x319   : > { %v3026_v17 = vpop.f32.mrb[192].mxu0 }
 0x31a   : > { %6895 = vpow2.f32 %v3625_v49  ;;  %v3627_v22 = vmul.f32 1.442695, %v3542_v9  ;;  %v6354_v14 = vpop.f32.mrb[193].mxu0 }
 0x31b   : > { %v3029_v18 = vpop.f32.mrb[194].mxu0 }
 0x31c   : > { %6897 = vpow2.f32 %v3627_v22  ;;  %v6355_v15 = vpop.f32.mrb[195].mxu0 }
 0x31d   : > { %6899 = vpow2.f32 %v3669_v20 }
 0x31e   : > { %6901 = vpow2.f32 %v3671_v28 }
 0x321   : > { %v3034_v7 = vpop.f32.mrb[196].mxu0 }
 0x322   : > { %v3321_v56 = vmax.f32 %v3026_v17, %v3034_v7  ;;  %v6358_v61 = vpop.f32.mrb[197].mxu0 }
 0x323   : > { %v3037_v37 = vpop.f32.mrb[198].mxu0  ;;  %v8922_v0 = vpop.f32.mrb[68].mxu1 }
 0x324   : > { %v6896_v46 = vpop.eup %6895  ;;  %v3322_v34 = vmax.f32 %v3029_v18, %v3037_v37  ;;  %v6359_v45 = vpop.f32.mrb[199].mxu0 }
 0x325   : > { %v6496_v33 = vpop.f32.mrb[69].mxu1  ;;  %v5875_v54 = vadd.f32 -1.0, %v6896_v46 }
 0x326   : > { %v8924_v21 = vpop.f32.mrb[70].mxu1  ;;  %v6898_v63 = vpop.eup %6897 }
 0x327   : > { %v6497_v58 = vpop.f32.mrb[71].mxu1  ;;  %v5876_v25 = vadd.f32 -1.0, %v6898_v63  ;;  %v3919_v55 = vpop.permute.xlu1 %3918  ;;  %v3757_v42 = vsel %vm3487_vm14, %v3433_v1, %v5875_v54 }
 0x328   : > { %v4055_v2 = vsel %vm4035_vm8, %v3983_v35, %v3919_v55  ;;  %v6900_v57 = vpop.eup %6899  ;;  %v3867_v7 = vpop.permute.xlu0 %3866 }
 0x329   : > { %v3758_v51 = vsel %vm3488_vm15, %v3434_v39, %v5876_v25  ;;  %6531 = vmatmul.mubr.msk.bf16.gmra.mrb[104].mxu1 %vm4119_vm9, %v4055_v2  ;;  %v3042_v43 = vpop.f32.mrb[200].mxu0  ;;  %v6902_v10 = vpop.eup %6901  ;;  %v5897_v31 = vadd.f32 -1.0, %v6900_v57  ;;  %v3986_v25 = vsel %vm3954_vm7, %v8727_v30, %v3867_v7 }
 0x32a   : > { %v3375_v47 = vmax.f32 %v3321_v56, %v3042_v43  ;;  %v6362_v27 = vpop.f32.mrb[201].mxu0  ;;  %v8930_v26 = vpack.c.bf16 %v3758_v51, %v3757_v42  ;;  %6534 = vmatprep.mubr.msk.bf16.mxu1 %vm7039_vm1, %v9543_v36  ;;  %v5898_v39 = vadd.f32 -1.0, %v6902_v10 }
 0x32b   : > { %v3045_v29 = vpop.f32.mrb[202].mxu0  ;;  %v3779_v5 = vsel %vm3509_vm5, %v8902_v59, %v5897_v31 }
 0x32c   : > { %v3435_v1 = vadd.f32 %v8937_v32, %v3375_v47  ;;  %v3376_v24 = vmax.f32 %v3322_v34, %v3045_v29  ;;  %3876 = vrot.lane.b32.xlu0 %v8930_v26, %s7043_s26  ;;  %3928 = vrot.lane.b32.xlu1 %v8930_v26, %s7045_s19  ;;  %v6363_v53 = vpop.f32.mrb[203].mxu0  ;;  %v3780_v40 = vsel %vm3510_vm6, %v8911_v48, %v5898_v39 }
 0x32d   : > { %v8949_v15 = vpack.c.bf16 %v3780_v40, %v3779_v5 }
 0x32e   : > { %v3543_v50 = vmin.f32 %v3435_v1, 0.0  ;;  %v3436_v49 = vadd.f32 %v8937_v32, %v3376_v24  ;;  %vm3489_vm2 = vcmp.gt.f32.partialorder %v3435_v1, 0.0 }
 0x330   : > { %v3629_v9 = vmul.f32 1.442695, %v3543_v50  ;;  %v3544_v3 = vmin.f32 %v3436_v49, 0.0  ;;  %vm3490_vm10 = vcmp.gt.f32.partialorder %v3436_v49, 0.0 }
 0x331   : > { %v3050_v17 = vpop.f32.mrb[204].mxu0 }
 0x332   : > { %6903 = vpow2.f32 %v3629_v9  ;;  %v3631_v22 = vmul.f32 1.442695, %v3544_v3  ;;  %v6366_v14 = vpop.f32.mrb[205].mxu0 }
 0x333   : > { %v3053_v18 = vpop.f32.mrb[206].mxu0 }
 0x334   : > { %6905 = vpow2.f32 %v3631_v22  ;;  %v6367_v20 = vpop.f32.mrb[207].mxu0 }
 0x339   : > { %v3058_v28 = vpop.f32.mrb[208].mxu0 }
 0x33a   : > { %v3323_v19 = vmax.f32 %v3050_v17, %v3058_v28  ;;  %v6370_v56 = vpop.f32.mrb[209].mxu0 }
 0x33b   : > { %v3061_v61 = vpop.f32.mrb[210].mxu0  ;;  %v4222_v37 = vpop.f32.mrb[72].mxu1 }
 0x33c   : > { %v6904_v46 = vpop.eup %6903  ;;  %v3324_v34 = vmax.f32 %v3053_v18, %v3061_v61  ;;  %v4429_v59 = vmax.f32 %v8922_v0, %v4222_v37  ;;  %v6371_v48 = vpop.f32.mrb[211].mxu0  ;;  %v8970_v18 = vld [vmem:[%s9525_s4] ss:$0 sm:$0xff] }
 0x33d   : > { %v6500_v45 = vpop.f32.mrb[73].mxu1  ;;  %v5877_v33 = vadd.f32 -1.0, %v6904_v46 }
 0x33e   : > { %v4225_v54 = vpop.f32.mrb[74].mxu1  ;;  %v6906_v63 = vpop.eup %6905 }
 0x33f   : > { %v4430_v58 = vmax.f32 %v8924_v21, %v4225_v54  ;;  %v6501_v35 = vpop.f32.mrb[75].mxu1  ;;  %v5878_v55 = vadd.f32 -1.0, %v6906_v63  ;;  %v3921_v2 = vpop.permute.xlu1 %3920  ;;  %v3759_v42 = vsel %vm3489_vm2, %v3435_v1, %v5877_v33 }
 0x340   : > { %v4057_v57 = vsel %vm4035_vm8, %v3986_v25, %v3921_v2  ;;  %v3869_v40 = vpop.permute.xlu0 %3868 }
 0x341   : > { %v3760_v51 = vsel %vm3490_vm10, %v3436_v49, %v5878_v55  ;;  %6535 = vmatmul.mubr.msk.bf16.gmra.mrb[108].mxu1 %vm4119_vm9, %v4057_v57  ;;  %v3066_v0 = vpop.f32.mrb[212].mxu0  ;;  %v3989_v54 = vsel %vm3954_vm7, %v8766_v12, %v3869_v40 }
 0x342   : > { %v3377_v43 = vmax.f32 %v3323_v19, %v3066_v0  ;;  %v6374_v10 = vpop.f32.mrb[213].mxu0  ;;  %v8957_v47 = vpack.c.bf16 %v3760_v51, %v3759_v42  ;;  %6538 = vmatprep.mubr.msk.bf16.mxu1 %vm7039_vm1, %v9543_v36 }
 0x343   : > { %v3069_v21 = vpop.f32.mrb[214].mxu0 }
 0x344   : > { %v3437_v30 = vadd.f32 %v8937_v32, %v3377_v43  ;;  %v3378_v27 = vmax.f32 %v3324_v34, %v3069_v21  ;;  %3878 = vrot.lane.b32.xlu0 %v8957_v47, %s7043_s26  ;;  %3930 = vrot.lane.b32.xlu1 %v8957_v47, %s7045_s19  ;;  %v6375_v29 = vpop.f32.mrb[215].mxu0 }
 0x346   : > { %v3545_v1 = vmin.f32 %v3437_v30, 0.0  ;;  %v3438_v24 = vadd.f32 %v8937_v32, %v3378_v27  ;;  %vm3491_vm4 = vcmp.gt.f32.partialorder %v3437_v30, 0.0 }
 0x348   : > { %v3633_v53 = vmul.f32 1.442695, %v3545_v1  ;;  %v3546_v31 = vmin.f32 %v3438_v24, 0.0  ;;  %vm3492_vm3 = vcmp.gt.f32.partialorder %v3438_v24, 0.0 }
 0x349   : > { %v3074_v39 = vpop.f32.mrb[216].mxu0 }
 0x34a   : > { %6907 = vpow2.f32 %v3633_v53  ;;  %v3635_v50 = vmul.f32 1.442695, %v3546_v31  ;;  %v6378_v49 = vpop.f32.mrb[217].mxu0 }
 0x34b   : > { %v3077_v9 = vpop.f32.mrb[218].mxu0 }
 0x34c   : > { %6909 = vpow2.f32 %v3635_v50  ;;  %v6379_v3 = vpop.f32.mrb[219].mxu0 }
 0x351   : > { %v3082_v5 = vpop.f32.mrb[220].mxu0 }
 0x352   : > { %v3325_v17 = vmax.f32 %v3074_v39, %v3082_v5  ;;  %v6382_v22 = vpop.f32.mrb[221].mxu0 }
 0x353   : > { %v3085_v14 = vpop.f32.mrb[222].mxu0 }
 0x354   : > { %v4230_v20 = vpop.f32.mrb[76].mxu1  ;;  %v6908_v28 = vpop.eup %6907  ;;  %v3326_v7 = vmax.f32 %v3077_v9, %v3085_v14 }
 0x355   : > { %v4447_v19 = vmax.f32 %v4429_v59, %v4230_v20  ;;  %v6383_v56 = vpop.f32.mrb[223].mxu0  ;;  %v6504_v61 = vpop.f32.mrb[77].mxu1  ;;  %v5879_v34 = vadd.f32 -1.0, %v6908_v28 }
 0x356   : > { %v4233_v37 = vpop.f32.mrb[78].mxu1  ;;  %v6910_v46 = vpop.eup %6909 }
 0x357   : > { %v4471_v48 = vadd.f32 %v8970_v18, %v4447_v19  ;;  %v4448_v45 = vmax.f32 %v4430_v58, %v4233_v37  ;;  %v6505_v33 = vpop.f32.mrb[79].mxu1  ;;  %v5880_v63 = vadd.f32 -1.0, %v6910_v46  ;;  %v3923_v35 = vpop.permute.xlu1 %3922  ;;  %v3761_v42 = vsel %vm3491_vm4, %v3437_v30, %v5879_v34 }
 0x358   : > { %v4059_v59 = vsel %vm4035_vm8, %v3989_v54, %v3923_v35  ;;  %v3871_v20 = vpop.permute.xlu0 %3870 }
 0x359   : > { %v4507_v25 = vmin.f32 %v4471_v48, 0.0  ;;  %v4472_v55 = vadd.f32 %v8970_v18, %v4448_v45  ;;  %v3762_v2 = vsel %vm3492_vm3, %v3438_v24, %v5880_v63  ;;  %6539 = vmatmul.mubr.msk.bf16.gmra.mrb[112].mxu1 %vm4119_vm9, %v4059_v59  ;;  %v3090_v57 = vpop.f32.mrb[224].mxu0  ;;  %vm4489_vm11 = vcmp.gt.f32.partialorder %v4471_v48, 0.0 }
 0x35a   : > { %v3379_v0 = vmax.f32 %v3325_v17, %v3090_v57  ;;  %v6386_v43 = vpop.f32.mrb[225].mxu0  ;;  %6542 = vmatprep.mubr.msk.bf16.mxu1 %vm7039_vm1, %v9543_v36  ;;  %v8980_v10 = vpack.c.bf16 %v3762_v2, %v3761_v42  ;;  %v3992_v2 = vsel %vm3954_vm7, %v8800_v11, %v3871_v20 }
 0x35b   : > { %v4525_v51 = vmul.f32 1.442695, %v4507_v25  ;;  %v4508_v58 = vmin.f32 %v4472_v55, 0.0  ;;  %v3093_v12 = vpop.f32.mrb[226].mxu0  ;;  %vm4490_vm12 = vcmp.gt.f32.partialorder %v4472_v55, 0.0 }
 0x35c   : > { %v3439_v27 = vadd.f32 %v8937_v32, %v3379_v0  ;;  %v3380_v29 = vmax.f32 %v3326_v7, %v3093_v12  ;;  %v6387_v1 = vpop.f32.mrb[227].mxu0  ;;  %3880 = vrot.lane.b32.xlu0 %v8980_v10, %s7043_s26  ;;  %3932 = vrot.lane.b32.xlu1 %v8980_v10, %s7045_s19 }
 0x35d   : > { %6911 = vpow2.f32 %v4525_v51  ;;  %v4527_v21 = vmul.f32 1.442695, %v4508_v58 }
 0x35e   : > { %v3547_v30 = vmin.f32 %v3439_v27, 0.0  ;;  %v3440_v24 = vadd.f32 %v8937_v32, %v3380_v29  ;;  %vm3493_vm13 = vcmp.gt.f32.partialorder %v3439_v27, 0.0 }
 0x35f   : > { %6913 = vpow2.f32 %v4527_v21 }
 0x360   : > { %v3637_v53 = vmul.f32 1.442695, %v3547_v30  ;;  %v3548_v31 = vmin.f32 %v3440_v24, 0.0  ;;  %vm3494_vm14 = vcmp.gt.f32.partialorder %v3440_v24, 0.0 }
 0x361   : > { %v3098_v39 = vpop.f32.mrb[228].mxu0 }
 0x362   : > { %6915 = vpow2.f32 %v3637_v53  ;;  %v3639_v50 = vmul.f32 1.442695, %v3548_v31  ;;  %v6390_v49 = vpop.f32.mrb[229].mxu0 }
 0x363   : > { %v3101_v9 = vpop.f32.mrb[230].mxu0 }
 0x364   : > { %6917 = vpow2.f32 %v3639_v50  ;;  %v6391_v3 = vpop.f32.mrb[231].mxu0 }
 0x367   : > { %v6912_v5 = vpop.eup %6911 }
 0x368   : > { %v5932_v40 = vadd.f32 -1.0, %v6912_v5 }
 0x369   : > { %v6914_v17 = vpop.eup %6913  ;;  %v3106_v14 = vpop.f32.mrb[232].mxu0 }
 0x36a   : > { %v5933_v22 = vadd.f32 -1.0, %v6914_v17  ;;  %v3327_v28 = vmax.f32 %v3098_v39, %v3106_v14  ;;  %v6394_v7 = vpop.f32.mrb[233].mxu0  ;;  %v4579_v19 = vsel %vm4489_vm11, %v4471_v48, %v5932_v40 }
 0x36b   : > { %v3109_v61 = vpop.f32.mrb[234].mxu0 }
 0x36c   : > { %v4580_v56 = vsel %vm4490_vm12, %v4472_v55, %v5933_v22  ;;  %v8988_v37 = vpop.f32.mrb[80].mxu1  ;;  %v6916_v46 = vpop.eup %6915  ;;  %v3328_v34 = vmax.f32 %v3101_v9, %v3109_v61  ;;  %vm4801_vm12 = vcmask 1042432  }
 0x36d   : > { %v6395_v45 = vpop.f32.mrb[235].mxu0  ;;  %v6508_v33 = vpop.f32.mrb[81].mxu1  ;;  %v8990_v54 = vpack.c.bf16 %v4580_v56, %v4579_v19  ;;  %v5881_v63 = vadd.f32 -1.0, %v6916_v46 }
 0x36e   : > { %v8992_v35 = vpop.f32.mrb[82].mxu1  ;;  %v6918_v25 = vpop.eup %6917 }
 0x36f   : > { %v6509_v59 = vpop.f32.mrb[83].mxu1  ;;  %v5882_v57 = vadd.f32 -1.0, %v6918_v25  ;;  %v3925_v48 = vpop.permute.xlu1 %3924  ;;  %v3763_v42 = vsel %vm3493_vm13, %v3439_v27, %v5881_v63 }
 0x370   : > { %v4061_v55 = vsel %vm4035_vm8, %v3992_v2, %v3925_v48  ;;  %v3873_v5 = vpop.permute.xlu0 %3872 }
 0x371   : > { %v3764_v51 = vsel %vm3494_vm14, %v3440_v24, %v5882_v57  ;;  %6543 = vmatmul.mubr.msk.bf16.gmra.mrb[116].mxu1 %vm4119_vm9, %v4061_v55  ;;  %v3114_v58 = vpop.f32.mrb[236].mxu0  ;;  %v3995_v63 = vsel %vm3954_vm7, %v8834_v23, %v3873_v5 }
 0x372   : > { %v3381_v0 = vmax.f32 %v3327_v28, %v3114_v58  ;;  %v6398_v43 = vpop.f32.mrb[237].mxu0  ;;  %v8998_v12 = vpack.c.bf16 %v3764_v51, %v3763_v42  ;;  %6546 = vmatprep.mubr.msk.bf16.mxu1 %vm7039_vm1, %v9543_v36 }
 0x373   : > { %v3117_v21 = vpop.f32.mrb[238].mxu0 }
 0x374   : > { %v3441_v11 = vadd.f32 %v8937_v32, %v3381_v0  ;;  %v3382_v29 = vmax.f32 %v3328_v34, %v3117_v21  ;;  %3882 = vrot.lane.b32.xlu0 %v8998_v12, %s7043_s26  ;;  %3934 = vrot.lane.b32.xlu1 %v8998_v12, %s7045_s19  ;;  %v6399_v27 = vpop.f32.mrb[239].mxu0 }
 0x376   : > { %v3549_v1 = vmin.f32 %v3441_v11, 0.0  ;;  %v3442_v30 = vadd.f32 %v8937_v32, %v3382_v29  ;;  %vm3495_vm15 = vcmp.gt.f32.partialorder %v3441_v11, 0.0 }
 0x378   : > { %v3641_v24 = vmul.f32 1.442695, %v3549_v1  ;;  %v3550_v53 = vmin.f32 %v3442_v30, 0.0  ;;  %vm3496_vm5 = vcmp.gt.f32.partialorder %v3442_v30, 0.0 }
 0x379   : > { %v3122_v31 = vpop.f32.mrb[240].mxu0 }
 0x37a   : > { %6919 = vpow2.f32 %v3641_v24  ;;  %v3643_v39 = vmul.f32 1.442695, %v3550_v53  ;;  %v6402_v50 = vpop.f32.mrb[241].mxu0 }
 0x37b   : > { %v3125_v49 = vpop.f32.mrb[242].mxu0 }
 0x37c   : > { %6921 = vpow2.f32 %v3643_v39  ;;  %v6403_v9 = vpop.f32.mrb[243].mxu0 }
 0x381   : > { %v3130_v3 = vpop.f32.mrb[244].mxu0 }
 0x382   : > { %v3329_v40 = vmax.f32 %v3122_v31, %v3130_v3  ;;  %v6406_v17 = vpop.f32.mrb[245].mxu0 }
 0x383   : > { %v3133_v22 = vpop.f32.mrb[246].mxu0 }
 0x384   : > { %v4246_v14 = vpop.f32.mrb[84].mxu1  ;;  %v6920_v20 = vpop.eup %6919  ;;  %v3330_v28 = vmax.f32 %v3125_v49, %v3133_v22 }
 0x385   : > { %v4431_v7 = vmax.f32 %v8988_v37, %v4246_v14  ;;  %v6407_v19 = vpop.f32.mrb[247].mxu0  ;;  %v6512_v56 = vpop.f32.mrb[85].mxu1  ;;  %v5883_v61 = vadd.f32 -1.0, %v6920_v20 }
 0x386   : > { %v4249_v46 = vpop.f32.mrb[86].mxu1  ;;  %v6922_v34 = vpop.eup %6921 }
 0x387   : > { %v4432_v45 = vmax.f32 %v8992_v35, %v4249_v46  ;;  %v6513_v33 = vpop.f32.mrb[87].mxu1  ;;  %v5884_v25 = vadd.f32 -1.0, %v6922_v34  ;;  %v3927_v59 = vpop.permute.xlu1 %3926  ;;  %v3765_v57 = vsel %vm3495_vm15, %v3441_v11, %v5883_v61 }
 0x388   : > { %v4063_v2 = vsel %vm4035_vm8, %v3995_v63, %v3927_v59 }
 0x389   : > { %v3766_v48 = vsel %vm3496_vm5, %v3442_v30, %v5884_v25  ;;  %6547 = vmatmul.mubr.msk.bf16.gmra.mrb[120].mxu1 %vm4119_vm9, %v4063_v2  ;;  %v3138_v37 = vpop.f32.mrb[248].mxu0 }
 0x38a   : > { %v3383_v55 = vmax.f32 %v3329_v40, %v3138_v37  ;;  %v6410_v42 = vpop.f32.mrb[249].mxu0  ;;  %v9014_v51 = vpack.c.bf16 %v3766_v48, %v3765_v57  ;;  %6550 = vmatprep.mubr.msk.bf16.mxu1 %vm7039_vm1, %v9543_v36 }
 0x38b   : > { %v3141_v35 = vpop.f32.mrb[250].mxu0 }
 0x38c   : > { %v3443_v23 = vadd.f32 %v8937_v32, %v3383_v55  ;;  %v3384_v58 = vmax.f32 %v3330_v28, %v3141_v35  ;;  %3884 = vrot.lane.b32.xlu0 %v9014_v51, %s7043_s26  ;;  %3936 = vrot.lane.b32.xlu1 %v9014_v51, %s7045_s19  ;;  %v6411_v0 = vpop.f32.mrb[251].mxu0 }
 0x38e   : > { %v3551_v43 = vmin.f32 %v3443_v23, 0.0  ;;  %v3444_v21 = vadd.f32 %v8937_v32, %v3384_v58  ;;  %vm3497_vm6 = vcmp.gt.f32.partialorder %v3443_v23, 0.0 }
 0x390   : > { %v3645_v11 = vmul.f32 1.442695, %v3551_v43  ;;  %v3552_v29 = vmin.f32 %v3444_v21, 0.0  ;;  %vm3498_vm2 = vcmp.gt.f32.partialorder %v3444_v21, 0.0 }
 0x391   : > { %v3146_v27 = vpop.f32.mrb[252].mxu0 }
 0x392   : > { %6923 = vpow2.f32 %v3645_v11  ;;  %v3647_v1 = vmul.f32 1.442695, %v3552_v29  ;;  %v3331_v30 = vmax.f32 %v3146_v27, %v8636_v4  ;;  %v6414_v24 = vpop.f32.mrb[253].mxu0  ;;  %v3875_v4 = vpop.permute.xlu0 %3874  ;;  %v6739_v27 = vld [vmem:[%s9526_s5] sm:$0xff]  }
 0x393   : > { %v3149_v53 = vpop.f32.mrb[254].mxu0  ;;  %4806 = vmatpush1.bf16.msra.mxu1 %v6739_v27 }
 0x394   : > { %6925 = vpow2.f32 %v3647_v1  ;;  %v3385_v31 = vmax.f32 %v3331_v30, %v8659_v44  ;;  %v3332_v39 = vmax.f32 %v3149_v53, %v8648_v62  ;;  %v6415_v50 = vpop.f32.mrb[255].mxu0  ;;  %4807 = vmatprep.subr.bf16.mxu1 %v9571_v16 }
 0x396   : > { %v3445_v49 = vadd.f32 %v8937_v32, %v3385_v31  ;;  %v3386_v9 = vmax.f32 %v3332_v39, %v8661_v41 }
 0x398   : > { %v3553_v3 = vmin.f32 %v3445_v49, 0.0  ;;  %v3446_v5 = vadd.f32 %v8937_v32, %v3386_v9  ;;  %v3998_v32 = vsel %vm3954_vm7, %v8868_v60, %v3875_v4  ;;  %vm3499_vm10 = vcmp.gt.f32.partialorder %v3445_v49, 0.0  ;;  %v6740_v9 = vld [vmem:[%s9526_s5 + $0x8] sm:$0xff]  }
 0x399   : > { %4808 = vmatpush1.bf16.msra.mxu1 %v6740_v9 }
 0x39a   : > { %v3649_v40 = vmul.f32 1.442695, %v3553_v3  ;;  %v3554_v17 = vmin.f32 %v3446_v5, 0.0  ;;  %vm3500_vm3 = vcmp.gt.f32.partialorder %v3446_v5, 0.0  ;;  %4809 = vmatprep.subr.bf16.mxu1 %v9571_v16 }
 0x39c   : > { %v4254_v22 = vpop.f32.mrb[88].mxu1  ;;  %v6924_v14 = vpop.eup %6923  ;;  %6927 = vpow2.f32 %v3649_v40  ;;  %v3651_v20 = vmul.f32 1.442695, %v3554_v17  ;;  %v6741_v17 = vld [vmem:[%s9526_s5 + $0x10] sm:$0xff]  }
 0x39d   : > { %v4449_v28 = vmax.f32 %v4431_v7, %v4254_v22  ;;  %v6516_v19 = vpop.f32.mrb[89].mxu1  ;;  %v5885_v44 = vadd.f32 -1.0, %v6924_v14  ;;  %4810 = vmatpush1.bf16.msra.mxu1 %v6741_v17  ;;  %v6743_v22 = vld [vmem:[%s9526_s5 + $0x20] sm:$0xff]   ;;  %v6744_v14 = vld [vmem:[%s9526_s5 + $0x28] sm:$0xff]  }
 0x39e   : > { %v4257_v56 = vpop.f32.mrb[90].mxu1  ;;  %v6926_v62 = vpop.eup %6925  ;;  %6929 = vpow2.f32 %v3651_v20  ;;  %4811 = vmatprep.subr.bf16.mxu1 %v9571_v16 }
 0x39f   : > { %v4473_v61 = vadd.f32 %v8970_v18, %v4449_v28  ;;  %v4450_v46 = vmax.f32 %v4432_v45, %v4257_v56  ;;  %v6517_v41 = vpop.f32.mrb[91].mxu1  ;;  %v5886_v34 = vadd.f32 -1.0, %v6926_v62  ;;  %v3929_v33 = vpop.permute.xlu1 %3928  ;;  %v3767_v59 = vsel %vm3497_vm6, %v3443_v23, %v5885_v44  ;;  %v6746_v44 = vld [vmem:[%s9526_s5 + $0x38] sm:$0xff]  }
 0x3a0   : > { %v4065_v7 = vsel %vm4035_vm8, %v3998_v32, %v3929_v33  ;;  %v3877_v53 = vpop.permute.xlu0 %3876  ;;  %v6748_v33 = vld [vmem:[%s9526_s5 + $0x48] ss:$0 sps:$4 sm:$0x77]   ;;  %vm4782_vm6 = vcmask 179200  }
 0x3a1   : > { %v4509_v63 = vmin.f32 %v4473_v61, 0.0  ;;  %v4474_v25 = vadd.f32 %v8970_v18, %v4450_v46  ;;  %v3768_v2 = vsel %vm3498_vm2, %v3444_v21, %v5886_v34  ;;  %6551 = vmatmul.mubr.msk.bf16.gmra.mrb[124].mxu1 %vm4119_vm9, %v4065_v7  ;;  %vm4491_vm4 = vcmp.gt.f32.partialorder %v4473_v61, 0.0  ;;  %v6747_v34 = vld [vmem:[%s9526_s5 + $0x40] sm:$0xff]  }
 0x3a2   : > { %v9036_v45 = vpack.c.bf16 %v3768_v2, %v3767_v59  ;;  %6554 = vmatprep.mubr.msk.bf16.mxu1 %vm7039_vm1, %v9543_v36  ;;  %v4001_v3 = vsel %vm3954_vm7, %v8898_v38, %v3877_v53  ;;  %v6742_v38 = vld [vmem:[%s9526_s5 + $0x18] sm:$0xff]   ;;  %vm4697_vm2 = vcmask 818176  }
 0x3a3   : > { %v4529_v57 = vmul.f32 1.442695, %v4509_v63  ;;  %v4510_v48 = vmin.f32 %v4474_v25, 0.0  ;;  %vm4492_vm11 = vcmp.gt.f32.partialorder %v4474_v25, 0.0  ;;  %4812 = vmatpush1.bf16.msra.mxu1 %v6742_v38 }
 0x3a4   : > { %3886 = vrot.lane.b32.xlu0 %v9036_v45, %s7043_s26  ;;  %3938 = vrot.lane.b32.xlu1 %v9036_v45, %s7045_s19 }
 0x3a5   : > { %6931 = vpow2.f32 %v4529_v57  ;;  %v4531_v60 = vmul.f32 1.442695, %v4510_v48  ;;  %4813 = vmatprep.subr.bf16.mxu1 %v9571_v16 }
 0x3a6   : > { %v6928_v37 = vpop.eup %6927 }
 0x3a7   : > { %6933 = vpow2.f32 %v4531_v60  ;;  %v5887_v55 = vadd.f32 -1.0, %v6928_v37  ;;  %4814 = vmatpush1.bf16.msra.mxu1 %v6743_v22 }
 0x3a8   : > { %v6930_v42 = vpop.eup %6929  ;;  %4815 = vmatprep.subr.bf16.mxu1 %v9571_v16 }
 0x3a9   : > { %v5888_v35 = vadd.f32 -1.0, %v6930_v42  ;;  %v3769_v23 = vsel %vm3499_vm10, %v3445_v49, %v5887_v55 }
 0x3ab   : > { %v3770_v58 = vsel %vm3500_vm3, %v3446_v5, %v5888_v35  ;;  %4816 = vmatpush1.bf16.msra.mxu1 %v6744_v14 }
 0x3ac   : > { %v9044_v0 = vpack.c.bf16 %v3770_v58, %v3769_v23  ;;  %4817 = vmatprep.subr.bf16.mxu1 %v9571_v16 }
 0x3ae   : > { %3888 = vrot.lane.b32.xlu0 %v9044_v0, %s7043_s26  ;;  %3940 = vrot.lane.b32.xlu1 %v9044_v0, %s7045_s19 }
 0x3af   : > { %v6932_v43 = vpop.eup %6931 }
 0x3b0   : > { %v5934_v21 = vadd.f32 -1.0, %v6932_v43 }
 0x3b1   : > { %v6934_v11 = vpop.eup %6933 }
 0x3b2   : > { %v5935_v29 = vadd.f32 -1.0, %v6934_v11  ;;  %3890 = vrot.lane.b32.xlu0 %v8824_v52, %s7043_s26  ;;  %3942 = vrot.lane.b32.xlu1 %v8824_v52, %s7045_s19  ;;  %v4581_v1 = vsel %vm4491_vm4, %v4473_v61, %v5934_v21 }
 0x3b4   : > { %v4582_v30 = vsel %vm4492_vm11, %v4474_v25, %v5935_v29  ;;  %v9057_v24 = vpop.f32.mrb[92].mxu1 }
 0x3b5   : > { %v6520_v31 = vpop.f32.mrb[93].mxu1  ;;  %v9059_v39 = vpack.c.bf16 %v4582_v30, %v4581_v1 }
 0x3b6   : > { %v9061_v50 = vpop.f32.mrb[94].mxu1  ;;  %3892 = vrot.lane.b32.xlu0 %v8858_v13, %s7043_s26  ;;  %3944 = vrot.lane.b32.xlu1 %v8858_v13, %s7045_s19  ;;  %v3931_v5 = vpop.permute.xlu1 %3930 }
 0x3b7   : > { %v6521_v49 = vpop.f32.mrb[95].mxu1  ;;  %v4067_v40 = vsel %vm4035_vm8, %v4001_v3, %v3931_v5  ;;  %v3879_v20 = vpop.permute.xlu0 %3878 }
 0x3b8   : > { %6555 = vmatmul.mubr.msk.bf16.gmra.mrb[128].mxu1 %vm4119_vm9, %v4067_v40  ;;  %v4004_v46 = vsel %vm3954_vm7, %v8930_v26, %v3879_v20  ;;  %v4803_v26 = vsel %vm4801_vm12, %v6748_v33, 0 }
 0x3b9   : > { %6558 = vmatprep.mubr.msk.bf16.mxu1 %vm7039_vm1, %v9543_v36 }
 0x3ba   : > { %3894 = vrot.lane.b32.xlu0 %v8890_v8, %s7043_s26  ;;  %3946 = vrot.lane.b32.xlu1 %v8890_v8, %s7045_s19 }
 0x3be   : > { %3896 = vrot.lane.b32.xlu0 %v8920_v6, %s7043_s26  ;;  %3948 = vrot.lane.b32.xlu1 %v8920_v6, %s7045_s19 }
 0x3c2   : > { %3898 = vrot.lane.b32.xlu0 %v8949_v15, %s7043_s26  ;;  %3950 = vrot.lane.b32.xlu1 %v8949_v15, %s7045_s19  ;;  %s7046_s26 = smov 100   ;;  %v6745_v15 = vld [vmem:[%s9526_s5 + $0x30] sm:$0xff]  }
 0x3c3   : > { %4818 = vmatpush1.bf16.msra.mxu1 %v6745_v15 }
 0x3c4   : > { %4819 = vmatprep.subr.bf16.mxu1 %v9571_v16 }
 0x3c6   : > { %4635 = vrot.lane.b32.xlu0 %v8990_v54, %s7045_s19  ;;  %3952 = vrot.lane.b32.xlu1 %v9571_v16, %s7045_s19 }
 0x3c7   : > { %4820 = vmatpush1.bf16.msra.mxu1 %v6746_v44 }
 0x3c8   : > { %4821 = vmatprep.subr.bf16.mxu1 %v9571_v16 }
 0x3ca   : > { %4637 = vrot.lane.b32.xlu0 %v9059_v39, %s7045_s19  ;;  %4653 = vrot.lane.b32.xlu1 %v9059_v39, %s7046_s26 }
 0x3cb   : > { %v4270_v4 = vpop.f32.mrb[96].mxu1  ;;  %4822 = vmatpush1.bf16.msra.mxu1 %v6747_v34 }
 0x3cc   : > { %v4433_v28 = vmax.f32 %v9057_v24, %v4270_v4  ;;  %v6524_v19 = vpop.f32.mrb[97].mxu1  ;;  %4823 = vmatprep.subr.bf16.mxu1 %v9571_v16 }
 0x3cd   : > { %v4273_v56 = vpop.f32.mrb[98].mxu1 }
 0x3ce   : > { %v4434_v62 = vmax.f32 %v9061_v50, %v4273_v56  ;;  %v6525_v61 = vpop.f32.mrb[99].mxu1  ;;  %v3933_v41 = vpop.permute.xlu1 %3932 }
 0x3cf   : > { %v4069_v32 = vsel %vm4035_vm8, %v4004_v46, %v3933_v41  ;;  %4824 = vmatpush1.bf16.msra.mxu1 %v4803_v26  ;;  %v3881_v25 = vpop.permute.xlu0 %3880 }
 0x3d0   : > { %6559 = vmatmul.mubr.msk.bf16.gmra.mrb[132].mxu1 %vm4119_vm9, %v4069_v32  ;;  %v4007_v37 = vsel %vm3954_vm7, %v8957_v47, %v3881_v25 }
 0x3d1   : > { %6562 = vmatprep.mubr.msk.bf16.mxu1 %vm7039_vm1, %v9543_v36 }
 0x3e3   : > { %v4278_v63 = vpop.f32.mrb[100].mxu1 }
 0x3e4   : > { %v4451_v7 = vmax.f32 %v4433_v28, %v4278_v63  ;;  %v6528_v59 = vpop.f32.mrb[101].mxu1 }
 0x3e5   : > { %v4281_v2 = vpop.f32.mrb[102].mxu1 }
 0x3e6   : > { %v4475_v57 = vadd.f32 %v8970_v18, %v4451_v7  ;;  %v4452_v48 = vmax.f32 %v4434_v62, %v4281_v2  ;;  %v6529_v60 = vpop.f32.mrb[103].mxu1  ;;  %v3935_v55 = vpop.permute.xlu1 %3934 }
 0x3e7   : > { %v4071_v23 = vsel %vm4035_vm8, %v4007_v37, %v3935_v55  ;;  %v3883_v24 = vpop.permute.xlu0 %3882 }
 0x3e8   : > { %v4511_v42 = vmin.f32 %v4475_v57, 0.0  ;;  %v4476_v35 = vadd.f32 %v8970_v18, %v4452_v48  ;;  %6563 = vmatmul.mubr.msk.bf16.gmra.mrb[136].mxu1 %vm4119_vm9, %v4071_v23  ;;  %vm4493_vm13 = vcmp.gt.f32.partialorder %v4475_v57, 0.0  ;;  %v4010_v9 = vsel %vm3954_vm7, %v8980_v10, %v3883_v24 }
 0x3e9   : > { %6566 = vmatprep.mubr.msk.bf16.mxu1 %vm7039_vm1, %v9543_v36 }
 0x3ea   : > { %v4533_v58 = vmul.f32 1.442695, %v4511_v42  ;;  %v4512_v43 = vmin.f32 %v4476_v35, 0.0  ;;  %vm4494_vm14 = vcmp.gt.f32.partialorder %v4476_v35, 0.0 }
 0x3ec   : > { %6935 = vpow2.f32 %v4533_v58  ;;  %v4535_v21 = vmul.f32 1.442695, %v4512_v43 }
 0x3ee   : > { %6937 = vpow2.f32 %v4535_v21 }
 0x3f6   : > { %v6936_v11 = vpop.eup %6935 }
 0x3f7   : > { %v5936_v29 = vadd.f32 -1.0, %v6936_v11 }
 0x3f8   : > { %v6938_v27 = vpop.eup %6937 }
 0x3f9   : > { %v5937_v47 = vadd.f32 -1.0, %v6938_v27  ;;  %v4583_v1 = vsel %vm4493_vm13, %v4475_v57, %v5936_v29 }
 0x3fb   : > { %v4584_v30 = vsel %vm4494_vm14, %v4476_v35, %v5937_v47 }
 0x3fc   : > { %v4286_v53 = vpop.f32.mrb[104].mxu1  ;;  %v9145_v31 = vpack.c.bf16 %v4584_v30, %v4583_v1 }
 0x3fd   : > { %v6532_v50 = vpop.f32.mrb[105].mxu1 }
 0x3fe   : > { %v4289_v49 = vpop.f32.mrb[106].mxu1  ;;  %4639 = vrot.lane.b32.xlu0 %v9145_v31, %s7045_s19  ;;  %4655 = vrot.lane.b32.xlu1 %v9145_v31, %s7046_s26  ;;  %v3937_v5 = vpop.permute.xlu1 %3936 }
 0x3ff   : > { %v6533_v3 = vpop.f32.mrb[107].mxu1  ;;  %v4073_v40 = vsel %vm4035_vm8, %v4010_v9, %v3937_v5  ;;  %v3885_v17 = vpop.permute.xlu0 %3884 }
 0x400   : > { %6567 = vmatmul.mubr.msk.bf16.gmra.mrb[140].mxu1 %vm4119_vm9, %v4073_v40  ;;  %v4013_v4 = vsel %vm3954_vm7, %v8998_v12, %v3885_v17 }
 0x401   : > { %6570 = vmatprep.mubr.msk.bf16.mxu1 %vm7039_vm1, %v9543_v36 }
 0x414   : > { %v4294_v38 = vpop.f32.mrb[108].mxu1 }
 0x415   : > { %v4435_v22 = vmax.f32 %v4286_v53, %v4294_v38  ;;  %v6536_v14 = vpop.f32.mrb[109].mxu1 }
 0x416   : > { %v4297_v15 = vpop.f32.mrb[110].mxu1  ;;  %v3939_v10 = vpop.permute.xlu1 %3938 }
 0x417   : > { %v4436_v20 = vmax.f32 %v4289_v49, %v4297_v15  ;;  %v6537_v28 = vpop.f32.mrb[111].mxu1  ;;  %v4075_v19 = vsel %vm4035_vm8, %v4013_v4, %v3939_v10  ;;  %v3887_v44 = vpop.permute.xlu0 %3886 }
 0x418   : > { %6571 = vmatmul.mubr.msk.bf16.gmra.mrb[144].mxu1 %vm4119_vm9, %v4075_v19  ;;  %v4016_v56 = vsel %vm3954_vm7, %v9014_v51, %v3887_v44 }
 0x419   : > { %6574 = vmatprep.mubr.msk.bf16.mxu1 %vm7039_vm1, %v9543_v36 }
 0x420   : > { %v3941_v62 = vpop.permute.xlu1 %3940  ;;  %v3889_v12 = vpop.permute.xlu0 %3888 }
 0x421   : > { %v4077_v61 = vsel %vm4035_vm8, %v4016_v56, %v3941_v62  ;;  %v4019_v41 = vsel %vm3954_vm7, %v9036_v45, %v3889_v12 }
 0x422   : > { %6575 = vmatmul.mubr.msk.bf16.gmra.mrb[148].mxu1 %vm4119_vm9, %v4077_v61 }
 0x423   : > { %6578 = vmatprep.mubr.msk.bf16.mxu1 %vm7039_vm1, %v9543_v36 }
 0x424   : > { %v3943_v46 = vpop.permute.xlu1 %3942  ;;  %v3891_v34 = vpop.permute.xlu0 %3890 }
 0x425   : > { %v4079_v32 = vsel %vm4035_vm8, %v4019_v41, %v3943_v46  ;;  %v4022_v45 = vsel %vm3954_vm7, %v9044_v0, %v3891_v34 }
 0x428   : > { %v3945_v63 = vpop.permute.xlu1 %3944  ;;  %v3893_v42 = vpop.permute.xlu0 %3892 }
 0x429   : > { %v4081_v57 = vsel %vm4035_vm8, %v4022_v45, %v3945_v63  ;;  %v4025_v0 = vsel %vm3954_vm7, %v8824_v52, %v3893_v42 }
 0x42a   : > { %6579 = vmatmul.mubr.msk.bf16.gmra.mrb[152].mxu1 %vm4119_vm9, %v4079_v32 }
 0x42b   : > { %6582 = vmatprep.mubr.msk.bf16.mxu1 %vm7039_vm1, %v9543_v36 }
 0x42c   : > { %v4302_v51 = vpop.f32.mrb[112].mxu1  ;;  %v3947_v23 = vpop.permute.xlu1 %3946 }
 0x42d   : > { %v4453_v33 = vmax.f32 %v4435_v22, %v4302_v51  ;;  %v6540_v26 = vpop.f32.mrb[113].mxu1  ;;  %v4083_v58 = vsel %vm4035_vm8, %v4025_v0, %v3947_v23  ;;  %v3895_v43 = vpop.permute.xlu0 %3894 }
 0x42e   : > { %v4305_v25 = vpop.f32.mrb[114].mxu1  ;;  %v4028_v27 = vsel %vm3954_vm7, %v8858_v13, %v3895_v43 }
 0x42f   : > { %v4477_v7 = vadd.f32 %v8970_v18, %v4453_v33  ;;  %v4454_v59 = vmax.f32 %v4436_v20, %v4305_v25  ;;  %v6541_v2 = vpop.f32.mrb[115].mxu1 }
 0x430   : > { %v3949_v21 = vpop.permute.xlu1 %3948 }
 0x431   : > { %v4513_v48 = vmin.f32 %v4477_v7, 0.0  ;;  %v4478_v60 = vadd.f32 %v8970_v18, %v4454_v59  ;;  %v4085_v1 = vsel %vm4035_vm8, %v4028_v27, %v3949_v21  ;;  %vm4495_vm15 = vcmp.gt.f32.partialorder %v4477_v7, 0.0  ;;  %v3897_v50 = vpop.permute.xlu0 %3896 }
 0x432   : > { %6583 = vmatmul.mubr.msk.bf16.gmra.mrb[156].mxu1 %vm4119_vm9, %v4081_v57  ;;  %v4031_v40 = vsel %vm3954_vm7, %v8890_v8, %v3897_v50 }
 0x433   : > { %v4537_v37 = vmul.f32 1.442695, %v4513_v48  ;;  %v4514_v55 = vmin.f32 %v4478_v60, 0.0  ;;  %6586 = vmatprep.mubr.msk.bf16.mxu1 %vm7039_vm1, %v9543_v36  ;;  %vm4496_vm5 = vcmp.gt.f32.partialorder %v4478_v60, 0.0 }
 0x434   : > { %v3951_v3 = vpop.permute.xlu1 %3950 }
 0x435   : > { %6939 = vpow2.f32 %v4537_v37  ;;  %v4539_v35 = vmul.f32 1.442695, %v4514_v55  ;;  %v4087_v17 = vsel %vm4035_vm8, %v4031_v40, %v3951_v3  ;;  %v3899_v22 = vpop.permute.xlu0 %3898 }
 0x436   : > { %v4034_v14 = vsel %vm3954_vm7, %v8920_v6, %v3899_v22 }
 0x437   : > { %6941 = vpow2.f32 %v4539_v35 }
 0x438   : > { %v3953_v38 = vpop.permute.xlu1 %3952 }
 0x439   : > { %v4089_v15 = vsel %vm4035_vm8, %v4034_v14, %v3953_v38  ;;  %v4636_v8 = vpop.permute.xlu0 %4635 }
 0x43a   : > { %6587 = vmatmul.mubr.msk.bf16.gmra.mrb[160].mxu1 %vm4119_vm9, %v4083_v58  ;;  %v4672_v20 = vsel %vm4035_vm8, 0, %v4636_v8 }
 0x43b   : > { %6590 = vmatprep.mubr.msk.bf16.mxu1 %vm7039_vm1, %v9543_v36 }
 0x43c   : > { %v4654_v4 = vpop.permute.xlu1 %4653 }
 0x43d   : > { %v4699_v28 = vsel %vm4697_vm2, %v4672_v20, %v4654_v4  ;;  %v4638_v62 = vpop.permute.xlu0 %4637 }
 0x43e   : > { %v4675_v61 = vsel %vm4035_vm8, %v8990_v54, %v4638_v62 }
 0x43f   : > { %v6940_v11 = vpop.eup %6939 }
 0x440   : > { %v5938_v29 = vadd.f32 -1.0, %v6940_v11 }
 0x441   : > { %v6942_v47 = vpop.eup %6941 }
 0x442   : > { %v5939_v30 = vadd.f32 -1.0, %v6942_v47  ;;  %6591 = vmatmul.mubr.msk.bf16.gmra.mrb[164].mxu1 %vm4119_vm9, %v4085_v1  ;;  %v4585_v52 = vsel %vm4495_vm15, %v4477_v7, %v5938_v29 }
 0x443   : > { %6594 = vmatprep.mubr.msk.bf16.mxu1 %vm7039_vm1, %v9543_v36 }
 0x444   : > { %v4586_v24 = vsel %vm4496_vm5, %v4478_v60, %v5939_v30  ;;  %v4310_v53 = vpop.f32.mrb[116].mxu1 }
 0x445   : > { %v6544_v49 = vpop.f32.mrb[117].mxu1  ;;  %v9195_v9 = vpack.c.bf16 %v4586_v24, %v4585_v52 }
 0x446   : > { %v4313_v13 = vpop.f32.mrb[118].mxu1 }
 0x447   : > { %v6545_v5 = vpop.f32.mrb[119].mxu1  ;;  %4641 = vrot.lane.b32.xlu0 %v9195_v9, %s7045_s19  ;;  %4657 = vrot.lane.b32.xlu1 %v9195_v9, %s7046_s26 }
 0x44a   : > { %6595 = vmatmul.mubr.msk.bf16.gmra.mrb[168].mxu1 %vm4119_vm9, %v4087_v17 }
 0x44b   : > { %6598 = vmatprep.mubr.msk.bf16.mxu1 %vm7039_vm1, %v9543_v36 }
 0x452   : > { %6599 = vmatmul.mubr.msk.bf16.gmra.mrb[172].mxu1 %vm4119_vm9, %v4089_v15 }
 0x453   : > { %5960 = vmatprep.mubr.msk.bf16.mxu1 %vm4782_vm6, %v4654_v4 }
 0x45a   : > { %4838 = vmatmul.mubr.bf16.vlgmr.msra.gmra.mrb[176].mxu1 %v4699_v28 }
 0x45c   : > { %v4318_v36 = vpop.f32.mrb[120].mxu1 }
 0x45d   : > { %v4437_v10 = vmax.f32 %v4310_v53, %v4318_v36  ;;  %v6548_v19 = vpop.f32.mrb[121].mxu1 }
 0x45e   : > { %v4321_v44 = vpop.f32.mrb[122].mxu1 }
 0x45f   : > { %v4438_v6 = vmax.f32 %v4313_v13, %v4321_v44  ;;  %v6549_v56 = vpop.f32.mrb[123].mxu1 }
 0x470   : > { %v4656_v12 = vpop.permute.xlu1 %4655  ;;  %v4640_v1 = vpop.permute.xlu0 %4639 }
 0x471   : > { %5961 = vmatprep.mubr.msk.bf16.mxu1 %vm4782_vm6, %v4656_v12  ;;  %v4702_v46 = vsel %vm4697_vm2, %v4675_v61, %v4656_v12  ;;  %v4678_v30 = vsel %vm4035_vm8, %v9059_v39, %v4640_v1 }
 0x472   : > { %4846 = vmatmul.mubr.bf16.gmra.mrb[180].mxu1 %v4702_v46 }
 0x474   : > { %v4326_v41 = vpop.f32.mrb[124].mxu1 }
 0x475   : > { %v4455_v32 = vmax.f32 %v4437_v10, %v4326_v41  ;;  %v6552_v51 = vpop.f32.mrb[125].mxu1 }
 0x476   : > { %v4329_v34 = vpop.f32.mrb[126].mxu1 }
 0x477   : > { %v4479_v33 = vadd.f32 %v8970_v18, %v4455_v32  ;;  %v4456_v26 = vmax.f32 %v4438_v6, %v4329_v34  ;;  %v6553_v63 = vpop.f32.mrb[127].mxu1 }
 0x479   : > { %v4515_v25 = vmin.f32 %v4479_v33, 0.0  ;;  %v4480_v7 = vadd.f32 %v8970_v18, %v4456_v26  ;;  %vm4497_vm1 = vcmp.gt.f32.partialorder %v4479_v33, 0.0 }
 0x47b   : > { %v4541_v59 = vmul.f32 1.442695, %v4515_v25  ;;  %v4516_v2 = vmin.f32 %v4480_v7, 0.0  ;;  %vm4498_vm7 = vcmp.gt.f32.partialorder %v4480_v7, 0.0 }
 0x47d   : > { %6943 = vpow2.f32 %v4541_v59  ;;  %v4543_v54 = vmul.f32 1.442695, %v4516_v2 }
 0x47f   : > { %6945 = vpow2.f32 %v4543_v54 }
 0x487   : > { %v6944_v45 = vpop.eup %6943 }
 0x488   : > { %v5940_v57 = vadd.f32 -1.0, %v6944_v45 }
 0x489   : > { %v6946_v48 = vpop.eup %6945 }
 0x48a   : > { %v5941_v60 = vadd.f32 -1.0, %v6946_v48  ;;  %v4587_v37 = vsel %vm4497_vm1, %v4479_v33, %v5940_v57 }
 0x48b   : > { %v4334_v42 = vpop.f32.mrb[128].mxu1 }
 0x48c   : > { %v4588_v55 = vsel %vm4498_vm7, %v4480_v7, %v5941_v60  ;;  %v6556_v35 = vpop.f32.mrb[129].mxu1 }
 0x48d   : > { %v9220_v23 = vpack.c.bf16 %v4588_v55, %v4587_v37  ;;  %v4337_v0 = vpop.f32.mrb[130].mxu1 }
 0x48e   : > { %v6557_v58 = vpop.f32.mrb[131].mxu1 }
 0x48f   : > { %4643 = vrot.lane.b32.xlu0 %v9220_v23, %s7045_s19  ;;  %4659 = vrot.lane.b32.xlu1 %v9220_v23, %s7046_s26 }
 0x4a3   : > { %v4342_v43 = vpop.f32.mrb[132].mxu1 }
 0x4a4   : > { %v4439_v21 = vmax.f32 %v4334_v42, %v4342_v43  ;;  %v6560_v11 = vpop.f32.mrb[133].mxu1 }
 0x4a5   : > { %v4345_v29 = vpop.f32.mrb[134].mxu1 }
 0x4a6   : > { %v4440_v27 = vmax.f32 %v4337_v0, %v4345_v29  ;;  %v6561_v47 = vpop.f32.mrb[135].mxu1 }
 0x4b9   : > { %v4658_v52 = vpop.permute.xlu1 %4657  ;;  %v4642_v48 = vpop.permute.xlu0 %4641 }
 0x4ba   : > { %5962 = vmatprep.mubr.msk.bf16.mxu1 %vm4782_vm6, %v4658_v52  ;;  %v4705_v24 = vsel %vm4697_vm2, %v4678_v30, %v4658_v52  ;;  %v4681_v35 = vsel %vm4035_vm8, %v9145_v31, %v4642_v48 }
 0x4bb   : > { %4854 = vmatmul.mubr.bf16.gmra.mrb[184].mxu1 %v4705_v24  ;;  %v4350_v53 = vpop.f32.mrb[136].mxu1 }
 0x4bc   : > { %v4457_v50 = vmax.f32 %v4439_v21, %v4350_v53  ;;  %v6564_v49 = vpop.f32.mrb[137].mxu1 }
 0x4bd   : > { %v4353_v3 = vpop.f32.mrb[138].mxu1 }
 0x4be   : > { %v4481_v13 = vadd.f32 %v8970_v18, %v4457_v50  ;;  %v4458_v5 = vmax.f32 %v4440_v27, %v4353_v3  ;;  %v6565_v40 = vpop.f32.mrb[139].mxu1 }
 0x4c0   : > { %v4517_v17 = vmin.f32 %v4481_v13, 0.0  ;;  %v4482_v38 = vadd.f32 %v8970_v18, %v4458_v5  ;;  %vm4499_vm9 = vcmp.gt.f32.partialorder %v4481_v13, 0.0  ;;  %v7013_v5 = vld [vmem:[%s9525_s4] ss:$0 sm:$0xff] }
 0x4c2   : > { %v4545_v22 = vmul.f32 1.442695, %v4517_v17  ;;  %v4518_v14 = vmin.f32 %v4482_v38, 0.0  ;;  %vm4500_vm10 = vcmp.gt.f32.partialorder %v4482_v38, 0.0 }
 0x4c4   : > { %6947 = vpow2.f32 %v4545_v22  ;;  %v4547_v39 = vmul.f32 1.442695, %v4518_v14 }
 0x4c6   : > { %6949 = vpow2.f32 %v4547_v39 }
 0x4ce   : > { %v6948_v15 = vpop.eup %6947 }
 0x4cf   : > { %v5942_v4 = vadd.f32 -1.0, %v6948_v15 }
 0x4d0   : > { %v6950_v8 = vpop.eup %6949 }
 0x4d1   : > { %v5943_v20 = vadd.f32 -1.0, %v6950_v8  ;;  %v4589_v28 = vsel %vm4499_vm9, %v4481_v13, %v5942_v4  ;;  %vm5038_vm9 = vcmask 588800  }
 0x4d3   : > { %v4590_v36 = vsel %vm4500_vm10, %v4482_v38, %v5943_v20  ;;  %v4358_v10 = vpop.f32.mrb[140].mxu1  ;;  %vm6014_vm10 = vmneg %vm4697_vm2 }
 0x4d4   : > { %v6568_v19 = vpop.f32.mrb[141].mxu1  ;;  %v9232_v44 = vpack.c.bf16 %v4590_v36, %v4589_v28 }
 0x4d5   : > { %v4361_v6 = vpop.f32.mrb[142].mxu1 }
 0x4d6   : > { %v6569_v56 = vpop.f32.mrb[143].mxu1  ;;  %4645 = vrot.lane.b32.xlu0 %v9232_v44, %s7045_s19  ;;  %4661 = vrot.lane.b32.xlu1 %v9232_v44, %s7046_s26 }
 0x4eb   : > { %v4366_v62 = vpop.f32.mrb[144].mxu1 }
 0x4ec   : > { %v4441_v61 = vmax.f32 %v4358_v10, %v4366_v62  ;;  %v6572_v12 = vpop.f32.mrb[145].mxu1 }
 0x4ed   : > { %v4369_v46 = vpop.f32.mrb[146].mxu1 }
 0x4ee   : > { %v4442_v41 = vmax.f32 %v4361_v6, %v4369_v46  ;;  %v6573_v32 = vpop.f32.mrb[147].mxu1 }
 0x4f5   : > { %v4374_v51 = vpop.f32.mrb[148].mxu1 }
 0x4f6   : > { %v4459_v34 = vmax.f32 %v4441_v61, %v4374_v51  ;;  %v6576_v33 = vpop.f32.mrb[149].mxu1 }
 0x4f7   : > { %v4377_v26 = vpop.f32.mrb[150].mxu1 }
 0x4f8   : > { %v4483_v63 = vadd.f32 %v8970_v18, %v4459_v34  ;;  %v4460_v25 = vmax.f32 %v4442_v41, %v4377_v26  ;;  %v6577_v7 = vpop.f32.mrb[151].mxu1 }
 0x4fa   : > { %v4519_v59 = vmin.f32 %v4483_v63, 0.0  ;;  %v4484_v2 = vadd.f32 %v8970_v18, %v4460_v25  ;;  %vm4501_vm3 = vcmp.gt.f32.partialorder %v4483_v63, 0.0 }
 0x4fc   : > { %v4549_v54 = vmul.f32 1.442695, %v4519_v59  ;;  %v4520_v45 = vmin.f32 %v4484_v2, 0.0  ;;  %vm4502_vm4 = vcmp.gt.f32.partialorder %v4484_v2, 0.0 }
 0x4fd   : > { %v4382_v57 = vpop.f32.mrb[152].mxu1 }
 0x4fe   : > { %6951 = vpow2.f32 %v4549_v54  ;;  %v4551_v60 = vmul.f32 1.442695, %v4520_v45  ;;  %v6580_v37 = vpop.f32.mrb[153].mxu1 }
 0x4ff   : > { %v4385_v55 = vpop.f32.mrb[154].mxu1 }
 0x500   : > { %6953 = vpow2.f32 %v4551_v60  ;;  %v6581_v42 = vpop.f32.mrb[155].mxu1 }
 0x501   : > { %v4660_v0 = vpop.permute.xlu1 %4659 }
 0x502   : > { %5963 = vmatprep.mubr.msk.bf16.mxu1 %vm4782_vm6, %v4660_v0  ;;  %v4708_v58 = vsel %vm4697_vm2, %v4681_v35, %v4660_v0 }
 0x503   : > { %4862 = vmatmul.mubr.bf16.gmra.mrb[188].mxu1 %v4708_v58 }
 0x505   : > { %v4390_v18 = vpop.f32.mrb[156].mxu1 }
 0x506   : > { %v4443_v43 = vmax.f32 %v4382_v57, %v4390_v18  ;;  %v6584_v21 = vpop.f32.mrb[157].mxu1 }
 0x507   : > { %v4393_v11 = vpop.f32.mrb[158].mxu1 }
 0x508   : > { %v6952_v29 = vpop.eup %6951  ;;  %v4444_v27 = vmax.f32 %v4385_v55, %v4393_v11  ;;  %v6585_v47 = vpop.f32.mrb[159].mxu1 }
 0x509   : > { %v5944_v1 = vadd.f32 -1.0, %v6952_v29 }
 0x50a   : > { %v6954_v30 = vpop.eup %6953 }
 0x50b   : > { %v5945_v52 = vadd.f32 -1.0, %v6954_v30  ;;  %v4591_v24 = vsel %vm4501_vm3, %v4483_v63, %v5944_v1  ;;  %v4644_v1 = vpop.permute.xlu0 %4643 }
 0x50d   : > { %v4592_v31 = vsel %vm4502_vm4, %v4484_v2, %v5945_v52  ;;  %v4398_v53 = vpop.f32.mrb[160].mxu1 }
 0x50e   : > { %v4461_v50 = vmax.f32 %v4443_v43, %v4398_v53  ;;  %v6588_v49 = vpop.f32.mrb[161].mxu1  ;;  %v9244_v3 = vpack.c.bf16 %v4592_v31, %v4591_v24 }
 0x50f   : > { %v4401_v13 = vpop.f32.mrb[162].mxu1 }
 0x510   : > { %v4485_v40 = vadd.f32 %v7013_v5, %v4461_v50  ;;  %v4462_v17 = vmax.f32 %v4444_v27, %v4401_v13  ;;  %4647 = vrot.lane.b32.xlu0 %v9244_v3, %s7045_s19  ;;  %4663 = vrot.lane.b32.xlu1 %v9244_v3, %s7046_s26  ;;  %v6589_v38 = vpop.f32.mrb[163].mxu1  ;;  %v4684_v50 = vsel %vm4035_vm8, %v9195_v9, %v4644_v1  ;;  %v9274_v9 = vld [vmem:[%s9527_s6] ss:$0 sm:$0xff]  ;;  %v6763_v1 = vld [vmem:[%s9528_s7 + $0x44] ss:$8 sps:$4 sm:$0xff]  }
 0x512   : > { %v4521_v22 = vmin.f32 %v4485_v40, 0.0  ;;  %v4486_v14 = vadd.f32 %v7013_v5, %v4462_v17  ;;  %vm4503_vm11 = vcmp.gt.f32.partialorder %v4485_v40, 0.0 }
 0x514   : > { %v4553_v39 = vmul.f32 1.442695, %v4521_v22  ;;  %v4522_v15 = vmin.f32 %v4486_v14, 0.0  ;;  %vm4504_vm12 = vcmp.gt.f32.partialorder %v4486_v14, 0.0 }
 0x515   : > { %v4406_v4 = vpop.f32.mrb[164].mxu1 }
 0x516   : > { %6955 = vpow2.f32 %v4553_v39  ;;  %v4555_v8 = vmul.f32 1.442695, %v4522_v15  ;;  %v6592_v20 = vpop.f32.mrb[165].mxu1 }
 0x517   : > { %v4409_v28 = vpop.f32.mrb[166].mxu1 }
 0x518   : > { %6957 = vpow2.f32 %v4555_v8  ;;  %v6593_v36 = vpop.f32.mrb[167].mxu1 }
 0x51d   : > { %v4414_v10 = vpop.f32.mrb[168].mxu1 }
 0x51e   : > { %v4445_v19 = vmax.f32 %v4406_v4, %v4414_v10  ;;  %v6596_v6 = vpop.f32.mrb[169].mxu1 }
 0x51f   : > { %v4417_v56 = vpop.f32.mrb[170].mxu1 }
 0x520   : > { %v6956_v62 = vpop.eup %6955  ;;  %v4446_v61 = vmax.f32 %v4409_v28, %v4417_v56  ;;  %v6597_v12 = vpop.f32.mrb[171].mxu1 }
 0x521   : > { %v5946_v46 = vadd.f32 -1.0, %v6956_v62 }
 0x522   : > { %v6958_v41 = vpop.eup %6957 }
 0x523   : > { %v5947_v32 = vadd.f32 -1.0, %v6958_v41  ;;  %v4593_v51 = vsel %vm4503_vm11, %v4485_v40, %v5946_v46 }
 0x525   : > { %v4594_v34 = vsel %vm4504_vm12, %v4486_v14, %v5947_v32  ;;  %v4422_v33 = vpop.f32.mrb[172].mxu1 }
 0x526   : > { %v4463_v26 = vmax.f32 %v4445_v19, %v4422_v33  ;;  %v6600_v63 = vpop.f32.mrb[173].mxu1  ;;  %v9253_v25 = vpack.c.bf16 %v4594_v34, %v4593_v51 }
 0x527   : > { %v4425_v7 = vpop.f32.mrb[174].mxu1 }
 0x528   : > { %v4487_v59 = vadd.f32 %v7013_v5, %v4463_v26  ;;  %v4464_v2 = vmax.f32 %v4446_v61, %v4425_v7  ;;  %4649 = vrot.lane.b32.xlu0 %v9253_v25, %s7045_s19  ;;  %4665 = vrot.lane.b32.xlu1 %v9253_v25, %s7046_s26  ;;  %v6601_v54 = vpop.f32.mrb[175].mxu1 }
 0x52a   : > { %v4523_v45 = vmin.f32 %v4487_v59, 0.0  ;;  %v4488_v57 = vadd.f32 %v7013_v5, %v4464_v2  ;;  %vm4505_vm13 = vcmp.gt.f32.partialorder %v4487_v59, 0.0 }
 0x52c   : > { %v4557_v48 = vmul.f32 1.442695, %v4523_v45  ;;  %v4524_v60 = vmin.f32 %v4488_v57, 0.0  ;;  %vm4506_vm14 = vcmp.gt.f32.partialorder %v4488_v57, 0.0 }
 0x52d   : > { %v4839_v37 = vpop.f32.mrb[176].mxu1 }
 0x52e   : > { %6959 = vpow2.f32 %v4557_v48  ;;  %v4559_v55 = vmul.f32 1.442695, %v4524_v60  ;;  %v4841_v42 = vpop.f32.mrb[177].mxu1 }
 0x52f   : > { %v4842_v35 = vpop.f32.mrb[178].mxu1 }
 0x530   : > { %6961 = vpow2.f32 %v4559_v55  ;;  %v4844_v0 = vpop.f32.mrb[179].mxu1 }
 0x538   : > { %v6960_v58 = vpop.eup %6959 }
 0x539   : > { %v5948_v18 = vadd.f32 -1.0, %v6960_v58 }
 0x53a   : > { %v6962_v43 = vpop.eup %6961 }
 0x53b   : > { %v5949_v21 = vadd.f32 -1.0, %v6962_v43  ;;  %v4595_v11 = vsel %vm4505_vm13, %v4487_v59, %v5948_v18  ;;  %v6749_v18 = vld [vmem:[%s9528_s7] ss:$8 sps:$4 sm:$0xff]   ;;  %v6752_v43 = vld [vmem:[%s9528_s7 + $0x10] ss:$8 sps:$4 sm:$0xff]   ;;  %vm5591_vm13 = vcmask 261120  }
 0x53d   : > { %v4596_v29 = vsel %vm4506_vm14, %v4488_v57, %v5949_v21  ;;  %v6754_v21 = vld [vmem:[%s9528_s7 + $0x14] ss:$8 sps:$4 sm:$0xff]   ;;  %vm5606_vm14 = vcmask 7168  }
 0x53e   : > { %v4625_v27 = vpack.c.bf16 %v4596_v29, %v4595_v11  ;;  %v6755_v11 = vld [vmem:[%s9528_s7 + $0x20] ss:$8 sps:$4 sm:$0xff]   ;;  %v6757_v29 = vld [vmem:[%s9528_s7 + $0x24] ss:$8 sps:$4 sm:$0xff]  }
 0x540   : > { %4651 = vrot.lane.b32.xlu0 %v4625_v27, %s7045_s19  ;;  %4667 = vrot.lane.b32.xlu1 %v4625_v27, %s7046_s26  ;;  %v6760_v27 = vld [vmem:[%s9528_s7 + $0x34] ss:$8 sps:$4 sm:$0xff]   ;;  %s5678_s19 = sshll.u32 %s5671_s12, 1 }
 0x541   : > { %p1126_p8 = scmp.lt.s32.totalorder %s5678_s19, 3 }
 0x543   : > { %s9600_s19 = smov (!%p1126_p8, %s5678_s19), 3 }
 0x544   : > { %4669 = vrot.lane.b32.xlu1 %v9571_v16, %s7046_s26 }
 0x545   : > { %v4847_v47 = vpop.f32.mrb[180].mxu1 }
 0x546   : > { %v4910_v30 = vmax.f32 %v4839_v37, %v4847_v47  ;;  %v4849_v52 = vpop.f32.mrb[181].mxu1  ;;  %v6758_v47 = vld [vmem:[%s9528_s7 + $0x30] ss:$8 sps:$4 sm:$0xff]  }
 0x547   : > { %v4850_v24 = vpop.f32.mrb[182].mxu1  ;;  %v6766_v52 = vld [vmem:[%s9528_s7 + $0x54] ss:$8 sps:$4 sm:$0xff]  }
 0x548   : > { %v4911_v31 = vmax.f32 %v4842_v35, %v4850_v24  ;;  %v4852_v53 = vpop.f32.mrb[183].mxu1  ;;  %v4662_v49 = vpop.permute.xlu1 %4661  ;;  %v6764_v24 = vld [vmem:[%s9528_s7 + $0x50] ss:$8 sps:$4 sm:$0xff]  }
 0x549   : > { %5964 = vmatprep.mubr.msk.bf16.mxu1 %vm4782_vm6, %v4662_v49  ;;  %v4711_v13 = vsel %vm4697_vm2, %v4684_v50, %v4662_v49  ;;  %v4646_v5 = vpop.permute.xlu0 %4645  ;;  %v6767_v53 = vld [vmem:[%s9528_s7 + $0x60] ss:$8 sps:$4 sm:$0xff]   ;;  %v6772_v50 = vld [vmem:[%s9528_s7 + $0x74] ss:$8 sps:$4 sm:$0xff]   ;;  %v6770_v49 = vld [vmem:[%s9528_s7 + $0x70] ss:$8 sps:$4 sm:$0xff]  }
 0x54a   : > { %4870 = vmatmul.mubr.bf16.gmra.mrb[192].mxu1 %v4711_v13  ;;  %v4687_v40 = vsel %vm4035_vm8, %v9220_v23, %v4646_v5  ;;  %v6775_v13 = vld [vmem:[%s9528_s7 + $0x84] ss:$8 sps:$4 sm:$0xff]   ;;  %v6773_v5 = vld [vmem:[%s9528_s7 + $0x80] ss:$8 sps:$4 sm:$0xff]  }
 0x582   : > { %v4664_v17 = vpop.permute.xlu1 %4663  ;;  %v4648_v19 = vpop.permute.xlu0 %4647 }
 0x583   : > { %5965 = vmatprep.mubr.msk.bf16.mxu1 %vm4782_vm6, %v4664_v17  ;;  %v4714_v38 = vsel %vm4697_vm2, %v4687_v40, %v4664_v17  ;;  %v4690_v56 = vsel %vm4035_vm8, %v9232_v44, %v4648_v19  ;;  %v6778_v40 = vld [vmem:[%s9528_s7 + $0x94] ss:$8 sps:$4 sm:$0xff]   ;;  %v6776_v17 = vld [vmem:[%s9528_s7 + $0x90] ss:$8 sps:$4 sm:$0xff]  }
 0x584   : > { %4878 = vmatmul.mubr.bf16.gmra.mrb[196].mxu1 %v4714_v38  ;;  %v6781_v38 = vld [vmem:[%s9528_s7 + $0xa4] ss:$8 sps:$4 sm:$0xff]  }
 0x58e   : > { %v4855_v22 = vpop.f32.mrb[184].mxu1 }
 0x58f   : > { %v4916_v14 = vmax.f32 %v4910_v30, %v4855_v22  ;;  %v4857_v39 = vpop.f32.mrb[185].mxu1  ;;  %v6761_v30 = vld [vmem:[%s9528_s7 + $0x40] ss:$8 sps:$4 sm:$0xff]  }
 0x590   : > { %v4858_v15 = vpop.f32.mrb[186].mxu1  ;;  %v6779_v22 = vld [vmem:[%s9528_s7 + $0xa0] ss:$8 sps:$4 sm:$0xff]   ;;  %v6782_v39 = vld [vmem:[%s9528_s7 + $0xb0] ss:$8 sps:$4 sm:$0xff]  }
 0x591   : > { %v4928_v4 = vadd.f32 %v9274_v9, %v4916_v14  ;;  %v4917_v8 = vmax.f32 %v4911_v31, %v4858_v15  ;;  %v4860_v20 = vpop.f32.mrb[187].mxu1  ;;  %v6769_v31 = vld [vmem:[%s9528_s7 + $0x64] ss:$8 sps:$4 sm:$0xff]   ;;  %v6784_v14 = vld [vmem:[%s9528_s7 + $0xb4] ss:$8 sps:$4 sm:$0xff]  }
 0x592   : > { %v6787_v15 = vld [vmem:[%s9528_s7 + $0xc4] ss:$8 sps:$4 sm:$0xff]  }
 0x593   : > { %v4940_v23 = vmin.f32 %v4928_v4, 0.0  ;;  %v4929_v28 = vadd.f32 %v9274_v9, %v4917_v8  ;;  %vm4934_vm15 = vcmp.gt.f32.partialorder %v4928_v4, 0.0  ;;  %v6790_v8 = vld [vmem:[%s9528_s7 + $0xd4] ss:$8 sps:$4 sm:$0xff]  }
 0x595   : > { %v4946_v36 = vmul.f32 1.442695, %v4940_v23  ;;  %v4941_v10 = vmin.f32 %v4929_v28, 0.0  ;;  %vm4935_vm5 = vcmp.gt.f32.partialorder %v4929_v28, 0.0 }
 0x597   : > { %6963 = vpow2.f32 %v4946_v36  ;;  %v4948_v6 = vmul.f32 1.442695, %v4941_v10  ;;  %v6788_v10 = vld [vmem:[%s9528_s7 + $0xd0] ss:$8 sps:$4 sm:$0xff]  }
 0x599   : > { %6965 = vpow2.f32 %v4948_v6 }
 0x59a   : > { %v4666_v62 = vpop.permute.xlu1 %4665  ;;  %v4650_v44 = vpop.permute.xlu0 %4649 }
 0x59b   : > { %5966 = vmatprep.mubr.msk.bf16.mxu1 %vm4782_vm6, %v4666_v62  ;;  %v4717_v61 = vsel %vm4697_vm2, %v4690_v56, %v4666_v62  ;;  %v4693_v26 = vsel %vm4035_vm8, %v9244_v3, %v4650_v44  ;;  %v6793_v62 = vld [vmem:[%s9528_s7 + $0xe4] ss:$8 sps:$4 sm:$0xff]   ;;  %v6794_v44 = vld [vmem:[%s9528_s7 + $0xf0] ss:$8 sps:$4 sm:$0xff]  }
 0x59c   : > { %4886 = vmatmul.mubr.bf16.gmra.mrb[200].mxu1 %v4717_v61 }
 0x5a1   : > { %v6964_v12 = vpop.eup %6963 }
 0x5a2   : > { %v5970_v46 = vadd.f32 -1.0, %v6964_v12 }
 0x5a3   : > { %v6966_v41 = vpop.eup %6965 }
 0x5a4   : > { %v5971_v32 = vadd.f32 -1.0, %v6966_v41  ;;  %v4964_v51 = vsel %vm4934_vm15, %v4928_v4, %v5970_v46  ;;  %v6785_v4 = vld [vmem:[%s9528_s7 + $0xc0] ss:$8 sps:$4 sm:$0xff]  }
 0x5a5   : > { %v6791_v46 = vld [vmem:[%s9528_s7 + $0xe0] ss:$8 sps:$4 sm:$0xff]  }
 0x5a6   : > { %v4965_v34 = vsel %vm4935_vm5, %v4929_v28, %v5971_v32 }
 0x5a7   : > { %v9282_v33 = vpack.c.bf16 %v4965_v34, %v4964_v51  ;;  %v6796_v51 = vld [vmem:[%s9528_s7 + $0xf4] ss:$8 sps:$4 sm:$0xff]  }
 0x5a9   : > { %5015 = vrot.lane.b32.xlu0 %v9282_v33, %s7046_s26 }
 0x5b2   : > { %v4668_v63 = vpop.permute.xlu1 %4667  ;;  %v4652_v2 = vpop.permute.xlu0 %4651 }
 0x5b3   : > { %5967 = vmatprep.mubr.msk.bf16.mxu1 %vm4782_vm6, %v4668_v63  ;;  %v4720_v7 = vsel %vm4697_vm2, %v4693_v26, %v4668_v63  ;;  %v4696_v54 = vsel %vm4035_vm8, %v9253_v25, %v4652_v2  ;;  %v6751_v25 = vld [vmem:[%s9528_s7 + $0x4] ss:$8 sps:$4 sm:$0xff]  }
 0x5b4   : > { %4894 = vmatmul.mubr.bf16.gmra.mrb[204].mxu1 %v4720_v7  ;;  %5249 = vmatprep.subr.bf16.mxu1 %v6751_v25  ;;  %v6799_v26 = vld [vmem:[%s9528_s7 + $0x104] ss:$8 sps:$4 sm:$0xff]  }
 0x5b5   : > { %5250 = vmatpush1.bf16.msra.mxu1 %v6749_v18 }
 0x5b6   : > { %v4670_v59 = vpop.permute.xlu1 %4669  ;;  %5251 = vmatprep.subr.bf16.mxu1 %v6754_v21 }
 0x5b7   : > { %5968 = vmatprep.mubr.msk.bf16.mxu1 %vm4782_vm6, %v4670_v59  ;;  %v4723_v45 = vsel %vm4697_vm2, %v4696_v54, %v4670_v59 }
 0x5b9   : > { %5252 = vmatpush1.bf16.msra.mxu1 %v6752_v43 }
 0x5ba   : > { %5253 = vmatprep.subr.bf16.mxu1 %v6757_v29 }
 0x5bc   : > { %4902 = vmatmul.mubr.bf16.gmra.mrb[208].mxu1 %v4723_v45 }
 0x5bd   : > { %5254 = vmatpush1.bf16.msra.mxu1 %v6755_v11 }
 0x5be   : > { %5255 = vmatprep.subr.bf16.mxu1 %v6760_v27 }
 0x5c1   : > { %5256 = vmatpush1.bf16.msra.mxu1 %v6758_v47 }
 0x5c2   : > { %5257 = vmatprep.subr.bf16.mxu1 %v6763_v1 }
 0x5c5   : > { %5258 = vmatpush1.bf16.msra.mxu1 %v6761_v30 }
 0x5c6   : > { %5259 = vmatprep.subr.bf16.mxu1 %v6766_v52 }
 0x5c9   : > { %5260 = vmatpush1.bf16.msra.mxu1 %v6764_v24 }
 0x5ca   : > { %5261 = vmatprep.subr.bf16.mxu1 %v6769_v31 }
 0x5cd   : > { %5262 = vmatpush1.bf16.msra.mxu1 %v6767_v53 }
 0x5ce   : > { %5263 = vmatprep.subr.bf16.mxu1 %v6772_v50 }
 0x5d1   : > { %5264 = vmatpush1.bf16.msra.mxu1 %v6770_v49 }
 0x5d2   : > { %5265 = vmatprep.subr.bf16.mxu1 %v6775_v13 }
 0x5d5   : > { %5266 = vmatpush1.bf16.msra.mxu1 %v6773_v5 }
 0x5d6   : > { %v9294_v57 = vpop.f32.mrb[188].mxu1  ;;  %5267 = vmatprep.subr.bf16.mxu1 %v6778_v40 }
 0x5d7   : > { %v4865_v48 = vpop.f32.mrb[189].mxu1 }
 0x5d8   : > { %v9296_v3 = vpop.f32.mrb[190].mxu1 }
 0x5d9   : > { %v4868_v60 = vpop.f32.mrb[191].mxu1  ;;  %5268 = vmatpush1.bf16.msra.mxu1 %v6776_v17 }
 0x5da   : > { %5269 = vmatprep.subr.bf16.mxu1 %v6781_v38 }
 0x5dd   : > { %5270 = vmatpush1.bf16.msra.mxu1 %v6779_v22  ;;  %v6797_v22 = vld [vmem:[%s9528_s7 + $0x100] ss:$8 sps:$4 sm:$0xff]  }
 0x5de   : > { %5271 = vmatprep.subr.bf16.mxu1 %v6784_v14 }
 0x5e1   : > { %5272 = vmatpush1.bf16.msra.mxu1 %v6782_v39  ;;  %v6802_v39 = vld [vmem:[%s9528_s7 + $0x114] ss:$8 sps:$4 sm:$0xff]  }
 0x5e2   : > { %5273 = vmatprep.subr.bf16.mxu1 %v6787_v15  ;;  %v6800_v15 = vld [vmem:[%s9528_s7 + $0x110] ss:$8 sps:$4 sm:$0xff]  }
 0x5e5   : > { %5274 = vmatpush1.bf16.msra.mxu1 %v6785_v4  ;;  %v6803_v4 = vld [vmem:[%s9528_s7 + $0x124] ss:$8 sps:$4 sm:$0x3f]  }
 0x5e6   : > { %5275 = vmatprep.subr.bf16.mxu1 %v6790_v8  ;;  %v6805_v8 = vld [vmem:[%s9528_s7 + $0x120] ss:$8 sps:$4 sm:$0x3f]  }
 0x5e9   : > { %5276 = vmatpush1.bf16.msra.mxu1 %v6788_v10 }
 0x5ea   : > { %5277 = vmatprep.subr.bf16.mxu1 %v6793_v62 }
 0x5ed   : > { %5278 = vmatpush1.bf16.msra.mxu1 %v6791_v46  ;;  %v6809_v46 = vld [vmem:[%s9530_s9 + $0x18] sm:$0xff]  }
 0x5ee   : > { %5279 = vmatprep.subr.bf16.mxu1 %v6796_v51  ;;  %v6812_v51 = vld [vmem:[%s9530_s9 + $0x30] sm:$0xff]  }
 0x5f1   : > { %5280 = vmatpush1.bf16.msra.mxu1 %v6794_v44  ;;  %v6814_v44 = vld [vmem:[%s9530_s9 + $0x40] sm:$0xff]  }
 0x5f2   : > { %5312 = vmatprep.subr.bf16.mxu1 %v6799_v26  ;;  %v6815_v26 = vld [vmem:[%s9530_s9 + $0x48] sm:$0xff]  }
 0x61d   : > { %v4871_v37 = vpop.f32.mrb[192].mxu1 }
 0x61e   : > { %v4912_v55 = vmax.f32 %v9294_v57, %v4871_v37  ;;  %v4873_v42 = vpop.f32.mrb[193].mxu1 }
 0x61f   : > { %v9299_v35 = vpop.f32.mrb[194].mxu1 }
 0x620   : > { %v4913_v0 = vmax.f32 %v9296_v3, %v9299_v35  ;;  %v4876_v58 = vpop.f32.mrb[195].mxu1 }
 0x657   : > { %v4879_v20 = vpop.f32.mrb[196].mxu1 }
 0x658   : > { %v4918_v23 = vmax.f32 %v4912_v55, %v4879_v20  ;;  %v4881_v28 = vpop.f32.mrb[197].mxu1  ;;  %v5244_v20 = vsel %vm2604_vm0, %v6805_v8, 0 }
 0x659   : > { %v4882_v36 = vpop.f32.mrb[198].mxu1 }
 0x65a   : > { %v4930_v19 = vadd.f32 %v9274_v9, %v4918_v23  ;;  %v4919_v6 = vmax.f32 %v4913_v0, %v4882_v36  ;;  %v4884_v56 = vpop.f32.mrb[199].mxu1 }
 0x65c   : > { %v4942_v61 = vmin.f32 %v4930_v19, 0.0  ;;  %v4931_v12 = vadd.f32 %v9274_v9, %v4919_v6  ;;  %vm4936_vm8 = vcmp.gt.f32.partialorder %v4930_v19, 0.0 }
 0x65e   : > { %v4950_v41 = vmul.f32 1.442695, %v4942_v61  ;;  %v4943_v32 = vmin.f32 %v4931_v12, 0.0  ;;  %vm4937_vm6 = vcmp.gt.f32.partialorder %v4931_v12, 0.0  ;;  %v6806_v61 = vld [vmem:[%s9530_s9] sm:$0xff]  }
 0x660   : > { %6967 = vpow2.f32 %v4950_v41  ;;  %v4952_v34 = vmul.f32 1.442695, %v4943_v32  ;;  %v6810_v41 = vld [vmem:[%s9530_s9 + $0x20] sm:$0xff]   ;;  %v6811_v32 = vld [vmem:[%s9530_s9 + $0x28] sm:$0xff]  }
 0x662   : > { %6969 = vpow2.f32 %v4952_v34  ;;  %v6813_v34 = vld [vmem:[%s9530_s9 + $0x38] sm:$0xff]  }
 0x66a   : > { %v6968_v63 = vpop.eup %6967 }
 0x66b   : > { %v5972_v7 = vadd.f32 -1.0, %v6968_v63  ;;  %v6816_v63 = vld [vmem:[%s9530_s9 + $0x50] sm:$0xff]  }
 0x66c   : > { %v6970_v59 = vpop.eup %6969 }
 0x66d   : > { %v5973_v2 = vadd.f32 -1.0, %v6970_v59  ;;  %v4966_v54 = vsel %vm4936_vm8, %v4930_v19, %v5972_v7  ;;  %v6817_v7 = vld [vmem:[%s9530_s9 + $0x58] sm:$0xff]   ;;  %v6818_v59 = vld [vmem:[%s9530_s9 + $0x60] ss:$0 sps:$4 sm:$0xff]  }
 0x66f   : > { %v4967_v45 = vsel %vm4937_vm6, %v4931_v12, %v5973_v2  ;;  %v4887_v57 = vpop.f32.mrb[200].mxu1  ;;  %v6808_v12 = vld [vmem:[%s9530_s9 + $0x10] sm:$0xff]  }
 0x670   : > { %v4889_v48 = vpop.f32.mrb[201].mxu1  ;;  %v9404_v3 = vpack.c.bf16 %v4967_v45, %v4966_v54 }
 0x671   : > { %v4890_v60 = vpop.f32.mrb[202].mxu1 }
 0x672   : > { %5017 = vrot.lane.b32.xlu0 %v9404_v3, %s7046_s26  ;;  %5021 = vrot.lane.b32.xlu1 %v9404_v3, %s7047_s27  ;;  %v4892_v37 = vpop.f32.mrb[203].mxu1 }
 0x687   : > { %v4895_v55 = vpop.f32.mrb[204].mxu1 }
 0x688   : > { %v4914_v42 = vmax.f32 %v4887_v57, %v4895_v55  ;;  %v4897_v35 = vpop.f32.mrb[205].mxu1 }
 0x689   : > { %v4898_v0 = vpop.f32.mrb[206].mxu1 }
 0x68a   : > { %v4915_v58 = vmax.f32 %v4890_v60, %v4898_v0  ;;  %v4900_v25 = vpop.f32.mrb[207].mxu1 }
 0x68f   : > { %v4903_v18 = vpop.f32.mrb[208].mxu1 }
 0x690   : > { %v4920_v43 = vmax.f32 %v4914_v42, %v4903_v18  ;;  %v4905_v21 = vpop.f32.mrb[209].mxu1 }
 0x691   : > { %v4906_v11 = vpop.f32.mrb[210].mxu1 }
 0x692   : > { %v4932_v29 = vadd.f32 %v9274_v9, %v4920_v43  ;;  %v4921_v27 = vmax.f32 %v4915_v58, %v4906_v11  ;;  %v4908_v47 = vpop.f32.mrb[211].mxu1  ;;  %v5008_v43 = vld [vmem:[%s9529_s8] sm:$0x3] }
 0x694   : > { %v4944_v1 = vmin.f32 %v4932_v29, 0.0  ;;  %v4933_v30 = vadd.f32 %v9274_v9, %v4921_v27  ;;  %vm4938_vm1 = vcmp.gt.f32.partialorder %v4932_v29, 0.0  ;;  %v5016_v9 = vpop.permute.xlu0 %5015 }
 0x696   : > { %v4954_v52 = vmul.f32 1.442695, %v4944_v1  ;;  %v4945_v24 = vmin.f32 %v4933_v30, 0.0  ;;  %vm4939_vm7 = vcmp.gt.f32.partialorder %v4933_v30, 0.0 }
 0x698   : > { %6971 = vpow2.f32 %v4954_v52  ;;  %v4956_v31 = vmul.f32 1.442695, %v4945_v24 }
 0x69a   : > { %6973 = vpow2.f32 %v4956_v31 }
 0x6a2   : > { %v6972_v53 = vpop.eup %6971 }
 0x6a3   : > { %v5974_v50 = vadd.f32 -1.0, %v6972_v53 }
 0x6a4   : > { %v6974_v49 = vpop.eup %6973 }
 0x6a5   : > { %v5975_v13 = vadd.f32 -1.0, %v6974_v49  ;;  %v4968_v5 = vsel %vm4938_vm1, %v4932_v29, %v5974_v50 }
 0x6a7   : > { %v4969_v40 = vsel %vm4939_vm7, %v4933_v30, %v5975_v13 }
 0x6a8   : > { %v5011_v17 = vpack.c.bf16 %v4969_v40, %v4968_v5 }
 0x6aa   : > { %5019 = vrot.lane.b32.xlu0 %v5011_v17, %s7046_s26  ;;  %5023 = vrot.lane.b32.xlu1 %v5011_v17, %s7047_s27  ;;  %s5679_s26 = sshll.u32 %s9600_s19, 3 }
 0x6ab   : > { %s1129_s15 = scalar_lea.vmem %s9534_s13, %s5679_s26 }
 0x6ae   : > { %5025 = vrot.lane.b32.xlu1 %v9571_v16, %s7047_s27 }
 0x6e4   : > { %v5022_v38 = vpop.permute.xlu1 %5021  ;;  %v5018_v23 = vpop.permute.xlu0 %5017 }
 0x6e5   : > { %v5040_v14 = vsel %vm5038_vm9, %v5016_v9, %v5022_v38  ;;  %v5032_v10 = vsel %vm4697_vm2, %v9282_v33, %v5018_v23  ;;  %v6807_v33 = vld [vmem:[%s9530_s9 + $0x8] sm:$0xff]  }
 0x6e6   : > { %5281 = vmatprep.mubr.bf16.mxu1 %v5040_v14 }
 0x6e7   : > { %6015 = vmatmul.mubr.msk.bf16.vlgmr.msra.gmra.mrb[212].mxu1 %vm6014_vm10, %v5016_v9 }
 0x6e8   : > { %5313 = vmatpush1.bf16.msra.mxu1 %v6797_v22 }
 0x6e9   : > { %5314 = vmatprep.subr.bf16.mxu1 %v6802_v39 }
 0x6ec   : > { %5315 = vmatpush1.bf16.msra.mxu1 %v6800_v15 }
 0x6ed   : > { %6016 = vmatprep.subr.msk.bf16.mxu1 %vm2604_vm0, %v6803_v4  ;;  %vm5236_vm0 = vcmask 359424  }
 0x6f0   : > { %5317 = vmatpush1.bf16.msra.mxu1 %v5244_v20 }
 0x6f1   : > { %5540 = vmatprep.subr.bf16.mxu1 %v9571_v16 }
 0x71c   : > { %v5024_v28 = vpop.permute.xlu1 %5023  ;;  %v5020_v19 = vpop.permute.xlu0 %5019 }
 0x71d   : > { %v5043_v36 = vsel %vm5038_vm9, %v5018_v23, %v5024_v28  ;;  %v5036_v62 = vsel %vm4697_vm2, %v9404_v3, %v5020_v19  ;;  %vm5536_vm2 = vcmask 1043456   ;;  %v5384_v3 = vlaneseq }
 0x71e   : > { %5291 = vmatprep.mubr.bf16.mxu1 %v5043_v36  ;;  %v5538_v2 = vsel %vm5536_vm2, %v6818_v59, 0 }
 0x71f   : > { %5292 = vmatmul.mubr.bf16.gmra.mrb[216].mxu1 %v5032_v10  ;;  %v5385_v60 = vshrl.u32 %v5384_v3, 7 }
 0x720   : > { %v5026_v6 = vpop.permute.xlu1 %5025 }
 0x721   : > { %v5046_v56 = vsel %vm5038_vm9, %v5020_v19, %v5026_v6  ;;  %v5386_v25 = vsub.s32 0, %v5385_v60  ;;  %v5390_v21 = vsub.s32 1, %v5385_v60 }
 0x722   : > { %5301 = vmatprep.mubr.bf16.mxu1 %v5046_v56 }
 0x723   : > { %v5387_v11 = vrot.slane %v5008_v43, %v5386_v25  ;;  %v5391_v27 = vrot.slane %v5008_v43, %v5390_v21 }
 0x727   : > { %5302 = vmatmul.mubr.bf16.gmra.mrb[220].mxu1 %v5036_v62 }
 0x728   : > { %5344 = vmatprep.mubr.bf16.mxu1 %v9571_v16 }
 0x72f   : > { %6017 = vmatmul.mubr.msk.bf16.vlgmr.msra.gmra.mrb[212].mxu1 %vm5236_vm0, %v5022_v38 }
 0x730   : > { %5354 = vmatprep.mubr.bf16.mxu1 %v9571_v16  ;;  %5541 = vmatpush1.bf16.msra.mxu1 %v6806_v61 }
 0x731   : > { %5542 = vmatprep.subr.bf16.mxu1 %v9571_v16 }
 0x734   : > { %5543 = vmatpush1.bf16.msra.mxu1 %v6807_v33 }
 0x735   : > { %5544 = vmatprep.subr.bf16.mxu1 %v9571_v16 }
 0x737   : > { %6018 = vmatmul.mubr.msk.bf16.gmra.mrb[216].mxu1 %vm5236_vm0, %v5024_v28 }
 0x738   : > { %5364 = vmatprep.mubr.bf16.mxu1 %v9571_v16  ;;  %5545 = vmatpush1.bf16.msra.mxu1 %v6808_v12 }
 0x739   : > { %5546 = vmatprep.subr.bf16.mxu1 %v9571_v16 }
 0x73c   : > { %5547 = vmatpush1.bf16.msra.mxu1 %v6809_v46  ;;  %v6024_v46 = vld [vmem:[%s9531_s10] ss:$0 sm:$0xff] }
 0x73d   : > { %5548 = vmatprep.subr.bf16.mxu1 %v9571_v16 }
 0x73f   : > { %6019 = vmatmul.mubr.msk.bf16.gmra.mrb[220].mxu1 %vm5236_vm0, %v5026_v6 }
 0x740   : > { %5549 = vmatpush1.bf16.msra.mxu1 %v6810_v41 }
 0x741   : > { %5550 = vmatprep.subr.bf16.mxu1 %v9571_v16 }
 0x744   : > { %5551 = vmatpush1.bf16.msra.mxu1 %v6811_v32 }
 0x745   : > { %5552 = vmatprep.subr.bf16.mxu1 %v9571_v16 }
 0x748   : > { %5553 = vmatpush1.bf16.msra.mxu1 %v6812_v51 }
 0x749   : > { %5554 = vmatprep.subr.bf16.mxu1 %v9571_v16 }
 0x74c   : > { %5555 = vmatpush1.bf16.msra.mxu1 %v6813_v34  ;;  %v6039_v34 = vld [vmem:[%s9532_s11] ss:$0 sm:$0xff] }
 0x74d   : > { %5556 = vmatprep.subr.bf16.mxu1 %v9571_v16 }
 0x750   : > { %5557 = vmatpush1.bf16.msra.mxu1 %v6814_v44 }
 0x751   : > { %5558 = vmatprep.subr.bf16.mxu1 %v9571_v16 }
 0x754   : > { %5559 = vmatpush1.bf16.msra.mxu1 %v6815_v26 }
 0x755   : > { %5560 = vmatprep.subr.bf16.mxu1 %v9571_v16 }
 0x758   : > { %5561 = vmatpush1.bf16.msra.mxu1 %v6816_v63 }
 0x759   : > { %5562 = vmatprep.subr.bf16.mxu1 %v9571_v16 }
 0x75c   : > { %5563 = vmatpush1.bf16.msra.mxu1 %v6817_v7 }
 0x75d   : > { %5564 = vmatprep.subr.bf16.mxu1 %v9571_v16 }
 0x760   : > { %5565 = vmatpush1.bf16.msra.mxu1 %v5538_v2 }
 0x802   : > { %v5346_v54 = vpop.f32.mrb[212].mxu1 }
 0x803   : > { %v5348_v45 = vpop.f32.mrb[213].mxu1 }
 0x804   : > { %v5350_v57 = vpop.f32.mrb[214].mxu1 }
 0x805   : > { %v5352_v48 = vpop.f32.mrb[215].mxu1 }
 0x80a   : > { %v5356_v37 = vpop.f32.mrb[216].mxu1 }
 0x80b   : > { %v5375_v55 = vmax.f32 %v5346_v54, %v5356_v37  ;;  %v5358_v42 = vpop.f32.mrb[217].mxu1 }
 0x80c   : > { %v5376_v35 = vmax.f32 %v5348_v45, %v5358_v42  ;;  %v5360_v0 = vpop.f32.mrb[218].mxu1 }
 0x80d   : > { %v5377_v58 = vmax.f32 %v5350_v57, %v5360_v0  ;;  %v5362_v16 = vpop.f32.mrb[219].mxu1 }
 0x80e   : > { %v5378_v18 = vmax.f32 %v5352_v48, %v5362_v16  ;;  %v6040_v48 = vld [vmem:[#allocation2] ss:$0 sm:$0xff] }
 0x812   : > { %v5366_v29 = vpop.f32.mrb[220].mxu1 }
 0x813   : > { %v5379_v47 = vmax.f32 %v5375_v55, %v5366_v29  ;;  %v5368_v1 = vpop.f32.mrb[221].mxu1 }
 0x814   : > { %v5380_v30 = vmax.f32 %v5376_v35, %v5368_v1  ;;  %v5370_v52 = vpop.f32.mrb[222].mxu1 }
 0x815   : > { %v5394_v24 = vadd.f32 %v5387_v11, %v5379_v47  ;;  %v5381_v31 = vmax.f32 %v5377_v58, %v5370_v52  ;;  %v5372_v53 = vpop.f32.mrb[223].mxu1 }
 0x816   : > { %v5395_v50 = vadd.f32 %v5391_v27, %v5380_v30  ;;  %v5382_v49 = vmax.f32 %v5378_v18, %v5372_v53 }
 0x817   : > { %v5402_v13 = vmin.f32 %v5394_v24, 0.0  ;;  %v5396_v5 = vadd.f32 %v5387_v11, %v5381_v31  ;;  %vm5398_vm3 = vcmp.gt.f32.partialorder %v5394_v24, 0.0 }
 0x818   : > { %v5403_v40 = vmin.f32 %v5395_v50, 0.0  ;;  %v5397_v17 = vadd.f32 %v5391_v27, %v5382_v49  ;;  %vm5399_vm11 = vcmp.gt.f32.partialorder %v5395_v50, 0.0 }
 0x819   : > { %v5406_v9 = vmul.f32 1.442695, %v5402_v13  ;;  %v5404_v38 = vmin.f32 %v5396_v5, 0.0  ;;  %vm5400_vm4 = vcmp.gt.f32.partialorder %v5396_v5, 0.0 }
 0x81a   : > { %v5408_v22 = vmul.f32 1.442695, %v5403_v40  ;;  %v5405_v14 = vmin.f32 %v5397_v17, 0.0  ;;  %vm5401_vm12 = vcmp.gt.f32.partialorder %v5397_v17, 0.0 }
 0x81b   : > { %6975 = vpow2.f32 %v5406_v9  ;;  %v5410_v39 = vmul.f32 1.442695, %v5404_v38 }
 0x81c   : > { %6977 = vpow2.f32 %v5408_v22  ;;  %v5412_v15 = vmul.f32 1.442695, %v5405_v14 }
 0x81d   : > { %6979 = vpow2.f32 %v5410_v39 }
 0x81e   : > { %6981 = vpow2.f32 %v5412_v15 }
 0x825   : > { %v6976_v4 = vpop.eup %6975 }
 0x826   : > { %v6978_v8 = vpop.eup %6977  ;;  %v6020_v20 = vadd.f32 -1.0, %v6976_v4 }
 0x827   : > { %v6980_v23 = vpop.eup %6979  ;;  %v6021_v28 = vadd.f32 -1.0, %v6978_v8 }
 0x828   : > { %v6982_v36 = vpop.eup %6981  ;;  %v6022_v10 = vadd.f32 -1.0, %v6980_v23  ;;  %v5418_v6 = vsel %vm5398_vm3, %v5394_v24, %v6020_v20 }
 0x829   : > { %v6023_v19 = vadd.f32 -1.0, %v6982_v36  ;;  %v5419_v62 = vsel %vm5399_vm11, %v5395_v50, %v6021_v28 }
 0x82a   : > { %v5420_v56 = vsel %vm5400_vm4, %v5396_v5, %v6022_v10 }
 0x82b   : > { %v5450_v61 = vpack.c.bf16 %v5420_v56, %v5418_v6  ;;  %v5421_v33 = vsel %vm5401_vm12, %v5397_v17, %v6023_v19 }
 0x82c   : > { %v5451_v12 = vpack.c.bf16 %v5421_v33, %v5419_v62 }
 0x82e   : > { %6038 = vmatprep.mubr.msk.bf16.mxu1 %vm5038_vm9, %v5451_v12 }
 0x82f   : > { %5573 = vmatmul.mubr.bf16.vlgmr.msra.gmra.mrb[224].mxu1 %v5450_v61 }
 0x902   : > { %v5574_v41 = vpop.f32.mrb[224].mxu1 }
 0x903   : > { %v5575_v32 = vadd.f32 %v6024_v46, %v5574_v41  ;;  %v5576_v51 = vpop.f32.mrb[225].mxu1 }
 0x904   : > { %v5577_v44 = vpop.f32.mrb[226].mxu1 }
 0x905   : > { %v5581_v26 = vmax.f32 %v5575_v32, 0.0  ;;  %v5578_v63 = vadd.f32 %v6024_v46, %v5577_v44  ;;  %v5579_v7 = vpop.f32.mrb[227].mxu1 }
 0x907   : > { %v5589_v59 = vmul.f32 %v6039_v34, %v5581_v26  ;;  %v5582_v2 = vmax.f32 %v5578_v63, 0.0 }
 0x909   : > { %v5590_v54 = vmul.f32 %v6039_v34, %v5582_v2  ;;  %v5592_v45 = vsel %vm5591_vm13, %v5589_v59, 0.0 }
 0x90a   : > { %5593 = vadd.xlane.f32.xlu0 %v5592_v45 }
 0x90b   : > { %v5595_v57 = vsel %vm5591_vm13, %v5590_v54, 0.0 }
 0x90c   : > { %5596 = vadd.xlane.f32.xlu1 %v5595_v57 }
 0x997   : > { %v5594_v3 = vpop.xlane.xlu0 %5593 }
 0x998   : > { %v5604_v60 = vadd.f32 %v6040_v48, %v5594_v3 }
 0x999   : > { %v5597_v37 = vpop.xlane.xlu1 %5596 }
 0x99a   : > { %5607 = vst.msk [vmem:[%s1129_s15] sm:$0xff] %vm5606_vm14, %v5604_v60  ;;  %v5605_v55 = vadd.f32 %v6040_v48, %v5597_v37 }
 0x99c   : > { %5608 = vst.msk [vmem:[%s1129_s15 + $0x8] sm:$0xff] %vm5606_vm14, %v5605_v55 }
 0x99d PF: > { %p22_p9 = scmp.ge.s32.totalorder %s7138_s30, 4   ;;  %s9596_s27 = smov %s7032_s28 }
 0x99e   : > { %s9597_s28 = smov %s7147_s16  ;;  %s9598_s29 = smov %s7138_s30 }
 0x99f   :  { %24 = sbr.rel (!%p22_p9) target bundleno = 5 (0x5), region = 148 }

</bundles_post_ra>
